<compile_context>
chip_gen: v6e
topology: v6e:2x2x1
jax: 0.10.0
libtpu: 0.0.40
codegen_flags: <defaults>
</compile_context>

<pallas_src>
import math
import functools

import jax
import jax.numpy as jnp
from jax.experimental import pallas as pl
from jax.experimental.pallas import tpu as pltpu


def _siren_kernel(n_hidden, *refs):
    # refs = (x_ref, w0, b0, [w_h, b_h]*n_hidden, wf, bf, o_ref)
    x_ref = refs[0]
    o_ref = refs[-1]
    p = refs[1:-1]

    # x tile is (2, block_n): row 0 = x coords, row 1 = y coords.
    x0 = x_ref[0:1, :].astype(jnp.float32)          # (1, block_n)
    x1 = x_ref[1:2, :].astype(jnp.float32)          # (1, block_n)

    # First SIREN layer (omega folded into w0): two broadcast FMAs on the VPU.
    w0 = p[0][...]                                   # (H, 2)  (= first_omega * W0)
    b0 = p[1][...]                                   # (H, 1)
    h = jnp.sin(w0[:, 0:1] * x0 + w0[:, 1:2] * x1 + b0)   # (H, block_n)

    # Hidden SIREN layers: sin((omega*Wk) @ h + bk), PyTorch (out,in) weights
    # multiply the column-major activations directly -> no transposes.
    for k in range(n_hidden):
        wk = p[2 + 2 * k][...]                       # (H, H)  (= hidden_omega * Wk)
        bk = p[3 + 2 * k][...]                       # (H, 1)
        h = jnp.sin(jnp.dot(wk, h, preferred_element_type=jnp.float32) + bk)

    # Final plain linear layer (out_features = 1): multiply + sublane reduce.
    wf = p[-2][...]                                  # (H, 1)
    bf = p[-1][...]                                  # (1, 1)
    y = jnp.sum(wf * h, axis=0, keepdims=True) + bf  # (1, block_n) lane-dense
    o_ref[...] = y.astype(o_ref.dtype)


def image_siren_forward(x, params, *, first_omega=30.0, hidden_omega=30.0,
                        block_n=512):
    """x: (N, 2) f32 coordinates. params: flat list
    [W0 (H,2), b0 (1,H), (Wk (H,H), bk (1,H))*n_hidden, Wf (1,H), bf (1,1)]
    in PyTorch nn.Linear (out, in) convention. Returns (N, 1) f32."""
    assert block_n % 128 == 0, "block_n must be a multiple of 128 (lane width)"
    N, in_features = x.shape
    assert in_features == 2
    n_hidden = (len(params) - 4) // 2
    H = params[0].shape[0]

    # Pad N up to a multiple of block_n (handles real image pixel counts).
    n_blocks = pl.cdiv(N, block_n)
    n_pad = n_blocks * block_n

    # Wrapper-side layout plumbing: transpose coords to (2, N_pad), fold omega
    # into the weights (NOT the biases), reshape biases to column vectors.
    xt = x.T.astype(jnp.float32)                       # (2, N)
    if n_pad != N:
        xt = jnp.pad(xt, ((0, 0), (0, n_pad - N)))

    kparams = []
    kparams.append((first_omega * params[0]).astype(jnp.float32))     # (H, 2)
    kparams.append(params[1].reshape(H, 1).astype(jnp.float32))       # (H, 1)
    for k in range(n_hidden):
        kparams.append((hidden_omega * params[2 + 2 * k]).astype(jnp.float32))
        kparams.append(params[3 + 2 * k].reshape(H, 1).astype(jnp.float32))
    kparams.append(params[-2].reshape(H, 1).astype(jnp.float32))      # (H, 1)
    kparams.append(params[-1].reshape(1, 1).astype(jnp.float32))      # (1, 1)

    kernel = functools.partial(_siren_kernel, n_hidden)

    in_specs = [pl.BlockSpec((2, block_n), lambda i: (0, i))]
    for p in kparams:
        in_specs.append(pl.BlockSpec(p.shape, lambda i: (0, 0)))
    out_spec = pl.BlockSpec((1, block_n), lambda i: (0, i))

    # Advisory cost hint: transcendental-heavy, byte-light.
    flops = int(n_pad * (2 * H * 2 + n_hidden * 2 * H * H + 2 * H))
    transcendentals = int(n_pad * H * (1 + n_hidden))
    bytes_accessed = int(n_pad * 3 * 4 + sum(int(p.size) for p in kparams) * 4)

    out = pl.pallas_call(
        kernel,
        out_shape=jax.ShapeDtypeStruct((1, n_pad), jnp.float32),
        grid_spec=pltpu.PrefetchScalarGridSpec(
            num_scalar_prefetch=0,
            grid=(n_blocks,),
            in_specs=in_specs,
            out_specs=out_spec,
        ),
        compiler_params=pltpu.CompilerParams(
            dimension_semantics=("parallel",)),
        cost_estimate=pl.CostEstimate(
            flops=flops,
            transcendentals=transcendentals,
            bytes_accessed=bytes_accessed),
    )(xt, *kparams)

    return out[:, :N].reshape(N, 1)


def make_params(key, hidden_layers=1, hidden_features=32,
                first_omega=30.0, hidden_omega=30.0, c=6.0):
    """Deterministic parameter init mirroring the PyTorch `initializer`."""
    in_features, out_features = 2, 1
    params = []

    def uniform(key, shape, bound):
        return jax.random.uniform(key, shape, jnp.float32, -bound, bound)

    keys = jax.random.split(key, 2 * (hidden_layers + 2))
    ki = 0

    # First layer: weight uniform(-1/in_features, 1/in_features); bias uses
    # PyTorch nn.Linear default: uniform(-1/sqrt(fan_in), 1/sqrt(fan_in)).
    w0 = uniform(keys[ki], (hidden_features, in_features), 1.0 / in_features); ki += 1
    b0 = uniform(keys[ki], (1, hidden_features), 1.0 / math.sqrt(in_features)); ki += 1
    params += [w0, b0]

    # Hidden layers: weight uniform(+-sqrt(c/fan_in)/omega).
    for _ in range(hidden_layers):
        bound = math.sqrt(c / hidden_features) / hidden_omega
        wk = uniform(keys[ki], (hidden_features, hidden_features), bound); ki += 1
        bk = uniform(keys[ki], (1, hidden_features),
                     1.0 / math.sqrt(hidden_features)); ki += 1
        params += [wk, bk]

    # Final linear layer.
    bound = math.sqrt(c / hidden_features) / hidden_omega
    wf = uniform(keys[ki], (out_features, hidden_features), bound); ki += 1
    bf = uniform(keys[ki], (1, out_features),
                 1.0 / math.sqrt(hidden_features)); ki += 1
    params += [wf, bf]
    return params


def reference_forward(x, params, first_omega=30.0, hidden_omega=30.0):
    n_hidden = (len(params) - 4) // 2
    h = x
    h = jnp.sin(first_omega * (h @ params[0].T) + params[1])
    for k in range(n_hidden):
        h = jnp.sin(hidden_omega * (h @ params[2 + 2 * k].T) + params[3 + 2 * k])
    return h @ params[-2].T + params[-1]


if __name__ == "__main__":
    key = jax.random.PRNGKey(0)
    k_param, k_x = jax.random.split(key)

    hidden_layers = 1
    hidden_features = 32
    N = 1000  # number of (x, y) coordinate queries (ragged vs block_n on purpose)

    params = make_params(k_param, hidden_layers=hidden_layers,
                         hidden_features=hidden_features)
    # Coordinates in [-1, 1], shape (N, 2) — what an image-SIREN is fed.
    x = jax.random.uniform(k_x, (N, 2), jnp.float32, -1.0, 1.0)

    out = image_siren_forward(x, params, block_n=512)
    out = jax.block_until_ready(out)

    ref = reference_forward(x, params)
    assert out.shape == (N, 1)
    assert jnp.allclose(out, ref, atol=1e-4, rtol=1e-4), (
        float(jnp.max(jnp.abs(out - ref))))

    print("KERNEL_OK")
</pallas_src>

<mosaic_0001>
module attributes {stable_mosaic.version = 11 : i64} {
  func.func @_siren_kernel(%arg0: i32, %arg1: memref<2x512xf32, #tpu.memory_space<vmem>>, %arg2: memref<32x2xf32, #tpu.memory_space<vmem>>, %arg3: memref<32x1xf32, #tpu.memory_space<vmem>>, %arg4: memref<32x32xf32, #tpu.memory_space<vmem>>, %arg5: memref<32x1xf32, #tpu.memory_space<vmem>>, %arg6: memref<32x1xf32, #tpu.memory_space<vmem>>, %arg7: memref<1x1xf32, #tpu.memory_space<vmem>>, %arg8: memref<1x512xf32, #tpu.memory_space<vmem>>) attributes {dimension_semantics = [#tpu.dimension_semantics<parallel>], iteration_bounds = array<i64: 2>, scalar_prefetch = 0 : i64, scratch_operands = 0 : i64, tpu.core_type = #tpu.core_type<tc>, window_params = [{transform_indices = @transform_0, window_bounds = array<i64: 2, 512>}, {pipeline_mode = #tpu.pipeline_mode<synchronous>, transform_indices = @transform_1, window_bounds = array<i64: 32, 2>}, {pipeline_mode = #tpu.pipeline_mode<synchronous>, transform_indices = @transform_2, window_bounds = array<i64: 32, 1>}, {pipeline_mode = #tpu.pipeline_mode<synchronous>, transform_indices = @transform_3, window_bounds = array<i64: 32, 32>}, {pipeline_mode = #tpu.pipeline_mode<synchronous>, transform_indices = @transform_4, window_bounds = array<i64: 32, 1>}, {pipeline_mode = #tpu.pipeline_mode<synchronous>, transform_indices = @transform_5, window_bounds = array<i64: 32, 1>}, {pipeline_mode = #tpu.pipeline_mode<synchronous>, transform_indices = @transform_6, window_bounds = array<i64: 1, 1>}, {transform_indices = @transform_7, window_bounds = array<i64: 1, 512>}]} {
    %c0 = arith.constant 0 : index
    %c0_0 = arith.constant 0 : index
    %0 = vector.load %arg1[%c0, %c0_0] : memref<2x512xf32, #tpu.memory_space<vmem>>, vector<1x512xf32>
    %c1 = arith.constant 1 : index
    %c0_1 = arith.constant 0 : index
    %1 = vector.load %arg1[%c1, %c0_1] : memref<2x512xf32, #tpu.memory_space<vmem>>, vector<1x512xf32>
    %c0_2 = arith.constant 0 : index
    %c0_3 = arith.constant 0 : index
    %2 = vector.load %arg2[%c0_2, %c0_3] : memref<32x2xf32, #tpu.memory_space<vmem>>, vector<32x2xf32>
    %c0_4 = arith.constant 0 : index
    %c0_5 = arith.constant 0 : index
    %3 = vector.load %arg3[%c0_4, %c0_5] : memref<32x1xf32, #tpu.memory_space<vmem>>, vector<32x1xf32>
    %4 = vector.extract_strided_slice %2 {offsets = [0, 0], sizes = [32, 1], strides = [1, 1]} : vector<32x2xf32> to vector<32x1xf32>
    %5 = vector.broadcast %4 : vector<32x1xf32> to vector<32x512xf32>
    %6 = vector.broadcast %0 : vector<1x512xf32> to vector<32x512xf32>
    %7 = arith.mulf %5, %6 : vector<32x512xf32>
    %8 = vector.extract_strided_slice %2 {offsets = [0, 1], sizes = [32, 1], strides = [1, 1]} : vector<32x2xf32> to vector<32x1xf32>
    %9 = vector.broadcast %8 : vector<32x1xf32> to vector<32x512xf32>
    %10 = vector.broadcast %1 : vector<1x512xf32> to vector<32x512xf32>
    %11 = arith.mulf %9, %10 : vector<32x512xf32>
    %12 = arith.addf %7, %11 : vector<32x512xf32>
    %13 = vector.broadcast %3 : vector<32x1xf32> to vector<32x512xf32>
    %14 = arith.addf %12, %13 : vector<32x512xf32>
    %15 = math.sin %14 : vector<32x512xf32>
    %c0_6 = arith.constant 0 : index
    %c0_7 = arith.constant 0 : index
    %16 = vector.load %arg4[%c0_6, %c0_7] : memref<32x32xf32, #tpu.memory_space<vmem>>, vector<32x32xf32>
    %c0_8 = arith.constant 0 : index
    %c0_9 = arith.constant 0 : index
    %17 = vector.load %arg5[%c0_8, %c0_9] : memref<32x1xf32, #tpu.memory_space<vmem>>, vector<32x1xf32>
    %cst = arith.constant dense<0.000000e+00> : vector<32x512xf32>
    %18 = tpu.matmul %16, %15, %cst {dimension_numbers = #tpu.dot_dimension_numbers<[1], [0], [0], [1], [0, 0, 1, 1], [], []>} : vector<32x32xf32>, vector<32x512xf32>, vector<32x512xf32> -> vector<32x512xf32>
    %19 = vector.broadcast %17 : vector<32x1xf32> to vector<32x512xf32>
    %20 = arith.addf %18, %19 : vector<32x512xf32>
    %21 = math.sin %20 : vector<32x512xf32>
    %c0_10 = arith.constant 0 : index
    %c0_11 = arith.constant 0 : index
    %22 = vector.load %arg6[%c0_10, %c0_11] : memref<32x1xf32, #tpu.memory_space<vmem>>, vector<32x1xf32>
    %c0_12 = arith.constant 0 : index
    %c0_13 = arith.constant 0 : index
    %23 = vector.load %arg7[%c0_12, %c0_13] : memref<1x1xf32, #tpu.memory_space<vmem>>, vector<1x1xf32>
    %24 = vector.broadcast %22 : vector<32x1xf32> to vector<32x512xf32>
    %25 = arith.mulf %24, %21 : vector<32x512xf32>
    %cst_14 = arith.constant dense<0.000000e+00> : vector<512xf32>
    %26 = vector.multi_reduction <add>, %25, %cst_14 [0] : vector<32x512xf32> to vector<512xf32>
    %27 = vector.shape_cast %26 : vector<512xf32> to vector<1x512xf32>
    %28 = vector.broadcast %23 : vector<1x1xf32> to vector<1x512xf32>
    %29 = arith.addf %27, %28 : vector<1x512xf32>
    %c0_15 = arith.constant 0 : index
    %c0_16 = arith.constant 0 : index
    %30 = vector.load %arg8[%c0_15, %c0_16] : memref<1x512xf32, #tpu.memory_space<vmem>>, vector<1x512xf32>
    tpu.vector_store %arg8[%c0_15, %c0_16], %29 {strides = array<i32>} : memref<1x512xf32, #tpu.memory_space<vmem>>, vector<1x512xf32>,
    return
  }
  func.func @transform_0(%arg0: i32) -> (i32, i32) {
    %c0_i32 = arith.constant 0 : i32
    %c0_i32_0 = arith.constant 0 : i32
    return %c0_i32, %arg0 : i32, i32
  }
  func.func @transform_1(%arg0: i32) -> (i32, i32) {
    %c0_i32 = arith.constant 0 : i32
    %c0_i32_0 = arith.constant 0 : i32
    %c0_i32_1 = arith.constant 0 : i32
    return %c0_i32, %c0_i32_0 : i32, i32
  }
  func.func @transform_2(%arg0: i32) -> (i32, i32) {
    %c0_i32 = arith.constant 0 : i32
    %c0_i32_0 = arith.constant 0 : i32
    %c0_i32_1 = arith.constant 0 : i32
    return %c0_i32, %c0_i32_0 : i32, i32
  }
  func.func @transform_3(%arg0: i32) -> (i32, i32) {
    %c0_i32 = arith.constant 0 : i32
    %c0_i32_0 = arith.constant 0 : i32
    %c0_i32_1 = arith.constant 0 : i32
    return %c0_i32, %c0_i32_0 : i32, i32
  }
  func.func @transform_4(%arg0: i32) -> (i32, i32) {
    %c0_i32 = arith.constant 0 : i32
    %c0_i32_0 = arith.constant 0 : i32
    %c0_i32_1 = arith.constant 0 : i32
    return %c0_i32, %c0_i32_0 : i32, i32
  }
  func.func @transform_5(%arg0: i32) -> (i32, i32) {
    %c0_i32 = arith.constant 0 : i32
    %c0_i32_0 = arith.constant 0 : i32
    %c0_i32_1 = arith.constant 0 : i32
    return %c0_i32, %c0_i32_0 : i32, i32
  }
  func.func @transform_6(%arg0: i32) -> (i32, i32) {
    %c0_i32 = arith.constant 0 : i32
    %c0_i32_0 = arith.constant 0 : i32
    %c0_i32_1 = arith.constant 0 : i32
    return %c0_i32, %c0_i32_0 : i32, i32
  }
  func.func @transform_7(%arg0: i32) -> (i32, i32) {
    %c0_i32 = arith.constant 0 : i32
    %c0_i32_0 = arith.constant 0 : i32
    return %c0_i32, %arg0 : i32, i32
  }
}

</mosaic_0001>

<bundles_post_ra>
// kernel: tpu_custom_call.1
= control target key start
LH: loop header
LB: loop body
LE: loop exit
PB: predicated region body
PF: predicated region fallthrough
CT: control target
= control target key end

     0   :  { %s8657_s0 = inlined_call_operand.vmem [shape: f32[2,1024], index: 0, kind: input, shape index: {}]   ;;  %s8658_s1 = inlined_call_operand.vmem [shape: f32[32,2], index: 1, kind: input, shape index: {}]   ;;  %s8659_s2 = inlined_call_operand.vmem [shape: f32[32,1], index: 2, kind: input, shape index: {}]   ;;  %s8660_s3 = inlined_call_operand.vmem [shape: f32[32,32], index: 3, kind: input, shape index: {}]   ;;  %s8661_s4 = inlined_call_operand.vmem [shape: f32[32,1], index: 4, kind: input, shape index: {}]   ;;  %s8662_s5 = inlined_call_operand.vmem [shape: f32[32,1], index: 5, kind: input, shape index: {}]   ;;  %s8663_s6 = inlined_call_operand.<no memory space> [shape: f32[1,1], index: 6, kind: input, shape index: {}]   ;;  %s8664_s7 = inlined_call_operand.hbm [shape: f32[1,1024], index: 7, kind: output, shape index: {}]  }
   0x1   :  { %v12_v0 = vstv %s8663_s6 }
   0x2   :  { %13 = vst [vmem:[#allocation2] sm:$0x1] %v12_v0 }
   0x3   :  { %14 = vsyncpa [#allocation4], 0 }
   0x4   :  { %16 = vsyncpa [#allocation4 + $0x1], 0  ;;  %s4778_s26 = smov 0   ;;  %s4780_s27 = smov 0  }
   0x5   :  { %s4782_s28 = smov 0   ;;  %s4784_s29 = smov 0  }
   0x6 LB: > { %s4799_s6 = sadd.s32 4294967295, %s4722_s29   ;;  %s4200_s30 = sadd.s32 4294967294, %s4722_s29   ;;  %s4722_s29 = sphi %s4784_s29, %s8933_s29   ;;  %s4718_s28 = sphi %s4782_s28, %s8932_s28   ;;  %s4714_s27 = sphi %s4780_s27, %s8931_s27   ;;  %s4710_s26 = sphi %s4778_s26, %s8930_s26  }
   0x7   : > { %s4803_s8 = sadd.s32 1, %s4722_s29   ;;  %s181_s9 = sadd.s32 1, %s4718_s28 }
   0x8   : > { %s178_s10 = ssub.s32 %s4722_s29, %s4803_s8  ;;  %p191_p0 = scmp.ne.s32.totalorder %s4718_s28, %s4714_s27 }
   0x9   : > { %p179_p1 = scmp.eq.s32.totalorder %s178_s10, 0  ;;  %p192_p2 = scmp.eq.s32.totalorder %s4799_s6, 1 }
   0xa   : > { %p197_p3 = scmp.ne.s32.totalorder %s4714_s27, %s4710_s26  ;;  %p198_p4 = scmp.eq.s32.totalorder %s4200_s30, 1 }
   0xb   : > { %s4814_s11 = scalar_select %p179_p1, %s4718_s28, %s181_s9  }
   0xc   : > { %p4816_p5 = por %p192_p2, %p191_p0  ;;  %p4820_p6 = por %p198_p4, %p197_p3 }
   0xd   : > { %p4203_p7 = scmp.ge.s32.totalorder %s4722_s29, 1  ;;  %p243_p8 = scmp.lt.s32.totalorder %s4722_s29, 3 }
   0xf   : > { %p244_p9 = pnand %p4203_p7, %p243_p8 }
  0x11   : > { %247 = sbr.rel (%p244_p9) target bundleno = 1247 (0x4df), region = 48 }
  0x16   : > { %v288_v1 = vld [vmem:[%s8658_s1 + $0x18] sm:$0xff]  ;;  %v287_v2 = vld [vmem:[%s8658_s1 + $0x10] sm:$0xff]  ;;  %v4724_v3 = vmov 1   ;;  %v4725_v4 = vmov 0   ;;  %v286_v5 = vld [vmem:[%s8658_s1 + $0x8] sm:$0xff]  ;;  %s4205_s16 = sshll.u32 %s4799_s6, 2  ;;  %v8665_v20 = vlaneseq }
  0x17   : > { %4527 = vset.pattern.permute.xlu0 %v4724_v3  ;;  %4528 = vset.pattern.permute.xlu1 %v4725_v4  ;;  %v285_v6 = vld [vmem:[%s8658_s1] sm:$0xff]  ;;  %v292_v7 = vld [vmem:[%s8659_s2 + $0x18] sm:$0xff]  ;;  %v290_v8 = vld [vmem:[%s8659_s2 + $0x8] sm:$0xff]  ;;  %p276_p10 = scmp.lt.s32.totalorder %s4205_s16, 7  ;;  %s272_s14 = sand.u32 1, %s4714_s27  }
  0x18   : > { %363 = vperm.xlu0 %4527, %v288_v1   ;;  %305 = vperm.xlu1 %4528, %v287_v2   ;;  %v2123_v9 = vld [vmem:[%s8661_s4] sm:$0xff]  ;;  %v291_v10 = vld [vmem:[%s8659_s2 + $0x10] sm:$0xff]  ;;  %v2124_v14 = vld [vmem:[%s8661_s4 + $0x8] sm:$0xff]  ;;  %v4876_v21 = vshrl.u32 %v8665_v20, 7  ;;  %s4204_s15 = sshll.u32 %s272_s14, 2  ;;  %s4127_s22 = scalar_lea.sflag [#allocation4], %s272_s14 }
  0x19   : > { %v2125_v11 = vld [vmem:[%s8661_s4 + $0x10] sm:$0xff]  ;;  %v289_v12 = vld [vmem:[%s8659_s2] sm:$0xff]  ;;  %v2126_v16 = vld [vmem:[%s8661_s4 + $0x18] sm:$0xff]  ;;  %s8935_s16 = smov (!%p276_p10, %s4205_s16), 7  ;;  %s4734_s24 = smov [#allocation3]  }
  0x1a   : > { %v4002_v13 = vld [vmem:[%s8662_s5] sm:$0xff]  ;;  %v4004_v15 = vld [vmem:[%s8662_s5 + $0x10] sm:$0xff]  ;;  %v4003_v18 = vld [vmem:[%s8662_s5 + $0x8] sm:$0xff]  ;;  %s4206_s17 = sshll.u32 %s8935_s16, 1  ;;  %8750 = vst [vmem:[#allocation6_spill] sm:$0xff] %v4876_v21  ;;  %v320_v22 = vsub.s32 1, %v4876_v21 }
  0x1b   : > { %v4006_v17 = vld [vmem:[#allocation2] sm:$0x1]  ;;  %v4005_v19 = vld [vmem:[%s8662_s5 + $0x18] sm:$0xff]  ;;  %s279_s20 = scalar_lea.vmem %s8657_s0, %s4206_s17  ;;  %v324_v23 = vsub.s32 2, %v4876_v21  ;;  %v328_v24 = vsub.s32 3, %v4876_v21  ;;  %v4885_v26 = vsub.s32 0, %v4876_v21 }
  0x1c   : > { %4529 = vset.pattern.permute.xlu1 %v4724_v3  ;;  %355 = vperm.xlu0 %4527, %v286_v5   ;;  %v282_v25 = vld [vmem:[%s279_s20] ss:$2 sm:$0xf]  ;;  %v4207_v30 = vld [vmem:[%s279_s20 + $0x1] ss:$2 sm:$0xf] }
  0x1d   : > { %359 = vperm.xlu1 %4529, %v287_v2   ;;  %8751 = vst [vmem:[#allocation7_spill] sm:$0xff] %v4885_v26  ;;  %v321_v27 = vrot.slane %v282_v25, %v320_v22  ;;  %v325_v28 = vrot.slane %v282_v25, %v324_v23  ;;  %v329_v29 = vrot.slane %v282_v25, %v328_v24  ;;  %s4349_s16 = sshll.u32 %s4799_s6, 6  ;;  %s274_s17 = scalar_lea.vmem [#allocation3], %s4204_s15 }
  0x1e   : > { %v4888_v31 = vrot.slane %v282_v25, %v4885_v26  ;;  %v374_v37 = vrot.slane %v4207_v30, %v320_v22  ;;  %v378_v38 = vrot.slane %v4207_v30, %v324_v23  ;;  %v382_v39 = vrot.slane %v4207_v30, %v328_v24  ;;  %s4141_s18 = sshll.u32 %s274_s17, 4  ;;  %s4139_s21 = scalar_lea.hbm %s8664_s7, %s4349_s16  ;;  %s4142_s18 = int_to_ptr.vmem [resolvable:$true] %s4141_s18 }
  0x1f   : > { %v4894_v41 = vrot.slane %v4207_v30, %v4885_v26  ;;  %s4662_s23 = scalar_lea.vmem %s4142_s18, 64  ;;  %s4666_s6 = sshll.u32 %s4734_s24, 4  ;;  %s4667_s6 = int_to_ptr.vmem [resolvable:$false] %s4666_s6 }
  0x20   : > { %4531 = vset.pattern.permute.xlu0 %v4725_v4  ;;  %p4663_p11 = scmp.ne.s32.totalorder %s4142_s18, %s4662_s23  ;;  %s4668_s25 = scalar_lea.vmem %s4667_s6, 128 }
  0x21   : > { %4530 = vset.pattern.permute.xlu1 %v4725_v4  ;;  %310 = vperm.xlu0 %4531, %v288_v1   ;;  %p4669_p0 = scmp.lt.s32.totalorder %s4142_s18, %s4667_s6  ;;  %p4670_p1 = scmp.lt.s32.totalorder %s4668_s25, %s4662_s23 }
  0x22   : > { %300 = vperm.xlu1 %4530, %v286_v5   ;;  %p4664_p12 = pnand %p4663_p11, %p4816_p5 }
  0x23   : > { %p4671_p2 = por %p4670_p1, %p4669_p0 }
  0x24   : > { %p4665_p13 = pneg %p4664_p12 }
  0x25   : > { %295 = vperm.xlu0 %4531, %v285_v6  }
  0x26   : > { %436 = vperm.xlu1 %4530, %v292_v7   ;;  %p4672_p3 = pnand %p4671_p2, %p4665_p13 }
  0x29   : > { %426 = vperm.xlu0 %4531, %v290_v8  }
  0x2a   : > { %4532 = vset.pattern.permute.xlu1 %v4724_v3 }
  0x2b   : > { %351 = vperm.xlu1 %4532, %v285_v6  }
  0x2d   : > { %2129 = vperm.xlu0 %4531, %v2123_v9  }
  0x2f   : > { %4533 = vset.pattern.permute.xlu1 %v4725_v4 }
  0x30   : > { %431 = vperm.xlu1 %4533, %v291_v10  }
  0x31   : > { %2139 = vperm.xlu0 %4531, %v2125_v11  }
  0x34   : > { %421 = vperm.xlu1 %4533, %v289_v12  }
  0x35   : > { %4009 = vperm.xlu0 %4531, %v4002_v13  }
  0x38   : > { %2134 = vperm.xlu1 %4533, %v2124_v14  }
  0x39   : > { %4019 = vperm.xlu0 %4531, %v4004_v15  }
  0x3c   : > { %2144 = vperm.xlu1 %4533, %v2126_v16  }
  0x3d   : > { %4081 = vperm.xlu0 %4531, %v4006_v17  }
  0x40   : > { %4014 = vperm.xlu1 %4533, %v4003_v18  }
  0x44   : > { %4024 = vperm.xlu1 %4533, %v4005_v19  }
  0x93   : > { %v306_v32 = vpop.permute.xlu1 %305  ;;  %v4890_v33 = vpop.permute.xlu0 %363 }
  0x94   : > { %v343_v34 = vmul.f32 %v321_v27, %v306_v32  ;;  %v344_v35 = vmul.f32 %v325_v28, %v306_v32  ;;  %v345_v36 = vmul.f32 %v329_v29, %v306_v32  ;;  %v342_v40 = vmul.f32 %v4888_v31, %v306_v32 }
  0x95   : > { %v400_v52 = vmul.f32 %v374_v37, %v4890_v33  ;;  %v401_v53 = vmul.f32 %v378_v38, %v4890_v33  ;;  %v402_v54 = vmul.f32 %v382_v39, %v4890_v33 }
  0x97   : > { %v356_v42 = vpop.permute.xlu0 %355 }
  0x98   : > { %v360_v43 = vpop.permute.xlu1 %359  ;;  %v392_v44 = vmul.f32 %v374_v37, %v356_v42  ;;  %v393_v45 = vmul.f32 %v378_v38, %v356_v42  ;;  %v394_v46 = vmul.f32 %v382_v39, %v356_v42  ;;  %v4897_v47 = vmul.f32 %v4894_v41, %v356_v42 }
  0x99   : > { %v396_v48 = vmul.f32 %v374_v37, %v360_v43  ;;  %v397_v49 = vmul.f32 %v378_v38, %v360_v43  ;;  %v398_v50 = vmul.f32 %v382_v39, %v360_v43  ;;  %v395_v51 = vmul.f32 %v4894_v41, %v360_v43 }
  0x9a   : > { %8752 = vst [vmem:[#allocation8_spill] sm:$0xff] %v4897_v47  ;;  %v8773_v47 = vmov 2102212464  }
  0x9b   : > { %v4903_v55 = vadd.f32 %v396_v48, %v343_v34  ;;  %v4905_v56 = vadd.f32 %v397_v49, %v344_v35  ;;  %v4907_v57 = vadd.f32 %v398_v50, %v345_v36  ;;  %v4912_v10 = vadd.f32 %v395_v51, %v342_v40 }
  0x9c   : > { %v311_v58 = vpop.permute.xlu0 %310 }
  0x9d   : > { %v347_v59 = vmul.f32 %v321_v27, %v311_v58  ;;  %v348_v60 = vmul.f32 %v325_v28, %v311_v58  ;;  %v349_v61 = vmul.f32 %v329_v29, %v311_v58  ;;  %v301_v62 = vpop.permute.xlu1 %300 }
  0x9e   : > { %v339_v63 = vmul.f32 %v321_v27, %v301_v62  ;;  %v340_v0 = vmul.f32 %v325_v28, %v301_v62  ;;  %v341_v1 = vmul.f32 %v329_v29, %v301_v62  ;;  %v4910_v2 = vmul.f32 %v4888_v31, %v301_v62 }
  0x9f   : > { %v416_v3 = vadd.f32 %v400_v52, %v347_v59  ;;  %v417_v4 = vadd.f32 %v401_v53, %v348_v60  ;;  %v418_v5 = vadd.f32 %v402_v54, %v349_v61 }
  0xa0   : > { %8753 = vst [vmem:[#allocation9_spill] sm:$0xff] %v4910_v2  ;;  %v296_v6 = vpop.permute.xlu0 %295  ;;  %v408_v7 = vadd.f32 %v392_v44, %v339_v63  ;;  %v409_v8 = vadd.f32 %v393_v45, %v340_v0  ;;  %v410_v9 = vadd.f32 %v394_v46, %v341_v1  ;;  %v346_v63 = vmul.f32 %v4888_v31, %v311_v58 }
  0xa1   : > { %v335_v11 = vmul.f32 %v321_v27, %v296_v6  ;;  %v336_v12 = vmul.f32 %v325_v28, %v296_v6  ;;  %v337_v13 = vmul.f32 %v329_v29, %v296_v6  ;;  %v4914_v14 = vpop.permute.xlu1 %436  ;;  %v4917_v15 = vmul.f32 %v4888_v31, %v296_v6 }
  0xa2   : > { %v4920_v16 = vadd.f32 %v4914_v14, %v416_v3  ;;  %v4923_v17 = vadd.f32 %v4914_v14, %v417_v4  ;;  %v4926_v18 = vadd.f32 %v4914_v14, %v418_v5  ;;  %v399_v1 = vmul.f32 %v4894_v41, %v4890_v33 }
  0xa3   : > { %8754 = vst [vmem:[#allocation10_spill] sm:$0xff] %v4917_v15 }
  0xa4   : > { %v1810_v19 = vand.u32 2139095040, %v4920_v16  ;;  %v4929_v22 = vpop.permute.xlu0 %426  ;;  %v1914_v28 = vand.u32 2139095040, %v4923_v17  ;;  %v2018_v29 = vand.u32 2139095040, %v4926_v18  ;;  %vm1809_vm11 = vcmp.lt.s32.totalorder %v4920_v16, 0 }
  0xa5   : > { %8755 = vst [vmem:[#allocation11_spill] sm:$0xff] %v4929_v22  ;;  %v4932_v23 = vadd.f32 %v4929_v22, %v408_v7  ;;  %v4942_v44 = vadd.f32 %v4929_v22, %v409_v8  ;;  %v4945_v46 = vadd.f32 %v4929_v22, %v410_v9  ;;  %v415_v8 = vadd.f32 %v399_v1, %v346_v63 }
  0xa6   : > { %v352_v24 = vpop.permute.xlu1 %351  ;;  %v1811_v25 = vshrl.u32 %v1810_v19, 23  ;;  %v1915_v42 = vshrl.u32 %v1914_v28, 23  ;;  %v2019_v43 = vshrl.u32 %v2018_v29, 23 }
  0xa7   : > { %8756 = vst [vmem:[#allocation12_spill] sm:$0xff] %v4932_v23  ;;  %v388_v27 = vmul.f32 %v374_v37, %v352_v24  ;;  %v389_v30 = vmul.f32 %v378_v38, %v352_v24  ;;  %v390_v32 = vmul.f32 %v382_v39, %v352_v24  ;;  %v978_v34 = vand.u32 2139095040, %v4932_v23  ;;  %8757 = vst [vmem:[#allocation13_spill] sm:$0xff] %v4942_v44 }
  0xa8   : > { %v4260_v36 = vadd.s32 4294967169, %v1811_v25  ;;  %8758 = vst [vmem:[#allocation14_spill] sm:$0xff] %v4945_v46  ;;  %v4264_v48 = vadd.s32 4294967169, %v1915_v42  ;;  %v4268_v38 = vadd.s32 4294967169, %v2019_v43  ;;  %v1082_v39 = vand.u32 2139095040, %v4942_v44 }
  0xa9   : > { %v4937_v35 = vadd.f32 %v388_v27, %v335_v11  ;;  %v4939_v40 = vadd.f32 %v389_v30, %v336_v12  ;;  %v979_v45 = vshrl.u32 %v978_v34, 23  ;;  %v1186_v50 = vand.u32 2139095040, %v4945_v46 }
  0xaa   : > { %v1817_v37 = vadd.s32 1, %v4260_v36  ;;  %v1921_v51 = vadd.s32 1, %v4264_v48  ;;  %v2025_v52 = vadd.s32 1, %v4268_v38  ;;  %v1083_v53 = vshrl.u32 %v1082_v39, 23 }
  0xab   : > { %v4228_v49 = vadd.s32 4294967169, %v979_v45  ;;  %v4949_v54 = vadd.f32 %v390_v32, %v337_v13  ;;  %v4951_v61 = vpop.permute.xlu1 %431  ;;  %v1187_v62 = vshrl.u32 %v1186_v50, 23  ;;  %v4955_v0 = vmul.f32 %v4894_v41, %v352_v24 }
  0xac   : > { %vm1818_vm0 = vcmp.gt.s32.totalorder %v1817_v37, 0  ;;  %vm1922_vm1 = vcmp.gt.s32.totalorder %v1921_v51, 0  ;;  %vm2026_vm2 = vcmp.gt.s32.totalorder %v2025_v52, 0  ;;  %v4232_v3 = vadd.s32 4294967169, %v1083_v53 }
  0xad   : > { %v1819_v59 = vsel %vm1818_vm0, %v1817_v37, 0  ;;  %v985_v60 = vadd.s32 1, %v4228_v49  ;;  %8759 = vst [vmem:[#allocation15_spill] sm:$0xff] %v4955_v0  ;;  %v4961_v5 = vadd.f32 %v4951_v61, %v4903_v55  ;;  %v4965_v6 = vadd.f32 %v4951_v61, %v4905_v56 }
  0xae   : > { %v1821_v4 = vand.u32 31, %v1819_v59  ;;  %v1923_v31 = vsel %vm1922_vm1, %v1921_v51, 0  ;;  %v2027_v58 = vsel %vm2026_vm2, %v2025_v52, 0  ;;  %v4236_v7 = vadd.s32 4294967169, %v1187_v62 }
  0xaf   : > { %vm986_vm3 = vcmp.gt.s32.totalorder %v985_v60, 0  ;;  %v1089_v9 = vadd.s32 1, %v4232_v3  ;;  %v4969_v33 = vadd.f32 %v4951_v61, %v4907_v57  ;;  %v1394_v12 = vand.u32 2139095040, %v4961_v5 }
  0xb0   : > { %v1822_v41 = vsub.s32 32, %v1821_v4  ;;  %v987_v11 = vsel %vm986_vm3, %v985_v60, 0  ;;  %v1498_v55 = vand.u32 2139095040, %v4965_v6  ;;  %v4973_v13 = vand.u32 31, %v1923_v31 }
  0xb1   : > { %v4975_v56 = vand.u32 31, %v2027_v58  ;;  %v1193_v19 = vadd.s32 1, %v4236_v7  ;;  %v8666_v24 = vand.u32 2147483647, %v4920_v16  ;;  %v4979_v25 = vadd.f32 %v4914_v14, %v415_v8 }
  0xb2   : > { %v4981_v27 = vshrl.u32 %v1819_v59, 5  ;;  %v4983_v57 = vand.u32 31, %v987_v11  ;;  %vm1090_vm4 = vcmp.gt.s32.totalorder %v1089_v9, 0  ;;  %v1602_v28 = vand.u32 2139095040, %v4969_v33 }
  0xb3   : > { %v4986_v29 = vshrl.u32 %v1923_v31, 5  ;;  %v1395_v30 = vshrl.u32 %v1394_v12, 23  ;;  %v1499_v32 = vshrl.u32 %v1498_v55, 23  ;;  %v8677_v34 = vmov 2475754826  }
  0xb4   : > { %8760 = vst [vmem:[#allocation16_spill] sm:$0xff] %v4983_v57  ;;  %v1825_v36 = vshrl.u32 %v8677_v34, %v1822_v41  ;;  %v4990_v42 = vsub.s32 32, %v4973_v13  ;;  %v4992_v43 = vshrl.u32 %v2027_v58, 5  ;;  %v4995_v14 = vsub.s32 32, %v4975_v56 }
  0xb5   : > { %v4997_v45 = vshrl.u32 %v987_v11, 5  ;;  %v4999_v37 = vsel %vm1090_vm4, %v1089_v9, 0  ;;  %vm1194_vm5 = vcmp.gt.s32.totalorder %v1193_v19, 0  ;;  %v1814_v48 = vand.u32 8388607, %v8666_v24 }
  0xb6   : > { %v8680_v38 = vmov 683565275   ;;  %v5005_v49 = vsub.s32 32, %v4983_v57  ;;  %v1603_v50 = vshrl.u32 %v1602_v28, 23  ;;  %v1827_v51 = vshll.u32 %v8677_v34, %v1821_v4 }
  0xb7   : > { %8761 = vst [vmem:[#allocation17_spill] sm:$0xff] %v4997_v45  ;;  %v1824_v39 = vshll.u32 %v8680_v38, %v1821_v4  ;;  %v8674_v52 = vmov 2131351028   ;;  %v4244_v59 = vadd.s32 4294967169, %v1395_v30  ;;  %v4248_v60 = vadd.s32 4294967169, %v1499_v32 }
  0xb8   : > { %8762 = vst [vmem:[#allocation18_spill] sm:$0xff] %v5005_v49  ;;  %v1828_v53 = vshrl.u32 %v8674_v52, %v1822_v41  ;;  %v1830_v63 = vshll.u32 %v8674_v52, %v1821_v4  ;;  %v8672_v3 = vmov 2102212464   ;;  %v8667_v7 = vmov 920167782  }
  0xb9   : > { %v1826_v62 = vor.u32 %v1825_v36, %v1824_v39  ;;  %v1831_v31 = vshrl.u32 %v8672_v3, %v1822_v41  ;;  %v1833_v58 = vshll.u32 %v8672_v3, %v1821_v4  ;;  %v1834_v8 = vshrl.u32 %v8667_v7, %v1822_v41 }
  0xba   : > { %v1829_v1 = vor.u32 %v1828_v53, %v1827_v51  ;;  %v1815_v9 = vor.u32 8388608, %v1814_v48  ;;  %v1823_v11 = vshrl.u32 %v8680_v38, %v1822_v41  ;;  %v1836_v12 = vshll.u32 %v8667_v7, %v1821_v4 }
  0xbb   : > { %v8670_v55 = vmov 1326507024   ;;  %v1832_v30 = vor.u32 %v1831_v31, %v1830_v63  ;;  %v1835_v32 = vor.u32 %v1834_v8, %v1833_v58  ;;  %vm1839_vm6 = vcmp.lt.s32.totalorder %v4981_v27, 1 }
  0xbc   : > { %v1837_v28 = vshrl.u32 %v8670_v55, %v1822_v41  ;;  %vm1840_vm7 = vcmp.lt.s32.totalorder %v4981_v27, 2  ;;  %vm1841_vm8 = vcmp.lt.s32.totalorder %v4981_v27, 3  ;;  %vm1842_vm9 = vcmp.lt.s32.totalorder %v4981_v27, 4 }
  0xbd   : > { %v1847_v39 = vsel %vm1839_vm6, %v1826_v62, %v1829_v1  ;;  %v1843_v48 = vsel %vm1839_vm6, %v1823_v11, %v1826_v62  ;;  %v1844_v51 = vsel %vm1842_vm9, %v1832_v30, 2102212464  ;;  %v1848_v53 = vsel %vm1842_vm9, %v1835_v32, 920167782 }
  0xbe   : > { %v1838_v36 = vor.u32 %v1837_v28, %v1836_v12  ;;  %v1851_v20 = vsel %vm1839_vm6, %v1829_v1, %v1832_v30  ;;  %v1845_v4 = vsel %vm1841_vm8, %v1829_v1, %v1844_v51  ;;  %v1849_v24 = vsel %vm1841_vm8, %v1832_v30, %v1848_v53 }
  0xbf   : > { %v1855_v41 = vshll.u32 %v1815_v9, 8  ;;  %v5021_v63 = vsel %vm1194_vm5, %v1193_v19, 0  ;;  %v1850_v31 = vsel %vm1840_vm7, %v1847_v39, %v1849_v24  ;;  %v8669_v8 = vand.u32 2147483647, %v4926_v18 }
  0xc0   : > { %v1852_v7 = vsel %vm1842_vm9, %v1838_v36, 1326507024  ;;  %8763 = vst [vmem:[#allocation19_spill] sm:$0xff] %v5021_v63  ;;  %v4252_v12 = vadd.s32 4294967169, %v1603_v50  ;;  %v1401_v1 = vadd.s32 1, %v4244_v59  ;;  %v1846_v9 = vsel %vm1840_vm7, %v1843_v48, %v1845_v4 }
  0xc1   : > { %v1853_v58 = vsel %vm1841_vm8, %v1835_v32, %v1852_v7  ;;  %v5028_v11 = vmul.u32.u64.low %v1855_v41, %v1850_v31  ;;  %v5029_v28 = vmul.u32.u64.high %v1855_v41, %v1850_v31, %v5028_v11  ;;  %v5037_v36 = vadd.s32 1, %v4248_v60 }
  0xc2   : > { %v1854_v62 = vsel %vm1840_vm7, %v1851_v20, %v1853_v58  ;;  %v2022_v24 = vand.u32 8388607, %v8669_v8  ;;  %v2032_v50 = vshll.u32 %v8680_v38, %v4975_v56  ;;  %v2033_v20 = vshrl.u32 %v8677_v34, %v4995_v14 }
  0xc3   : > { %v5034_v19 = vmul.u32.u64.low %v1855_v41, %v1854_v62  ;;  %v5035_v30 = vmul.u32.u64.high %v1855_v41, %v1854_v62, %v5034_v19  ;;  %v2035_v59 = vshll.u32 %v8677_v34, %v4975_v56  ;;  %v2036_v27 = vshrl.u32 %v8674_v52, %v4995_v14 }
  0xc4   : > { %v2038_v7 = vshll.u32 %v8674_v52, %v4975_v56  ;;  %v2039_v60 = vshrl.u32 %v8672_v3, %v4995_v14  ;;  %v5053_v32 = vadd.s32 1, %v4252_v12  ;;  %v1862_v39 = vmul.u32 %v1855_v41, %v1846_v9 }
  0xc5   : > { %v1865_v48 = vadd.s32 1, %v5029_v28  ;;  %v2034_v51 = vor.u32 %v2033_v20, %v2032_v50  ;;  %vm1864_vm10 = vc.u32 %v5035_v30, %v5028_v11  ;;  %v2037_v53 = vor.u32 %v2036_v27, %v2035_v59 }
  0xc6   : > { %v2040_v4 = vor.u32 %v2039_v60, %v2038_v7  ;;  %v2041_v31 = vshll.u32 %v8672_v3, %v4975_v56  ;;  %v8764_v62 = vmov 920167782   ;;  %v2045_v9 = vshrl.u32 %v8670_v55, %v4995_v14 }
  0xc7   : > { %v1866_v58 = vsel %vm1864_vm10, %v1865_v48, %v5029_v28  ;;  %v2042_v12 = vshrl.u32 %v8764_v62, %v4995_v14  ;;  %v2044_v41 = vshll.u32 %v8764_v62, %v4975_v56  ;;  %vm1402_vm12 = vcmp.gt.s32.totalorder %v1401_v1, 0 }
  0xc8   : > { %v8765_v19 = vand.u32 2147483647, %v4920_v16  ;;  %v1867_v20 = vadd.s32 %v1866_v58, %v1862_v39  ;;  %v2023_v59 = vor.u32 8388608, %v2022_v24  ;;  %vm2047_vm14 = vcmp.lt.s32.totalorder %v4992_v43, 1 }
  0xc9   : > { %v2043_v28 = vor.u32 %v2042_v12, %v2041_v31  ;;  %v2046_v27 = vor.u32 %v2045_v9, %v2044_v41  ;;  %vm2048_vm15 = vcmp.lt.s32.totalorder %v4992_v43, 2  ;;  %vm2049_vm0 = vcmp.lt.s32.totalorder %v4992_v43, 3 }
  0xca   : > { %vm5070_vm13 = vcmp.le.f32.partialorder %v8765_v19, 0.7853982  ;;  %v1868_v56 = vadd.s32 536870912, %v1867_v20  ;;  %vm2050_vm1 = vcmp.lt.s32.totalorder %v4992_v43, 4  ;;  %v2055_v7 = vsel %vm2047_vm14, %v2034_v51, %v2037_v53 }
  0xcb   : > { %v2059_v60 = vsel %vm2047_vm14, %v2037_v53, %v2040_v4  ;;  %v2031_v24 = vshrl.u32 %v8680_v38, %v4995_v14  ;;  %v2052_v39 = vsel %vm2050_vm1, %v2040_v4, 2102212464  ;;  %v2056_v48 = vsel %vm2050_vm1, %v2043_v28, 920167782 }
  0xcc   : > { %v2060_v31 = vsel %vm2050_vm1, %v2046_v27, 1326507024  ;;  %v1869_v58 = vshrl.u32 %v1868_v56, 30  ;;  %v2057_v12 = vsel %vm2049_vm0, %v2040_v4, %v2056_v48  ;;  %v2063_v9 = vshll.u32 %v2023_v59, 8  ;;  %v5097_v56 = vpop.permute.xlu1 %421 }
  0xcd   : > { %v2061_v41 = vsel %vm2049_vm0, %v2043_v28, %v2060_v31  ;;  %v5089_v19 = vsel %vm1402_vm12, %v1401_v1, 0  ;;  %v2051_v8 = vsel %vm2047_vm14, %v2031_v24, %v2034_v51  ;;  %v2058_v14 = vsel %vm2048_vm15, %v2055_v7, %v2057_v12  ;;  %8768 = vst [vmem:[#allocation20_spill] sm:$0xff] %v5097_v56 }
  0xce   : > { %v2062_v27 = vsel %vm2048_vm15, %v2059_v60, %v2061_v41  ;;  %v1870_v55 = vshll.u32 %v1869_v58, 30  ;;  %v1893_v4 = vsub.s32 4, %v1869_v58  ;;  %v2053_v1 = vsel %vm2049_vm0, %v2037_v53, %v2052_v39 }
  0xcf   : > { %v5099_v48 = vmul.u32.u64.low %v2063_v9, %v2062_v27  ;;  %v5100_v3 = vmul.u32.u64.high %v2063_v9, %v2062_v27, %v5099_v48  ;;  %v5104_v59 = vmul.u32.u64.low %v2063_v9, %v2058_v14  ;;  %v5105_v28 = vmul.u32.u64.high %v2063_v9, %v2058_v14, %v5104_v59 }
  0xd0   : > { %v8676_v51 = vand.u32 2147483647, %v4979_v25  ;;  %v5109_v7 = vand.u32 31, %v4999_v37  ;;  %v5111_v24 = vsub.s32 %v1867_v20, %v1870_v55  ;;  %v1894_v60 = vsel %vm1809_vm11, %v1893_v4, %v1869_v58 }
  0xd1   : > { %v1706_v31 = vand.u32 2139095040, %v4979_v25  ;;  %v5117_v12 = vand.u32 31, %v5021_v63  ;;  %vm1506_vm2 = vcmp.gt.s32.totalorder %v5037_v36, 0  ;;  %v5122_v53 = vadd.f32 %v5097_v56, %v4937_v35 }
  0xd2   : > { %8769 = vst [vmem:[#allocation21_spill] sm:$0xff] %v5109_v7  ;;  %v1896_v39 = vsel %vm5070_vm13, 0, %v1894_v60  ;;  %v5127_v55 = vand.u32 31, %v5089_v19  ;;  %v1873_v20 = vsub.s32 0, %v5111_v24  ;;  %v2054_v58 = vsel %vm2048_vm15, %v2051_v8, %v2053_v1 }
  0xd3   : > { %8770 = vst [vmem:[#allocation22_spill] sm:$0xff] %v5117_v12  ;;  %vm2072_vm3 = vc.u32 %v5100_v3, %v5104_v59  ;;  %vm1610_vm4 = vcmp.gt.s32.totalorder %v5053_v32, 0  ;;  %v2073_v41 = vadd.s32 1, %v5105_v28  ;;  %v1707_v14 = vshrl.u32 %v1706_v31, 23 }
  0xd4   : > { %v1710_v35 = vand.u32 8388607, %v8676_v51  ;;  %v5139_v27 = vadd.f32 %v5097_v56, %v4939_v40  ;;  %v5143_v4 = vadd.f32 %v5097_v56, %v4949_v54  ;;  %v4261_v43 = vmin.u32 %v1873_v20, %v5111_v24 }
  0xd5   : > { %v1900_v8 = vadd.s32 3, %v1896_v39  ;;  %v2070_v1 = vmul.u32 %v2063_v9, %v2054_v58  ;;  %v2074_v60 = vsel %vm2072_vm3, %v2073_v41, %v5105_v28  ;;  %v4256_v31 = vadd.s32 4294967169, %v1707_v14 }
  0xd6   : > { %v5149_v52 = vsub.s32 32, %v5127_v55  ;;  %v5154_v40 = vsel %vm1506_vm2, %v5037_v36, 0  ;;  %v5157_v54 = vsel %vm1610_vm4, %v5053_v32, 0  ;;  %v1875_v51 = vclz %v4261_v43 }
  0xd7   : > { %v1863_v39 = vadd.s32 %v5028_v11, %v5035_v30  ;;  %v2075_v20 = vadd.s32 %v2074_v60, %v2070_v1  ;;  %v1711_v9 = vor.u32 8388608, %v1710_v35  ;;  %v1713_v58 = vadd.s32 1, %v4256_v31 }
  0xd8   : > { %v4262_v28 = vadd.s32 4294967294, %v1875_v51  ;;  %v5161_v41 = vand.u32 3, %v1900_v8  ;;  %v5164_v14 = vadd.s32 %v5104_v59, %v5100_v3  ;;  %v8686_v48 = vand.u32 2147483647, %v4923_v17 }
  0xd9   : > { %v2076_v36 = vadd.s32 536870912, %v2075_v20  ;;  %vm1714_vm5 = vcmp.gt.s32.totalorder %v1713_v58, 0  ;;  %v5169_v32 = vshrl.u32 %v8680_v38, %v4990_v42  ;;  %v1929_v11 = vshrl.u32 %v8677_v34, %v4990_v42 }
  0xda   : > { %vm4263_vm6 = vcmp.lt.s32.totalorder %v4262_v28, 0  ;;  %v1715_v30 = vsel %vm1714_vm5, %v1713_v58, 0  ;;  %v1928_v51 = vshll.u32 %v8680_v38, %v4973_v13  ;;  %v8771_v35 = vmov 2131351028  }
  0xdb   : > { %v1932_v3 = vshrl.u32 %v8771_v35, %v4990_v42  ;;  %v1878_v59 = vsel %vm4263_vm6, 0, %v4262_v28  ;;  %v2077_v43 = vshrl.u32 %v2076_v36, 30  ;;  %v1717_v8 = vand.u32 31, %v1715_v30 }
  0xdc   : > { %v5177_v1 = vshll.u32 %v1711_v9, 8  ;;  %v1879_v60 = vsub.s32 32, %v1878_v59  ;;  %v1883_v31 = vsub.s32 4294967266, %v1878_v59  ;;  %vm2017_vm7 = vcmp.lt.s32.totalorder %v4926_v18, 0 }
  0xdd   : > { %v5182_v34 = vand.u32 8388607, %v8686_v48  ;;  %v8772_v58 = vmov 2475754826   ;;  %v2078_v38 = vshll.u32 %v2077_v43, 30  ;;  %v1718_v26 = vsub.s32 32, %v1717_v8 }
  0xde   : > { %v1931_v21 = vshll.u32 %v8772_v58, %v4973_v13  ;;  %v5186_v56 = vor.u32 %v1929_v11, %v1928_v51  ;;  %v1934_v28 = vshll.u32 %v8771_v35, %v4973_v13  ;;  %v1880_v9 = vshll.u32 %v5111_v24, %v1878_v59 }
  0xdf   : > { %v1881_v36 = vshrl.u32 %v1863_v39, %v1879_v60  ;;  %v1884_v0 = vadd.s32 127, %v1883_v31  ;;  %v5193_v44 = vsub.s32 %v2075_v20, %v2078_v38  ;;  %v1716_v48 = vshrl.u32 %v1715_v30, 5 }
  0xe0   : > { %v5191_v15 = vor.u32 %v1932_v3, %v1931_v21  ;;  %v1721_v22 = vshrl.u32 %v8772_v58, %v1718_v26  ;;  %v1935_v2 = vshrl.u32 %v8773_v47, %v4990_v42  ;;  %v8774_v51 = vmov 683565275  }
  0xe1   : > { %v1882_v46 = vor.u32 %v1881_v36, %v1880_v9  ;;  %v1885_v11 = vshll.u32 %v1884_v0, 23  ;;  %v1720_v45 = vshll.u32 %v8774_v51, %v1717_v8  ;;  %v1724_v57 = vshrl.u32 %v8771_v35, %v1718_v26 }
  0xe2   : > { %v2081_v24 = vsub.s32 0, %v5193_v44  ;;  %v2101_v39 = vsub.s32 4, %v2077_v43  ;;  %v1723_v21 = vshll.u32 %v8772_v58, %v1717_v8  ;;  %v1727_v38 = vshrl.u32 %v8773_v47, %v1718_v26 }
  0xe3   : > { %v1886_v20 = vor.u32 4788187, %v1885_v11  ;;  %v1889_v30 = vcvt.s32.f32 %v1882_v46  ;;  %v1722_v3 = vor.u32 %v1721_v22, %v1720_v45  ;;  %v1726_v59 = vshll.u32 %v8771_v35, %v1717_v8 }
  0xe4   : > { %v4269_v60 = vmin.u32 %v2081_v24, %v5193_v44  ;;  %v1725_v31 = vor.u32 %v1724_v57, %v1723_v21  ;;  %v1729_v0 = vshll.u32 %v8773_v47, %v1717_v8  ;;  %v1730_v9 = vshrl.u32 %v8764_v62, %v1718_v26 }
  0xe5   : > { %v1887_v36 = vand.u32 2147483647, %v1886_v20  ;;  %v1728_v49 = vor.u32 %v1727_v38, %v1726_v59  ;;  %v1732_v12 = vshll.u32 %v8764_v62, %v1717_v8  ;;  %v8775_v7 = vmov 1326507024  }
  0xe6   : > { %v1733_v23 = vshrl.u32 %v8775_v7, %v1718_v26  ;;  %v2083_v63 = vclz %v4269_v60  ;;  %v5211_v46 = vsel %vm2017_vm7, %v2101_v39, %v2077_v43  ;;  %v1719_v22 = vshrl.u32 %v8774_v51, %v1718_v26 }
  0xe7   : > { %v5214_v45 = vor.u32 %v1935_v2, %v1934_v28  ;;  %v1890_v57 = vmul.f32 %v1889_v30, %v1887_v36  ;;  %v1731_v11 = vor.u32 %v1730_v9, %v1729_v0  ;;  %vm1735_vm8 = vcmp.lt.s32.totalorder %v1716_v48, 1 }
  0xe8   : > { %v1734_v24 = vor.u32 %v1733_v23, %v1732_v12  ;;  %v4270_v21 = vadd.s32 4294967294, %v2083_v63  ;;  %vm1736_vm9 = vcmp.lt.s32.totalorder %v1716_v48, 2  ;;  %vm1737_vm10 = vcmp.lt.s32.totalorder %v1716_v48, 3 }
  0xe9   : > { %vm1738_vm12 = vcmp.lt.s32.totalorder %v1716_v48, 4  ;;  %v1891_v8 = vxor.u32 2147483648, %v1890_v57  ;;  %v8776_v38 = vand.u32 2147483647, %v4926_v18  ;;  %v1743_v26 = vsel %vm1735_vm8, %v1722_v3, %v1725_v31 }
  0xea   : > { %v1740_v43 = vsel %vm1738_vm12, %v1728_v49, 2102212464  ;;  %v1744_v2 = vsel %vm1738_vm12, %v1731_v11, 920167782  ;;  %vm4271_vm15 = vcmp.lt.s32.totalorder %v4270_v21, 0  ;;  %v1739_v23 = vsel %vm1735_vm8, %v1719_v22, %v1722_v3 }
  0xeb   : > { %vm5218_vm14 = vcmp.le.f32.partialorder %v8776_v38, 0.7853982  ;;  %v1741_v63 = vsel %vm1737_vm10, %v1725_v31, %v1740_v43  ;;  %v1745_v12 = vsel %vm1737_vm10, %v1728_v49, %v1744_v2  ;;  %v1892_v28 = vsel %vm1809_vm11, %v1891_v8, %v1890_v57 }
  0xec   : > { %v2086_v39 = vsel %vm4271_vm15, 0, %v4270_v21  ;;  %v1746_v30 = vsel %vm1736_vm9, %v1743_v26, %v1745_v12  ;;  %v1747_v59 = vsel %vm1735_vm8, %v1725_v31, %v1728_v49  ;;  %v1895_v60 = vsel %vm5070_vm13, %v4920_v16, %v1892_v28 }
  0xed   : > { %v2087_v0 = vsub.s32 32, %v2086_v39  ;;  %v2088_v9 = vshll.u32 %v5193_v44, %v2086_v39  ;;  %v2091_v3 = vsub.s32 4294967266, %v2086_v39  ;;  %4534 = vcosq.f32 %v1895_v60 }
  0xee   : > { %v1748_v36 = vsel %vm1738_vm12, %v1734_v24, 1326507024  ;;  %v5238_v22 = vmul.u32.u64.low %v5177_v1, %v1746_v30  ;;  %v5239_v38 = vmul.u32.u64.high %v5177_v1, %v1746_v30, %v5238_v22  ;;  %4536 = vsinq.f32 %v1895_v60 }
  0xef   : > { %v2089_v57 = vshrl.u32 %v5164_v14, %v2087_v0  ;;  %v2092_v49 = vadd.s32 127, %v2091_v3  ;;  %v1749_v31 = vsel %vm1737_vm10, %v1731_v11, %v1748_v36  ;;  %v1742_v50 = vsel %vm1736_vm9, %v1739_v23, %v1741_v63 }
  0xf0   : > { %v1750_v21 = vsel %vm1736_vm9, %v1747_v59, %v1749_v31  ;;  %v1937_v44 = vshll.u32 %v8773_v47, %v4973_v13  ;;  %v1938_v24 = vshrl.u32 %v8764_v62, %v4990_v42  ;;  %v1761_v14 = vadd.s32 1, %v5239_v38 }
  0xf1   : > { %v2090_v8 = vor.u32 %v2089_v57, %v2088_v9  ;;  %v2093_v43 = vshll.u32 %v2092_v49, 23  ;;  %v5251_v26 = vmul.u32.u64.low %v5177_v1, %v1750_v21  ;;  %v5252_v2 = vmul.u32.u64.high %v5177_v1, %v1750_v21, %v5251_v26 }
  0xf2   : > { %v1939_v12 = vor.u32 %v1938_v24, %v1937_v44  ;;  %v1940_v11 = vshll.u32 %v8764_v62, %v4973_v13  ;;  %v1941_v48 = vshrl.u32 %v8775_v7, %v4990_v42  ;;  %v2104_v63 = vsel %vm5218_vm14, 0, %v5211_v46 }
  0xf3   : > { %v2094_v23 = vor.u32 4788187, %v2093_v43  ;;  %v1758_v28 = vmul.u32 %v5177_v1, %v1742_v50  ;;  %v1919_v39 = vor.u32 8388608, %v5182_v34  ;;  %v2097_v30 = vcvt.s32.f32 %v2090_v8 }
  0xf4   : > { %v1942_v59 = vor.u32 %v1941_v48, %v1940_v11  ;;  %vm1943_vm11 = vcmp.lt.s32.totalorder %v4986_v29, 1  ;;  %vm1944_vm13 = vcmp.lt.s32.totalorder %v4986_v29, 2  ;;  %vm1760_vm0 = vc.u32 %v5252_v2, %v5238_v22 }
  0xf5   : > { %v2095_v60 = vand.u32 2147483647, %v2094_v23  ;;  %vm1945_vm1 = vcmp.lt.s32.totalorder %v4986_v29, 3  ;;  %vm1946_vm2 = vcmp.lt.s32.totalorder %v4986_v29, 4  ;;  %v1762_v13 = vsel %vm1760_vm0, %v1761_v14, %v5239_v38 }
  0xf6   : > { %v1948_v42 = vsel %vm1946_vm2, %v5214_v45, 2102212464  ;;  %v1951_v34 = vsel %vm1943_vm11, %v5186_v56, %v5191_v15  ;;  %v1952_v1 = vsel %vm1946_vm2, %v1939_v12, 920167782  ;;  %v1763_v0 = vadd.s32 %v1762_v13, %v1758_v28 }
  0xf7   : > { %v2098_v46 = vmul.f32 %v2097_v30, %v2095_v60  ;;  %v1947_v9 = vsel %vm1943_vm11, %v5169_v32, %v5186_v56  ;;  %v1953_v3 = vsel %vm1945_vm1, %v5214_v45, %v1952_v1  ;;  %vm1899_vm3 = vweird.f32 %v4920_v16 }
  0xf8   : > { %vm1705_vm4 = vcmp.lt.s32.totalorder %v4979_v25, 0  ;;  %v1954_v36 = vsel %vm1944_vm13, %v1951_v34, %v1953_v3  ;;  %v1955_v38 = vsel %vm1943_vm11, %v5191_v15, %v5214_v45  ;;  %v1956_v57 = vsel %vm1946_vm2, %v1942_v59, 1326507024 }
  0xf9   : > { %v1959_v49 = vshll.u32 %v1919_v39, 8  ;;  %v2099_v31 = vxor.u32 2147483648, %v2098_v46  ;;  %v1764_v56 = vadd.s32 536870912, %v1763_v0  ;;  %v1949_v32 = vsel %vm1945_vm1, %v5191_v15, %v1948_v42 }
  0xfa   : > { %v1957_v50 = vsel %vm1945_vm1, %v1939_v12, %v1956_v57  ;;  %v2108_v21 = vadd.s32 3, %v2104_v63  ;;  %v4535_v43 = vpop.eup %4534  ;;  %vm1906_vm5 = vcmp.eq.s32.totalorder %v5161_v41, 2  ;;  %v1950_v23 = vsel %vm1944_vm13, %v1947_v9, %v1949_v32 }
  0xfb   : > { %v1958_v44 = vsel %vm1944_vm13, %v1955_v38, %v1957_v50  ;;  %v5298_v24 = vmul.u32.u64.low %v1959_v49, %v1954_v36  ;;  %v5299_v8 = vmul.u32.u64.high %v1959_v49, %v1954_v36, %v5298_v24  ;;  %v2100_v45 = vsel %vm2017_vm7, %v2099_v31, %v2098_v46  ;;  %v4537_v48 = vpop.eup %4536 }
  0xfc   : > { %v1765_v26 = vshrl.u32 %v1764_v56, 30  ;;  %v5303_v14 = vmul.u32.u64.low %v1959_v49, %v1958_v44  ;;  %v5304_v11 = vmul.u32.u64.high %v1959_v49, %v1958_v44, %v5303_v14  ;;  %v1907_v15 = vxor.u32 2147483648, %v4535_v43 }
  0xfd   : > { %v2103_v12 = vsel %vm5218_vm14, %v4926_v18, %v2100_v45  ;;  %v1904_v63 = vxor.u32 2147483648, %v4537_v48  ;;  %vm1903_vm6 = vcmp.eq.s32.totalorder %v5161_v41, 0  ;;  %v1969_v59 = vadd.s32 1, %v5299_v8 }
  0xfe   : > { %4538 = vcosq.f32 %v2103_v12  ;;  %v1766_v28 = vshll.u32 %v1765_v26, 30  ;;  %v1789_v39 = vsub.s32 4, %v1765_v26  ;;  %v1908_v30 = vsel %vm1906_vm5, %v1907_v15, %v4537_v48 }
  0xff   : > { %4540 = vsinq.f32 %v2103_v12  ;;  %vm1902_vm7 = vcmp.lt.s32.totalorder %v5161_v41, 2  ;;  %v1905_v60 = vsel %vm1903_vm6, %v4535_v43, %v1904_v63  ;;  %v5315_v13 = vand.u32 3, %v2108_v21 }
 0x100   : > { %v5317_v20 = vsub.s32 %v1763_v0, %v1766_v28  ;;  %v1909_v42 = vsel %vm1902_vm7, %v1905_v60, %v1908_v30  ;;  %v1966_v29 = vmul.u32 %v1959_v49, %v1950_v23  ;;  %vm1968_vm8 = vc.u32 %v5304_v11, %v5298_v24 }
 0x101   : > { %v1391_v34 = vand.u32 2147483647, %v4961_v5  ;;  %v1910_v1 = vsel %vm1899_vm3, nan, %v1909_v42  ;;  %v1790_v9 = vsel %vm1705_vm4, %v1789_v39, %v1765_v26  ;;  %v1970_v41 = vsel %vm1968_vm8, %v1969_v59, %v5299_v8 }
 0x102   : > { %v1769_v46 = vsub.s32 0, %v5317_v20  ;;  %v8779_v3 = vand.u32 2139095040, %v5122_v53  ;;  %v770_v38 = vand.u32 2139095040, %v5143_v4  ;;  %2184 = vmatprep.subr.mxu0 %v1910_v1  ;;  %v1971_v57 = vadd.s32 %v1970_v41, %v1966_v29 }
 0x103   : > { %v5334_v16 = vshrl.u32 %v5089_v19, 5  ;;  %v5337_v49 = vand.u32 31, %v5154_v40  ;;  %v8780_v31 = vand.u32 2147483647, %v4979_v25  ;;  %v5347_v50 = vshrl.u32 %v5157_v54, 5 }
 0x104   : > { %v5329_v0 = vshrl.u32 %v8779_v3, 23  ;;  %v4257_v32 = vmin.u32 %v1769_v46, %v5317_v20  ;;  %v1972_v44 = vadd.s32 536870912, %v1971_v57  ;;  %v5353_v19 = vand.u32 8388607, %v1391_v34 }
 0x105   : > { %vm5341_vm9 = vcmp.le.f32.partialorder %v8780_v31, 0.7853982  ;;  %v5356_v8 = vand.u32 31, %v5157_v54  ;;  %vm2111_vm10 = vcmp.eq.s32.totalorder %v5315_v13, 0  ;;  %v1409_v45 = vshrl.u32 %v8772_v58, %v5149_v52 }
 0x106   : > { %v1792_v21 = vsel %vm5341_vm9, 0, %v1790_v9  ;;  %v1771_v43 = vclz %v4257_v32  ;;  %vm2110_vm12 = vcmp.lt.s32.totalorder %v5315_v13, 2  ;;  %vm2114_vm14 = vcmp.eq.s32.totalorder %v5315_v13, 2 }
 0x107   : > { %v1759_v26 = vadd.s32 %v5238_v22, %v5252_v2  ;;  %v5365_v14 = vshrl.u32 %v1972_v44, 30  ;;  %v1412_v48 = vshrl.u32 %v8771_v35, %v5149_v52  ;;  %vm2107_vm15 = vweird.f32 %v4926_v18 }
 0x108   : > { %v4258_v54 = vadd.s32 4294967294, %v1771_v43  ;;  %v5370_v15 = vadd.s32 3, %v1792_v21  ;;  %v5373_v12 = vadd.s32 %v5298_v24, %v5304_v11  ;;  %v1408_v23 = vshll.u32 %v8774_v51, %v5127_v55 }
 0x109   : > { %v1974_v63 = vshll.u32 %v5365_v14, 30  ;;  %v1399_v22 = vor.u32 8388608, %v5353_v19  ;;  %v1407_v2 = vshrl.u32 %v8774_v51, %v5149_v52  ;;  %v1411_v28 = vshll.u32 %v8772_v58, %v5127_v55 }
 0x10a   : > { %vm4259_vm11 = vcmp.lt.s32.totalorder %v4258_v54, 0  ;;  %v1410_v39 = vor.u32 %v1409_v45, %v1408_v23  ;;  %v1414_v30 = vshll.u32 %v8771_v35, %v5127_v55  ;;  %v1415_v24 = vshrl.u32 %v8773_v47, %v5149_v52 }
 0x10b   : > { %v4539_v11 = vpop.eup %4538  ;;  %v1774_v59 = vsel %vm4259_vm11, 0, %v4258_v54  ;;  %v5387_v60 = vsub.s32 %v1971_v57, %v1974_v63  ;;  %v1413_v42 = vor.u32 %v1412_v48, %v1411_v28  ;;  %v1418_v29 = vshrl.u32 %v8764_v62, %v5149_v52 }
 0x10c   : > { %v4541_v1 = vpop.eup %4540  ;;  %v2115_v46 = vxor.u32 2147483648, %v4539_v11  ;;  %v1775_v9 = vsub.s32 32, %v1774_v59  ;;  %v1779_v41 = vsub.s32 4294967266, %v1774_v59  ;;  %v1421_v3 = vshrl.u32 %v8775_v7, %v5149_v52 }
 0x10d   : > { %v2112_v31 = vxor.u32 2147483648, %v4541_v1  ;;  %v1977_v32 = vsub.s32 0, %v5387_v60  ;;  %v1417_v21 = vshll.u32 %v8773_v47, %v5127_v55  ;;  %v1420_v57 = vshll.u32 %v8764_v62, %v5127_v55 }
 0x10e   : > { %v2116_v44 = vsel %vm2114_vm14, %v2115_v46, %v4541_v1  ;;  %v1776_v19 = vshll.u32 %v5317_v20, %v1774_v59  ;;  %v1777_v43 = vshrl.u32 %v1759_v26, %v1775_v9  ;;  %v1780_v45 = vadd.s32 127, %v1779_v41 }
 0x10f   : > { %v2113_v48 = vsel %vm2111_vm10, %v4539_v11, %v2112_v31  ;;  %v4265_v52 = vmin.u32 %v1977_v32, %v5387_v60  ;;  %v1416_v54 = vor.u32 %v1415_v24, %v1414_v30  ;;  %v1419_v23 = vor.u32 %v1418_v29, %v1417_v21 }
 0x110   : > { %v2117_v63 = vsel %vm2110_vm12, %v2113_v48, %v2116_v44  ;;  %v1778_v28 = vor.u32 %v1777_v43, %v1776_v19  ;;  %v1781_v36 = vshll.u32 %v1780_v45, 23  ;;  %v1422_v55 = vor.u32 %v1421_v3, %v1420_v57 }
 0x111   : > { %v2118_v1 = vsel %vm2107_vm15, nan, %v2117_v63  ;;  %v1979_v46 = vclz %v4265_v52  ;;  %vm1423_vm13 = vcmp.lt.s32.totalorder %v5334_v16, 1  ;;  %vm1424_vm0 = vcmp.lt.s32.totalorder %v5334_v16, 2 }
 0x112   : > { %2273 = vmatprep.subr.mxu1 %v2118_v1  ;;  %v1782_v20 = vor.u32 4788187, %v1781_v36  ;;  %vm1425_vm1 = vcmp.lt.s32.totalorder %v5334_v16, 3  ;;  %vm1426_vm2 = vcmp.lt.s32.totalorder %v5334_v16, 4  ;;  %v1431_v13 = vsel %vm1423_vm13, %v1410_v39, %v1413_v42 }
 0x113   : > { %v1785_v26 = vcvt.s32.f32 %v1778_v28  ;;  %v4266_v30 = vadd.s32 4294967294, %v1979_v46  ;;  %v1428_v24 = vsel %vm1426_vm2, %v1416_v54, 2102212464  ;;  %v1432_v11 = vsel %vm1426_vm2, %v1419_v23, 920167782 }
 0x114   : > { %v1783_v18 = vand.u32 2147483647, %v1782_v20  ;;  %v1433_v59 = vsel %vm1425_vm1, %v1416_v54, %v1432_v11  ;;  %v1435_v29 = vsel %vm1423_vm13, %v1413_v42, %v1416_v54  ;;  %v1436_v9 = vsel %vm1426_vm2, %v1422_v55, 1326507024 }
 0x115   : > { %vm4267_vm3 = vcmp.lt.s32.totalorder %v4266_v30, 0  ;;  %v1997_v36 = vsub.s32 4, %v5365_v14  ;;  %v1434_v41 = vsel %vm1424_vm0, %v1431_v13, %v1433_v59  ;;  %v1437_v3 = vsel %vm1425_vm1, %v1419_v23, %v1436_v9 }
 0x116   : > { %v1786_v31 = vmul.f32 %v1785_v26, %v1783_v18  ;;  %v1982_v32 = vsel %vm4267_vm3, 0, %v4266_v30  ;;  %v1438_v21 = vsel %vm1424_vm0, %v1435_v29, %v1437_v3  ;;  %v1439_v57 = vshll.u32 %v1399_v22, 8 }
 0x117   : > { %v1983_v44 = vsub.s32 32, %v1982_v32  ;;  %v1987_v19 = vsub.s32 4294967266, %v1982_v32  ;;  %v1427_v43 = vsel %vm1423_vm13, %v1407_v2, %v1410_v39  ;;  %v1429_v45 = vsel %vm1425_vm1, %v1413_v42, %v1428_v24 }
 0x118   : > { %v1787_v48 = vxor.u32 2147483648, %v1786_v31  ;;  %v1984_v52 = vshll.u32 %v5387_v60, %v1982_v32  ;;  %v5430_v54 = vmul.u32.u64.low %v1439_v57, %v1438_v21  ;;  %v5431_v63 = vmul.u32.u64.high %v1439_v57, %v1438_v21, %v5430_v54 }
 0x119   : > { %v1985_v23 = vshrl.u32 %v5373_v12, %v1983_v44  ;;  %v1988_v28 = vadd.s32 127, %v1987_v19  ;;  %v5434_v55 = vmul.u32.u64.low %v1439_v57, %v1434_v41  ;;  %v5435_v1 = vmul.u32.u64.high %v1439_v57, %v1434_v41, %v5434_v55 }
 0x11a   : > { %v1614_v22 = vsub.s32 32, %v5356_v8  ;;  %v1788_v2 = vsel %vm1705_vm4, %v1787_v48, %v1786_v31  ;;  %v8783_v39 = vand.u32 2147483647, %v4923_v17  ;;  %vm1913_vm6 = vcmp.lt.s32.totalorder %v4923_v17, 0 }
 0x11b   : > { %v1791_v12 = vsel %vm5341_vm9, %v4979_v25, %v1788_v2  ;;  %v1986_v60 = vor.u32 %v1985_v23, %v1984_v52  ;;  %v1989_v46 = vshll.u32 %v1988_v28, 23  ;;  %v1430_v20 = vsel %vm1424_vm0, %v1427_v43, %v1429_v45 }
 0x11c   : > { %vm5443_vm5 = vcmp.le.f32.partialorder %v8783_v39, 0.7853982  ;;  %4542 = vcosq.f32 %v1791_v12  ;;  %v5454_v13 = vand.u32 3, %v5370_v15  ;;  %vm1448_vm4 = vc.u32 %v5431_v63, %v5434_v55 }
 0x11d   : > { %v1599_v26 = vand.u32 2147483647, %v4969_v33  ;;  %4544 = vsinq.f32 %v1791_v12  ;;  %v1990_v30 = vor.u32 4788187, %v1989_v46  ;;  %v1998_v56 = vsel %vm1913_vm6, %v1997_v36, %v5365_v14 }
 0x11e   : > { %v1449_v24 = vadd.s32 1, %v5435_v1  ;;  %v1993_v11 = vcvt.s32.f32 %v1986_v60  ;;  %v1446_v16 = vmul.u32 %v1439_v57, %v1430_v20  ;;  %v1617_v18 = vshrl.u32 %v8772_v58, %v1614_v22 }
 0x11f   : > { %v1620_v15 = vshrl.u32 %v8771_v35, %v1614_v22  ;;  %v1991_v59 = vand.u32 2147483647, %v1990_v30  ;;  %v1616_v9 = vshll.u32 %v8774_v51, %v5356_v8  ;;  %v1623_v41 = vshrl.u32 %v8773_v47, %v1614_v22 }
 0x120   : > { %v1450_v29 = vsel %vm1448_vm4, %v1449_v24, %v5435_v1  ;;  %v1606_v14 = vand.u32 8388607, %v1599_v26  ;;  %v1619_v36 = vshll.u32 %v8772_v58, %v5356_v8  ;;  %v1622_v31 = vshll.u32 %v8771_v35, %v5356_v8 }
 0x121   : > { %v1451_v3 = vadd.s32 %v1450_v29, %v1446_v16  ;;  %v1994_v32 = vmul.f32 %v1993_v11, %v1991_v59  ;;  %v1618_v21 = vor.u32 %v1617_v18, %v1616_v9  ;;  %v1625_v57 = vshll.u32 %v8773_v47, %v5356_v8 }
 0x122   : > { %v1626_v44 = vshrl.u32 %v8764_v62, %v1614_v22  ;;  %v1621_v43 = vor.u32 %v1620_v15, %v1619_v36  ;;  %v1628_v45 = vshll.u32 %v8764_v62, %v5356_v8  ;;  %v1629_v48 = vshrl.u32 %v8775_v7, %v1614_v22 }
 0x123   : > { %v1452_v19 = vadd.s32 536870912, %v1451_v3  ;;  %vm1802_vm7 = vcmp.eq.s32.totalorder %v5454_v13, 2  ;;  %v1995_v52 = vxor.u32 2147483648, %v1994_v32  ;;  %v2000_v54 = vsel %vm5443_vm5, 0, %v1998_v56 }
 0x124   : > { %v1624_v23 = vor.u32 %v1623_v41, %v1622_v31  ;;  %v1627_v28 = vor.u32 %v1626_v44, %v1625_v57  ;;  %vm1799_vm8 = vcmp.eq.s32.totalorder %v5454_v13, 0  ;;  %v1615_v2 = vshrl.u32 %v8774_v51, %v1614_v22 }
 0x125   : > { %v1453_v1 = vshrl.u32 %v1452_v19, 30  ;;  %v1630_v39 = vor.u32 %v1629_v48, %v1628_v45  ;;  %vm1634_vm9 = vcmp.lt.s32.totalorder %v5347_v50, 4  ;;  %vm1798_vm10 = vcmp.lt.s32.totalorder %v5454_v13, 2 }
 0x126   : > { %v1996_v8 = vsel %vm1913_vm6, %v1995_v52, %v1994_v32  ;;  %v1607_v12 = vor.u32 8388608, %v1606_v14  ;;  %vm1631_vm12 = vcmp.lt.s32.totalorder %v5347_v50, 1  ;;  %v1640_v60 = vsel %vm1634_vm9, %v1627_v28, 920167782 }
 0x127   : > { %v1999_v46 = vsel %vm5443_vm5, %v4923_v17, %v1996_v8  ;;  %v1454_v20 = vshll.u32 %v1453_v1, 30  ;;  %vm1633_vm14 = vcmp.lt.s32.totalorder %v5347_v50, 3  ;;  %v1639_v22 = vsel %vm1631_vm12, %v1618_v21, %v1621_v43 }
 0x128   : > { %4546 = vcosq.f32 %v1999_v46  ;;  %v1641_v30 = vsel %vm1633_vm14, %v1624_v23, %v1640_v60  ;;  %v1643_v56 = vsel %vm1631_vm12, %v1621_v43, %v1624_v23  ;;  %v1644_v24 = vsel %vm1634_vm9, %v1630_v39, 1326507024 }
 0x129   : > { %4548 = vsinq.f32 %v1999_v46  ;;  %v2004_v11 = vadd.s32 3, %v2000_v54  ;;  %v5505_v42 = vsub.s32 %v1451_v3, %v1454_v20  ;;  %v1636_v16 = vsel %vm1634_vm9, %v1624_v23, 2102212464  ;;  %v4543_v18 = vpop.eup %4542 }
 0x12a   : > { %vm1632_vm15 = vcmp.lt.s32.totalorder %v5347_v50, 2  ;;  %v1635_v15 = vsel %vm1631_vm12, %v1615_v2, %v1618_v21  ;;  %v1645_v59 = vsel %vm1633_vm14, %v1627_v28, %v1644_v24  ;;  %v1647_v29 = vshll.u32 %v1607_v12, 8  ;;  %v4545_v9 = vpop.eup %4544 }
 0x12b   : > { %v1803_v41 = vxor.u32 2147483648, %v4543_v18  ;;  %v1457_v14 = vsub.s32 0, %v5505_v42  ;;  %v1642_v3 = vsel %vm1632_vm15, %v1639_v22, %v1641_v30  ;;  %v1646_v36 = vsel %vm1632_vm15, %v1643_v56, %v1645_v59 }
 0x12c   : > { %v1800_v31 = vxor.u32 2147483648, %v4545_v9  ;;  %v1637_v32 = vsel %vm1633_vm14, %v1621_v43, %v1636_v16  ;;  %v5521_v57 = vmul.u32.u64.low %v1647_v29, %v1646_v36  ;;  %v5522_v21 = vmul.u32.u64.high %v1647_v29, %v1646_v36, %v5521_v57 }
 0x12d   : > { %v1804_v44 = vsel %vm1802_vm7, %v1803_v41, %v4545_v9  ;;  %v4245_v19 = vmin.u32 %v1457_v14, %v5505_v42  ;;  %v1477_v45 = vsub.s32 4, %v1453_v1  ;;  %v5529_v48 = vadd.f32 %v4951_v61, %v4912_v10 }
 0x12e   : > { %v1801_v52 = vsel %vm1799_vm8, %v4543_v18, %v1800_v31  ;;  %v2005_v54 = vand.u32 3, %v2004_v11  ;;  %v5533_v23 = vmul.u32.u64.low %v1647_v29, %v1642_v3  ;;  %v5534_v28 = vmul.u32.u64.high %v1647_v29, %v1642_v3, %v5533_v23 }
 0x12f   : > { %v5538_v43 = vshrl.u32 %v5154_v40, 5  ;;  %vm1795_vm11 = vweird.f32 %v4979_v25  ;;  %v1805_v2 = vsel %vm1798_vm10, %v1801_v52, %v1804_v44  ;;  %v1459_v39 = vclz %v4245_v19 }
 0x130   : > { %v5544_v10 = vsub.s32 32, %v5337_v49  ;;  %v1806_v61 = vsel %vm1795_vm11, nan, %v1805_v2  ;;  %vm1393_vm13 = vcmp.lt.s32.totalorder %v4961_v5, 0  ;;  %v1638_v8 = vsel %vm1632_vm15, %v1635_v15, %v1637_v32 }
 0x131   : > { %2185 = vmatpush1.msra.mxu0 %v1806_v61  ;;  %v4246_v12 = vadd.s32 4294967294, %v1459_v39  ;;  %v1478_v40 = vsel %vm1393_vm13, %v1477_v45, %v1453_v1  ;;  %vm1656_vm0 = vc.u32 %v5522_v21, %v5533_v23  ;;  %v1290_v25 = vand.u32 2139095040, %v5529_v48 }
 0x132   : > { %vm2003_vm1 = vweird.f32 %v4923_v17  ;;  %vm2006_vm2 = vcmp.lt.s32.totalorder %v2005_v54, 2  ;;  %vm5557_vm3 = vcmp.le.f32.partialorder %v1391_v34, 0.7853982  ;;  %v1657_v50 = vadd.s32 1, %v5534_v28 }
 0x133   : > { %v1287_v60 = vand.u32 2147483647, %v5529_v48  ;;  %vm2010_vm5 = vcmp.eq.s32.totalorder %v2005_v54, 2  ;;  %vm4247_vm6 = vcmp.lt.s32.totalorder %v4246_v12, 0  ;;  %v1654_v1 = vmul.u32 %v1647_v29, %v1638_v8 }
 0x134   : > { %v1291_v46 = vshrl.u32 %v1290_v25, 23  ;;  %v1447_v20 = vadd.s32 %v5434_v55, %v5431_v63  ;;  %v1462_v22 = vsel %vm4247_vm6, 0, %v4246_v12  ;;  %v1480_v30 = vsel %vm5557_vm3, 0, %v1478_v40 }
 0x135   : > { %v1658_v34 = vsel %vm1656_vm0, %v1657_v50, %v5534_v28  ;;  %v4547_v56 = vpop.eup %4546  ;;  %v1463_v24 = vsub.s32 32, %v1462_v22  ;;  %v1467_v11 = vsub.s32 4294967266, %v1462_v22  ;;  %v1495_v18 = vand.u32 2147483647, %v4965_v6 }
 0x136   : > { %v1659_v16 = vadd.s32 %v1658_v34, %v1654_v1  ;;  %v4549_v15 = vpop.eup %4548  ;;  %v2011_v59 = vxor.u32 2147483648, %v4547_v56  ;;  %v1464_v29 = vshll.u32 %v5505_v42, %v1462_v22  ;;  %v4240_v9 = vadd.s32 4294967169, %v1291_v46 }
 0x137   : > { %v1294_v63 = vand.u32 8388607, %v1287_v60  ;;  %v2008_v55 = vxor.u32 2147483648, %v4549_v15  ;;  %v1465_v41 = vshrl.u32 %v1447_v20, %v1463_v24  ;;  %v1468_v14 = vadd.s32 127, %v1467_v11 }
 0x138   : > { %v1660_v3 = vadd.s32 536870912, %v1659_v16  ;;  %vm2007_vm4 = vcmp.eq.s32.totalorder %v2005_v54, 0  ;;  %v2012_v36 = vsel %vm2010_vm5, %v2011_v59, %v4549_v15  ;;  %vm1601_vm7 = vcmp.lt.s32.totalorder %v4969_v33, 0 }
 0x139   : > { %v1297_v31 = vadd.s32 1, %v4240_v9  ;;  %v2009_v32 = vsel %vm2007_vm4, %v4547_v56, %v2008_v55  ;;  %v1466_v57 = vor.u32 %v1465_v41, %v1464_v29  ;;  %v1469_v44 = vshll.u32 %v1468_v14, 23 }
 0x13a   : > { %v1661_v19 = vshrl.u32 %v1660_v3, 30  ;;  %v2013_v42 = vsel %vm2006_vm2, %v2009_v32, %v2012_v36  ;;  %v1484_v45 = vadd.s32 3, %v1480_v30  ;;  %v5577_v52 = vand.u32 8388607, %v1495_v18 }
 0x13b   : > { %vm1298_vm8 = vcmp.gt.s32.totalorder %v1297_v31, 0  ;;  %v2014_v28 = vsel %vm2003_vm1, nan, %v2013_v42  ;;  %v1470_v2 = vor.u32 4788187, %v1469_v44  ;;  %v1295_v61 = vor.u32 8388608, %v1294_v63 }
 0x13c   : > { %v1662_v39 = vshll.u32 %v1661_v19, 30  ;;  %2274 = vmatpush1.msra.mxu1 %v2014_v28  ;;  %v1473_v8 = vcvt.s32.f32 %v1466_v57  ;;  %v1685_v12 = vsub.s32 4, %v1661_v19  ;;  %v1299_v40 = vsel %vm1298_vm8, %v1297_v31, 0 }
 0x13d   : > { %v1513_v54 = vshrl.u32 %v8772_v58, %v5544_v10  ;;  %v1471_v25 = vand.u32 2147483647, %v1470_v2  ;;  %v1301_v1 = vand.u32 31, %v1299_v40  ;;  %v1516_v46 = vshrl.u32 %v8771_v35, %v5544_v10 }
 0x13e   : > { %v5583_v50 = vsub.s32 %v1659_v16, %v1662_v39  ;;  %v5587_v20 = vand.u32 3, %v1484_v45  ;;  %v1655_v17 = vadd.s32 %v5533_v23, %v5522_v21  ;;  %v1503_v22 = vor.u32 8388608, %v5577_v52 }
 0x13f   : > { %v1512_v30 = vshll.u32 %v8774_v51, %v5337_v49  ;;  %v1474_v34 = vmul.f32 %v1473_v8, %v1471_v25  ;;  %v1302_v24 = vsub.s32 32, %v1301_v1  ;;  %v1515_v11 = vshll.u32 %v8772_v58, %v5337_v49 }
 0x140   : > { %v1665_v56 = vsub.s32 0, %v5583_v50  ;;  %v5599_v16 = vsel %vm1601_vm7, %v1685_v12, %v1661_v19  ;;  %v1300_v15 = vshrl.u32 %v1299_v40, 5  ;;  %v5601_v59 = vshll.u32 %v1295_v61, 8 }
 0x141   : > { %v5603_v21 = vor.u32 %v1513_v54, %v1512_v30  ;;  %v1475_v23 = vxor.u32 2147483648, %v1474_v34  ;;  %v1305_v9 = vshrl.u32 %v8772_v58, %v1302_v24  ;;  %v5607_v63 = vor.u32 %v1516_v46, %v1515_v11 }
 0x142   : > { %v4253_v29 = vmin.u32 %v1665_v56, %v5583_v50  ;;  %v1304_v55 = vshll.u32 %v8774_v51, %v1301_v1  ;;  %v1307_v41 = vshll.u32 %v8772_v58, %v1301_v1  ;;  %v1308_v14 = vshrl.u32 %v8771_v35, %v1302_v24 }
 0x143   : > { %v1311_v3 = vshrl.u32 %v8773_v47, %v1302_v24  ;;  %v1476_v36 = vsel %vm1393_vm13, %v1475_v23, %v1474_v34  ;;  %vm5617_vm9 = vcmp.le.f32.partialorder %v1599_v26, 0.7853982  ;;  %v1310_v57 = vshll.u32 %v8771_v35, %v1301_v1 }
 0x144   : > { %v1667_v32 = vclz %v4253_v29  ;;  %v1314_v44 = vshrl.u32 %v8764_v62, %v1302_v24  ;;  %v1479_v19 = vsel %vm5557_vm3, %v4961_v5, %v1476_v36  ;;  %v1306_v42 = vor.u32 %v1305_v9, %v1304_v55 }
 0x145   : > { %v1313_v45 = vshll.u32 %v8773_v47, %v1301_v1  ;;  %v1518_v28 = vshll.u32 %v8771_v35, %v5337_v49  ;;  %4550 = vcosq.f32 %v1479_v19  ;;  %v1309_v2 = vor.u32 %v1308_v14, %v1307_v41 }
 0x146   : > { %v4254_v26 = vadd.s32 4294967294, %v1667_v32  ;;  %v1312_v39 = vor.u32 %v1311_v3, %v1310_v57  ;;  %4552 = vsinq.f32 %v1479_v19  ;;  %v1316_v8 = vshll.u32 %v8764_v62, %v1301_v1 }
 0x147   : > { %v1315_v61 = vor.u32 %v1314_v44, %v1313_v45  ;;  %v1317_v12 = vshrl.u32 %v8775_v7, %v1302_v24  ;;  %v1303_v13 = vshrl.u32 %v8774_v51, %v1302_v24  ;;  %vm1319_vm12 = vcmp.lt.s32.totalorder %v1300_v15, 1 }
 0x148   : > { %vm4255_vm10 = vcmp.lt.s32.totalorder %v4254_v26, 0  ;;  %vm1320_vm14 = vcmp.lt.s32.totalorder %v1300_v15, 2  ;;  %vm1321_vm15 = vcmp.lt.s32.totalorder %v1300_v15, 3  ;;  %vm1322_vm11 = vcmp.lt.s32.totalorder %v1300_v15, 4 }
 0x149   : > { %v1670_v40 = vsel %vm4255_vm10, 0, %v4254_v26  ;;  %v1318_v54 = vor.u32 %v1317_v12, %v1316_v8  ;;  %v1323_v30 = vsel %vm1319_vm12, %v1303_v13, %v1306_v42  ;;  %v1324_v34 = vsel %vm1322_vm11, %v1312_v39, 2102212464 }
 0x14a   : > { %v1671_v25 = vsub.s32 32, %v1670_v40  ;;  %v1675_v46 = vsub.s32 4294967266, %v1670_v40  ;;  %v1672_v56 = vshll.u32 %v5583_v50, %v1670_v40  ;;  %v1325_v1 = vsel %vm1321_vm15, %v1309_v2, %v1324_v34 }
 0x14b   : > { %v1327_v11 = vsel %vm1319_vm12, %v1306_v42, %v1309_v2  ;;  %v1328_v24 = vsel %vm1322_vm11, %v1315_v61, 920167782  ;;  %v1331_v55 = vsel %vm1319_vm12, %v1309_v2, %v1312_v39  ;;  %vm1490_vm13 = vcmp.eq.s32.totalorder %v5587_v20, 2 }
 0x14c   : > { %v1673_v23 = vshrl.u32 %v1655_v17, %v1671_v25  ;;  %v1676_v29 = vadd.s32 127, %v1675_v46  ;;  %v1329_v9 = vsel %vm1321_vm15, %v1312_v39, %v1328_v24  ;;  %v1688_v41 = vsel %vm5617_vm9, 0, %v5599_v16 }
 0x14d   : > { %v1330_v50 = vsel %vm1320_vm14, %v1327_v11, %v1329_v9  ;;  %v1332_v14 = vsel %vm1322_vm11, %v1318_v54, 1326507024  ;;  %v1519_v3 = vshrl.u32 %v8773_v47, %v5544_v10  ;;  %vm1487_vm0 = vcmp.eq.s32.totalorder %v5587_v20, 0 }
 0x14e   : > { %v1674_v17 = vor.u32 %v1673_v23, %v1672_v56  ;;  %v1677_v36 = vshll.u32 %v1676_v29, 23  ;;  %v1326_v32 = vsel %vm1320_vm14, %v1323_v30, %v1325_v1  ;;  %v1333_v57 = vsel %vm1321_vm15, %v1315_v61, %v1332_v14 }
 0x14f   : > { %vm1486_vm1 = vcmp.lt.s32.totalorder %v5587_v20, 2  ;;  %v1334_v44 = vsel %vm1320_vm14, %v1331_v55, %v1333_v57  ;;  %v5654_v16 = vmul.u32.u64.low %v5601_v59, %v1330_v50  ;;  %v5655_v19 = vmul.u32.u64.high %v5601_v59, %v1330_v50, %v5654_v16 }
 0x150   : > { %v1522_v42 = vshrl.u32 %v8764_v62, %v5544_v10  ;;  %vm1483_vm2 = vweird.f32 %v4961_v5  ;;  %v1678_v45 = vor.u32 4788187, %v1677_v36  ;;  %v1521_v39 = vshll.u32 %v8773_v47, %v5337_v49 }
 0x151   : > { %v5662_v26 = vmul.u32.u64.low %v5601_v59, %v1334_v44  ;;  %v5663_v2 = vmul.u32.u64.high %v5601_v59, %v1334_v44, %v5662_v26  ;;  %v1692_v15 = vadd.s32 3, %v1688_v41  ;;  %v1520_v61 = vor.u32 %v1519_v3, %v1518_v28 }
 0x152   : > { %v1524_v8 = vshll.u32 %v8764_v62, %v5337_v49  ;;  %v1525_v12 = vshrl.u32 %v8775_v7, %v5544_v10  ;;  %v1679_v13 = vand.u32 2147483647, %v1678_v45  ;;  %v1681_v40 = vcvt.s32.f32 %v1674_v17  ;;  %v4551_v46 = vpop.eup %4550 }
 0x153   : > { %v1342_v54 = vmul.u32 %v5601_v59, %v1326_v32  ;;  %v1523_v25 = vor.u32 %v1522_v42, %v1521_v39  ;;  %v1345_v30 = vadd.s32 1, %v5655_v19  ;;  %vm1527_vm3 = vcmp.lt.s32.totalorder %v5538_v43, 1  ;;  %v4553_v28 = vpop.eup %4552 }
 0x154   : > { %v1526_v34 = vor.u32 %v1525_v12, %v1524_v8  ;;  %vm1528_vm5 = vcmp.lt.s32.totalorder %v5538_v43, 2  ;;  %v1491_v56 = vxor.u32 2147483648, %v4551_v46  ;;  %v1682_v1 = vmul.f32 %v1681_v40, %v1679_v13 }
 0x155   : > { %vm1344_vm6 = vc.u32 %v5663_v2, %v5654_v16  ;;  %vm1530_vm4 = vcmp.lt.s32.totalorder %v5538_v43, 4  ;;  %v1488_v49 = vxor.u32 2147483648, %v4553_v28  ;;  %vm1529_vm8 = vcmp.lt.s32.totalorder %v5538_v43, 3 }
 0x156   : > { %v1346_v59 = vsel %vm1344_vm6, %v1345_v30, %v5655_v19  ;;  %v1532_v11 = vsel %vm1530_vm4, %v1520_v61, 2102212464  ;;  %v1492_v24 = vsel %vm1490_vm13, %v1491_v56, %v4553_v28  ;;  %v1683_v23 = vxor.u32 2147483648, %v1682_v1  ;;  %v8792_v30 = vld [vmem:[#allocation21_spill] sm:$0xff] }
 0x157   : > { %v1347_v29 = vadd.s32 %v1346_v59, %v1342_v54  ;;  %v1535_v9 = vsel %vm1527_vm3, %v5603_v21, %v5607_v63  ;;  %v1489_v55 = vsel %vm1487_vm0, %v4551_v46, %v1488_v49  ;;  %v1536_v41 = vsel %vm1530_vm4, %v1523_v25, 920167782 }
 0x158   : > { %v1539_v50 = vsel %vm1527_vm3, %v5607_v63, %v1520_v61  ;;  %v1540_v14 = vsel %vm1530_vm4, %v1526_v34, 1326507024  ;;  %v1493_v3 = vsel %vm1486_vm1, %v1489_v55, %v1492_v24  ;;  %v1684_v17 = vsel %vm1601_vm7, %v1683_v23, %v1682_v1  ;;  %v8793_v34 = vld [vmem:[#allocation22_spill] sm:$0xff] }
 0x159   : > { %v1348_v36 = vadd.s32 536870912, %v1347_v29  ;;  %v1537_v32 = vsel %vm1529_vm8, %v1520_v61, %v1536_v41  ;;  %v1494_v57 = vsel %vm1483_vm2, nan, %v1493_v3  ;;  %v1687_v44 = vsel %vm5617_vm9, %v4969_v33, %v1684_v17  ;;  %v8796_v17 = vld [vmem:[#allocation16_spill] sm:$0xff] }
 0x15a   : > { %v1538_v19 = vsel %vm1528_vm5, %v1535_v9, %v1537_v32  ;;  %v1541_v20 = vsel %vm1529_vm8, %v1523_v25, %v1540_v14  ;;  %2186 = vmatprep.subr.mxu0 %v1494_v57  ;;  %4554 = vcosq.f32 %v1687_v44  ;;  %v1543_v5 = vshll.u32 %v1503_v22, 8  ;;  %v8791_v25 = vld [vmem:[#allocation12_spill] sm:$0xff]  ;;  %v8795_v9 = vld [vmem:[#allocation18_spill] sm:$0xff] }
 0x15b   : > { %v1349_v42 = vshrl.u32 %v1348_v36, 30  ;;  %v1542_v45 = vsel %vm1528_vm5, %v1539_v50, %v1541_v20  ;;  %v4212_v26 = vadd.s32 4294967169, %v5329_v0  ;;  %v771_v31 = vshrl.u32 %v770_v38, 23 }
 0x15c   : > { %4556 = vsinq.f32 %v1687_v44  ;;  %v1511_v39 = vshrl.u32 %v8774_v51, %v5544_v10  ;;  %v5715_v61 = vand.u32 3, %v1692_v15  ;;  %v1533_v0 = vsel %vm1529_vm8, %v5607_v63, %v1532_v11  ;;  %v8790_v15 = vld [vmem:[#allocation19_spill] sm:$0xff] }
 0x15d   : > { %v1350_v8 = vshll.u32 %v1349_v42, 30  ;;  %v5717_v12 = vmul.u32.u64.low %v1543_v5, %v1542_v45  ;;  %v5718_v13 = vmul.u32.u64.high %v1543_v5, %v1542_v45, %v5717_v12  ;;  %v5731_v10 = vshrl.u32 %v4999_v37, 5 }
 0x15e   : > { %v1531_v52 = vsel %vm1527_vm3, %v1511_v39, %v5603_v21  ;;  %v5726_v22 = vmul.u32.u64.low %v1543_v5, %v1538_v19  ;;  %v5727_v38 = vmul.u32.u64.high %v1543_v5, %v1538_v19, %v5726_v22  ;;  %v5734_v40 = vshrl.u32 %v8790_v15, 5 }
 0x15f   : > { %v5736_v54 = vsub.s32 %v1347_v29, %v1350_v8  ;;  %v975_v46 = vand.u32 2147483647, %v8791_v25  ;;  %v5740_v21 = vsub.s32 32, %v8792_v30  ;;  %v5743_v28 = vsub.s32 32, %v8793_v34 }
 0x160   : > { %v5745_v63 = vadd.s32 1, %v4212_v26  ;;  %v8794_v56 = vand.u32 2139095040, %v5139_v27  ;;  %v1373_v49 = vsub.s32 4, %v1349_v42  ;;  %v1534_v59 = vsel %vm1528_vm5, %v1531_v52, %v1533_v0 }
 0x161   : > { %v1353_v37 = vsub.s32 0, %v5736_v54  ;;  %vm1552_vm7 = vc.u32 %v5718_v13, %v5726_v22  ;;  %v5756_v11 = vadd.s32 4294967169, %v771_v31  ;;  %vm1698_vm9 = vcmp.eq.s32.totalorder %v5715_v61, 2 }
 0x162   : > { %v5749_v1 = vshrl.u32 %v8794_v56, 23  ;;  %vm1289_vm10 = vcmp.lt.s32.totalorder %v5529_v48, 0  ;;  %v1553_v24 = vadd.s32 1, %v5727_v38  ;;  %vm1695_vm12 = vcmp.eq.s32.totalorder %v5715_v61, 0 }
 0x163   : > { %v1343_v23 = vadd.s32 %v5654_v16, %v5663_v2  ;;  %v4241_v29 = vmin.u32 %v1353_v37, %v5736_v54  ;;  %v5767_v43 = vand.u32 8388607, %v975_v46  ;;  %v993_v55 = vshrl.u32 %v8772_v58, %v8795_v9 }
 0x164   : > { %vm1694_vm14 = vcmp.lt.s32.totalorder %v5715_v61, 2  ;;  %v1550_v41 = vmul.u32 %v1543_v5, %v1534_v59  ;;  %v1554_v50 = vsel %vm1552_vm7, %v1553_v24, %v5727_v38  ;;  %v996_v14 = vshrl.u32 %v8771_v35, %v8795_v9 }
 0x165   : > { %v999_v16 = vshrl.u32 %v8773_v47, %v8795_v9  ;;  %vm1691_vm15 = vweird.f32 %v4969_v33  ;;  %v1355_v2 = vclz %v4241_v29  ;;  %v5780_v3 = vsel %vm1289_vm10, %v1373_v49, %v1349_v42 }
 0x166   : > { %v992_v36 = vshll.u32 %v8774_v51, %v8796_v17  ;;  %v1002_v32 = vshrl.u32 %v8764_v62, %v8795_v9  ;;  %v1555_v57 = vadd.s32 %v1554_v50, %v1550_v41  ;;  %v991_v44 = vshrl.u32 %v8774_v51, %v8795_v9 }
 0x167   : > { %v995_v19 = vshll.u32 %v8772_v58, %v8796_v17  ;;  %v998_v20 = vshll.u32 %v8771_v35, %v8796_v17  ;;  %v4242_v45 = vadd.s32 4294967294, %v1355_v2  ;;  %v983_v42 = vor.u32 8388608, %v5767_v43  ;;  %v4555_v31 = vpop.eup %4554 }
 0x168   : > { %v994_v5 = vor.u32 %v993_v55, %v992_v36  ;;  %v1001_v26 = vshll.u32 %v8773_v47, %v8796_v17  ;;  %vm5797_vm11 = vcmp.le.f32.partialorder %v1287_v60, 0.7853982  ;;  %v1556_v8 = vadd.s32 536870912, %v1555_v57  ;;  %v8799_v60 = vld [vmem:[#allocation17_spill] sm:$0xff] }
 0x169   : > { %v997_v12 = vor.u32 %v996_v14, %v995_v19  ;;  %v1000_v52 = vor.u32 %v999_v16, %v998_v20  ;;  %v1005_v0 = vshrl.u32 %v8775_v7, %v8795_v9  ;;  %v4557_v38 = vpop.eup %4556  ;;  %v1699_v15 = vxor.u32 2147483648, %v4555_v31 }
 0x16a   : > { %vm4243_vm13 = vcmp.lt.s32.totalorder %v4242_v45, 0  ;;  %v1003_v56 = vor.u32 %v1002_v32, %v1001_v26  ;;  %v1004_v37 = vshll.u32 %v8764_v62, %v8796_v17  ;;  %v1696_v49 = vxor.u32 2147483648, %v4557_v38 }
 0x16b   : > { %v1358_v59 = vsel %vm4243_vm13, 0, %v4242_v45  ;;  %v1557_v24 = vshrl.u32 %v1556_v8, 30  ;;  %vm1007_vm0 = vcmp.lt.s32.totalorder %v8799_v60, 1  ;;  %vm570_vm1 = vcmp.gt.s32.totalorder %v5745_v63, 0 }
 0x16c   : > { %v1700_v29 = vsel %vm1698_vm9, %v1699_v15, %v4557_v38  ;;  %v1359_v43 = vsub.s32 32, %v1358_v59  ;;  %v1363_v55 = vsub.s32 4294967266, %v1358_v59  ;;  %vm1010_vm2 = vcmp.lt.s32.totalorder %v8799_v60, 4 }
 0x16d   : > { %v1697_v9 = vsel %vm1695_vm12, %v4555_v31, %v1696_v49  ;;  %v1360_v41 = vshll.u32 %v5736_v54, %v1358_v59  ;;  %v1558_v50 = vshll.u32 %v1557_v24, 30  ;;  %v1006_v14 = vor.u32 %v1005_v0, %v1004_v37 }
 0x16e   : > { %v1701_v16 = vsel %vm1694_vm14, %v1697_v9, %v1700_v29  ;;  %v1361_v2 = vshrl.u32 %v1343_v23, %v1359_v43  ;;  %v1364_v17 = vadd.s32 127, %v1363_v55  ;;  %v1015_v36 = vsel %vm1007_vm0, %v994_v5, %v997_v12 }
 0x16f   : > { %v1702_v32 = vsel %vm1691_vm15, nan, %v1701_v16  ;;  %v5819_v19 = vsub.s32 %v1555_v57, %v1558_v50  ;;  %vm1009_vm3 = vcmp.lt.s32.totalorder %v8799_v60, 3  ;;  %v1016_v54 = vsel %vm1010_vm2, %v1003_v56, 920167782 }
 0x170   : > { %2275 = vmatprep.subr.mxu1 %v1702_v32  ;;  %v1362_v20 = vor.u32 %v1361_v2, %v1360_v41  ;;  %v1365_v45 = vshll.u32 %v1364_v17, 23  ;;  %vm1008_vm5 = vcmp.lt.s32.totalorder %v8799_v60, 2  ;;  %v1017_v61 = vsel %vm1009_vm3, %v1000_v52, %v1016_v54 }
 0x171   : > { %v1561_v23 = vsub.s32 0, %v5819_v19  ;;  %v1012_v33 = vsel %vm1010_vm2, %v1000_v52, 2102212464  ;;  %v1018_v57 = vsel %vm1008_vm5, %v1015_v36, %v1017_v61  ;;  %v1019_v26 = vsel %vm1007_vm0, %v997_v12, %v1000_v52 }
 0x172   : > { %v1366_v31 = vor.u32 4788187, %v1365_v45  ;;  %v1376_v8 = vsel %vm5797_vm11, 0, %v5780_v3  ;;  %v1020_v0 = vsel %vm1010_vm2, %v1006_v14, 1326507024  ;;  %v1023_v38 = vshll.u32 %v983_v42, 8 }
 0x173   : > { %v1369_v15 = vcvt.s32.f32 %v1362_v20  ;;  %v4249_v37 = vmin.u32 %v1561_v23, %v5819_v19  ;;  %v1581_v49 = vsub.s32 4, %v1557_v24  ;;  %v1021_v59 = vsel %vm1009_vm3, %v1003_v56, %v1020_v0  ;;  %v8802_v23 = vld [vmem:[#allocation14_spill] sm:$0xff] }
 0x174   : > { %v1367_v29 = vand.u32 2147483647, %v1366_v31  ;;  %v1022_v52 = vsel %vm1008_vm5, %v1019_v26, %v1021_v59  ;;  %v5844_v43 = vmul.u32.u64.low %v1023_v38, %v1018_v57  ;;  %v5845_v55 = vmul.u32.u64.high %v1023_v38, %v1018_v57, %v5844_v43 }
 0x175   : > { %v1380_v3 = vadd.s32 3, %v1376_v8  ;;  %v1563_v9 = vclz %v4249_v37  ;;  %v1011_v42 = vsel %vm1007_vm0, %v991_v44, %v994_v5  ;;  %v1013_v41 = vsel %vm1009_vm3, %v997_v12, %v1012_v33 }
 0x176   : > { %v1370_v50 = vmul.f32 %v1369_v15, %v1367_v29  ;;  %vm1497_vm6 = vcmp.lt.s32.totalorder %v4965_v6, 0  ;;  %v5853_v56 = vmul.u32.u64.low %v1023_v38, %v1022_v52  ;;  %v5854_v14 = vmul.u32.u64.high %v1023_v38, %v1022_v52, %v5853_v56 }
 0x177   : > { %v5859_v16 = vsel %vm570_vm1, %v5745_v63, 0  ;;  %v5862_v2 = vadd.s32 4294967169, %v5749_v1  ;;  %v4250_v17 = vadd.s32 4294967294, %v1563_v9  ;;  %v1582_v44 = vsel %vm1497_vm6, %v1581_v49, %v1557_v24 }
 0x178   : > { %v5867_v5 = vadd.s32 1, %v5756_v11  ;;  %v1371_v12 = vxor.u32 2147483648, %v1370_v50  ;;  %v1014_v36 = vsel %vm1008_vm5, %v1011_v42, %v1013_v41  ;;  %v1033_v32 = vadd.s32 1, %v5845_v55 }
 0x179   : > { %v5872_v54 = vand.u32 3, %v1380_v3  ;;  %vm5876_vm4 = vcmp.le.f32.partialorder %v1495_v18, 0.7853982  ;;  %v1551_v1 = vadd.s32 %v5726_v22, %v5718_v13  ;;  %vm4251_vm8 = vcmp.lt.s32.totalorder %v4250_v17, 0 }
 0x17a   : > { %v1372_v11 = vsel %vm1289_vm10, %v1371_v12, %v1370_v50  ;;  %v1566_v24 = vsel %vm4251_vm8, 0, %v4250_v17  ;;  %v1584_v60 = vsel %vm5876_vm4, 0, %v1582_v44  ;;  %vm1032_vm7 = vc.u32 %v5854_v14, %v5844_v43 }
 0x17b   : > { %v1375_v18 = vsel %vm5797_vm11, %v5529_v48, %v1372_v11  ;;  %v1567_v20 = vsub.s32 32, %v1566_v24  ;;  %v1571_v45 = vsub.s32 4294967266, %v1566_v24  ;;  %v1030_v61 = vmul.u32 %v1023_v38, %v1014_v36 }
 0x17c   : > { %4558 = vcosq.f32 %v1375_v18  ;;  %v1568_v13 = vshll.u32 %v5819_v19, %v1566_v24  ;;  %v1034_v22 = vsel %vm1032_vm7, %v1033_v32, %v5845_v55  ;;  %v1183_v33 = vand.u32 2147483647, %v8802_v23 }
 0x17d   : > { %4560 = vsinq.f32 %v1375_v18  ;;  %v1569_v57 = vshrl.u32 %v1551_v1, %v1567_v20  ;;  %v1572_v26 = vadd.s32 127, %v1571_v45  ;;  %v1035_v31 = vadd.s32 %v1034_v22, %v1030_v61 }
 0x17e   : > { %v1201_v8 = vshrl.u32 %v8772_v58, %v5743_v28  ;;  %v1204_v39 = vshrl.u32 %v8771_v35, %v5743_v28  ;;  %v1207_v0 = vshrl.u32 %v8773_v47, %v5743_v28  ;;  %v1209_v19 = vshll.u32 %v8773_v47, %v8793_v34 }
 0x17f   : > { %v1570_v38 = vor.u32 %v1569_v57, %v1568_v13  ;;  %v1573_v15 = vshll.u32 %v1572_v26, 23  ;;  %v1036_v37 = vadd.s32 536870912, %v1035_v31  ;;  %v1210_v49 = vshrl.u32 %v8764_v62, %v5743_v28 }
 0x180   : > { %v1200_v59 = vshll.u32 %v8774_v51, %v8793_v34  ;;  %v1203_v29 = vshll.u32 %v8772_v58, %v8793_v34  ;;  %v1206_v52 = vshll.u32 %v8771_v35, %v8793_v34  ;;  %v1213_v55 = vshrl.u32 %v8775_v7, %v5743_v28 }
 0x181   : > { %v1574_v3 = vor.u32 4788187, %v1573_v15  ;;  %v1037_v9 = vshrl.u32 %v1036_v37, 30  ;;  %v1190_v42 = vand.u32 8388607, %v1183_v33  ;;  %v1211_v41 = vor.u32 %v1210_v49, %v1209_v19 }
 0x182   : > { %v1202_v50 = vor.u32 %v1201_v8, %v1200_v59  ;;  %v1205_v56 = vor.u32 %v1204_v39, %v1203_v29  ;;  %v1208_v17 = vor.u32 %v1207_v0, %v1206_v52  ;;  %v1212_v44 = vshll.u32 %v8764_v62, %v8793_v34  ;;  %v8803_v8 = vld [vmem:[#allocation9_spill] sm:$0xff]  ;;  %v8804_v39 = vld [vmem:[#allocation8_spill] sm:$0xff] }
 0x183   : > { %v1575_v12 = vand.u32 2147483647, %v1574_v3  ;;  %v1577_v36 = vcvt.s32.f32 %v1570_v38  ;;  %vm977_vm9 = vcmp.lt.s32.totalorder %v8791_v25, 0  ;;  %v1038_v32 = vshll.u32 %v1037_v9, 30 }
 0x184   : > { %vm1218_vm10 = vcmp.lt.s32.totalorder %v5734_v40, 4  ;;  %vm1383_vm12 = vcmp.eq.s32.totalorder %v5872_v54, 0  ;;  %vm1386_vm14 = vcmp.eq.s32.totalorder %v5872_v54, 2  ;;  %v1588_v1 = vadd.s32 3, %v1584_v60 }
 0x185   : > { %v1214_v11 = vor.u32 %v1213_v55, %v1212_v44  ;;  %v1224_v24 = vsel %vm1218_vm10, %v1211_v41, 920167782  ;;  %vm1382_vm15 = vcmp.lt.s32.totalorder %v5872_v54, 2  ;;  %v1578_v18 = vmul.f32 %v1577_v36, %v1575_v12 }
 0x186   : > { %v5923_v34 = vsub.s32 %v1035_v31, %v1038_v32  ;;  %v1199_v20 = vshrl.u32 %v8774_v51, %v5743_v28  ;;  %vm1215_vm11 = vcmp.lt.s32.totalorder %v5734_v40, 1  ;;  %vm1379_vm13 = vweird.f32 %v5529_v48 }
 0x187   : > { %v1191_v45 = vor.u32 8388608, %v1190_v42  ;;  %vm1216_vm0 = vcmp.lt.s32.totalorder %v5734_v40, 2  ;;  %vm1217_vm1 = vcmp.lt.s32.totalorder %v5734_v40, 3  ;;  %v1223_v60 = vsel %vm1215_vm11, %v1202_v50, %v1205_v56 }
 0x188   : > { %v1579_v61 = vxor.u32 2147483648, %v1578_v18  ;;  %v1041_v13 = vsub.s32 0, %v5923_v34  ;;  %v1225_v22 = vsel %vm1217_vm1, %v1208_v17, %v1224_v24  ;;  %v1227_v57 = vsel %vm1215_vm11, %v1205_v56, %v1208_v17 }
 0x189   : > { %v1061_v26 = vsub.s32 4, %v1037_v9  ;;  %v1219_v31 = vsel %vm1215_vm11, %v1199_v20, %v1202_v50  ;;  %v1228_v28 = vsel %vm1218_vm10, %v1214_v11, 1326507024  ;;  %v407_v0 = vadd.f32 %v8804_v39, %v8803_v8  ;;  %v4559_v19 = vpop.eup %4558  ;;  %v8808_v39 = vld [vmem:[#allocation13_spill] sm:$0xff] }
 0x18a   : > { %v1580_v38 = vsel %vm1497_vm6, %v1579_v61, %v1578_v18  ;;  %v4229_v15 = vmin.u32 %v1041_v13, %v5923_v34  ;;  %v1220_v37 = vsel %vm1218_vm10, %v1208_v17, 2102212464  ;;  %v1229_v49 = vsel %vm1217_vm1, %v1211_v41, %v1228_v28  ;;  %v4561_v59 = vpop.eup %4560 }
 0x18b   : > { %v1387_v29 = vxor.u32 2147483648, %v4559_v19  ;;  %v1583_v52 = vsel %vm5876_vm4, %v4965_v6, %v1580_v38  ;;  %v1226_v55 = vsel %vm1216_vm0, %v1223_v60, %v1225_v22  ;;  %v1230_v3 = vsel %vm1216_vm0, %v1227_v57, %v1229_v49 }
 0x18c   : > { %v1384_v42 = vxor.u32 2147483648, %v4561_v59  ;;  %4562 = vcosq.f32 %v1583_v52  ;;  %v1043_v50 = vclz %v4229_v15  ;;  %v1231_v44 = vshll.u32 %v1191_v45, 8  ;;  %v8805_v45 = vld [vmem:[#allocation11_spill] sm:$0xff] }
 0x18d   : > { %v1388_v17 = vsel %vm1386_vm14, %v1387_v29, %v4561_v59  ;;  %4564 = vsinq.f32 %v1583_v52  ;;  %v1062_v41 = vsel %vm977_vm9, %v1061_v26, %v1037_v9  ;;  %v1221_v63 = vsel %vm1217_vm1, %v1205_v56, %v1220_v37 }
 0x18e   : > { %v1385_v12 = vsel %vm1383_vm12, %v4559_v19, %v1384_v42  ;;  %v4230_v36 = vadd.s32 4294967294, %v1043_v50  ;;  %v5960_v32 = vmul.u32.u64.low %v1231_v44, %v1230_v3  ;;  %v5961_v11 = vmul.u32.u64.high %v1231_v44, %v1230_v3, %v5960_v32 }
 0x18f   : > { %v1389_v24 = vsel %vm1382_vm15, %v1385_v12, %v1388_v17  ;;  %v5965_v18 = vmul.u32.u64.low %v1231_v44, %v1226_v55  ;;  %v5966_v20 = vmul.u32.u64.high %v1231_v44, %v1226_v55, %v5965_v18  ;;  %v5969_v60 = vadd.f32 %v8805_v45, %v407_v0 }
 0x190   : > { %v1390_v9 = vsel %vm1379_vm13, nan, %v1389_v24  ;;  %v1589_v56 = vand.u32 3, %v1588_v1  ;;  %vm5975_vm2 = vcmp.le.f32.partialorder %v975_v46, 0.7853982  ;;  %vm4231_vm3 = vcmp.lt.s32.totalorder %v4230_v36, 0 }
 0x191   : > { %2187 = vmatpush1.msra.mxu0 %v1390_v9  ;;  %v1046_v54 = vsel %vm4231_vm3, 0, %v4230_v36  ;;  %v1222_v13 = vsel %vm1216_vm0, %v1219_v31, %v1221_v63  ;;  %v871_v22 = vand.u32 2147483647, %v5969_v60  ;;  %v874_v57 = vand.u32 2139095040, %v5969_v60 }
 0x192   : > { %v1031_v48 = vadd.s32 %v5844_v43, %v5854_v14  ;;  %v1047_v1 = vsub.s32 32, %v1046_v54  ;;  %v1051_v26 = vsub.s32 4294967266, %v1046_v54  ;;  %v1064_v46 = vsel %vm5975_vm2, 0, %v1062_v41 }
 0x193   : > { %vm1240_vm5 = vc.u32 %v5961_v11, %v5965_v18  ;;  %v1241_v28 = vadd.s32 1, %v5966_v20  ;;  %v875_v8 = vshrl.u32 %v874_v57, 23  ;;  %v1079_v40 = vand.u32 2147483647, %v8808_v39 }
 0x194   : > { %v1048_v31 = vshll.u32 %v5923_v34, %v1046_v54  ;;  %v1049_v0 = vshrl.u32 %v1031_v48, %v1047_v1  ;;  %v1052_v19 = vadd.s32 127, %v1051_v26  ;;  %v1238_v38 = vmul.u32 %v1231_v44, %v1222_v13 }
 0x195   : > { %v1068_v15 = vadd.s32 3, %v1064_v46  ;;  %v1242_v43 = vsel %vm1240_vm5, %v1241_v28, %v5966_v20  ;;  %v4224_v14 = vadd.s32 4294967169, %v875_v8  ;;  %v878_v37 = vand.u32 8388607, %v871_v22 }
 0x196   : > { %v5995_v49 = vand.u32 31, %v5859_v16  ;;  %v1050_v59 = vor.u32 %v1049_v0, %v1048_v31  ;;  %v1053_v29 = vshll.u32 %v1052_v19, 23  ;;  %v1243_v52 = vadd.s32 %v1242_v43, %v1238_v38 }
 0x197   : > { %vm1587_vm6 = vweird.f32 %v4965_v6  ;;  %vm1590_vm4 = vcmp.lt.s32.totalorder %v1589_v56, 2  ;;  %v881_v34 = vadd.s32 1, %v4224_v14  ;;  %v6000_v55 = vand.u32 8388607, %v1079_v40 }
 0x198   : > { %vm1591_vm8 = vcmp.eq.s32.totalorder %v1589_v56, 0  ;;  %vm1594_vm7 = vcmp.eq.s32.totalorder %v1589_v56, 2  ;;  %v1054_v3 = vor.u32 4788187, %v1053_v29  ;;  %v1244_v42 = vadd.s32 536870912, %v1243_v52 }
 0x199   : > { %v4563_v50 = vpop.eup %4562  ;;  %v1057_v44 = vcvt.s32.f32 %v1050_v59  ;;  %v6002_v17 = vand.u32 3, %v1068_v15  ;;  %v879_v41 = vor.u32 8388608, %v878_v37  ;;  %vm882_vm10 = vcmp.gt.s32.totalorder %v881_v34, 0 }
 0x19a   : > { %v4565_v63 = vpop.eup %4564  ;;  %v1595_v12 = vxor.u32 2147483648, %v4563_v50  ;;  %v1055_v36 = vand.u32 2147483647, %v1054_v3  ;;  %v6004_v32 = vshrl.u32 %v1244_v42, 30  ;;  %v883_v24 = vsel %vm882_vm10, %v881_v34, 0 }
 0x19b   : > { %v1592_v20 = vxor.u32 2147483648, %v4565_v63  ;;  %v6007_v45 = vadd.s32 %v5965_v18, %v5961_v11  ;;  %v885_v9 = vand.u32 31, %v883_v24  ;;  %v1087_v54 = vor.u32 8388608, %v6000_v55 }
 0x19c   : > { %v1596_v13 = vsel %vm1594_vm7, %v1595_v12, %v4565_v63  ;;  %v1058_v57 = vmul.f32 %v1057_v44, %v1055_v36  ;;  %v1246_v48 = vshll.u32 %v6004_v32, 30  ;;  %v6014_v1 = vshrl.u32 %v8774_v51, %v5740_v21 }
 0x19d   : > { %v1593_v26 = vsel %vm1591_vm8, %v4563_v50, %v1592_v20  ;;  %v886_v46 = vsub.s32 32, %v885_v9  ;;  %v6017_v28 = vshll.u32 %v879_v41, 8  ;;  %v1096_v11 = vshll.u32 %v8774_v51, %v8792_v30 }
 0x19e   : > { %v1597_v18 = vsel %vm1590_vm4, %v1593_v26, %v1596_v13  ;;  %v1059_v8 = vxor.u32 2147483648, %v1058_v57  ;;  %v6022_v31 = vsub.s32 %v1243_v52, %v1246_v48  ;;  %v1097_v0 = vshrl.u32 %v8772_v58, %v5740_v21 }
 0x19f   : > { %v1598_v19 = vsel %vm1587_vm6, nan, %v1597_v18  ;;  %v888_v38 = vshll.u32 %v8774_v51, %v885_v9  ;;  %v889_v15 = vshrl.u32 %v8772_v58, %v886_v46  ;;  %v6032_v43 = vshll.u32 %v8772_v58, %v8792_v30 }
 0x1a0   : > { %2276 = vmatpush1.msra.mxu1 %v1598_v19  ;;  %v1060_v56 = vsel %vm977_vm9, %v1059_v8, %v1058_v57  ;;  %v1249_v14 = vsub.s32 0, %v6022_v31  ;;  %v891_v37 = vshll.u32 %v8772_v58, %v885_v9  ;;  %v892_v59 = vshrl.u32 %v8771_v35, %v886_v46 }
 0x1a1   : > { %v1063_v6 = vsel %vm5975_vm2, %v8791_v25, %v1060_v56  ;;  %vm1185_vm12 = vcmp.lt.s32.totalorder %v8802_v23, 0  ;;  %v884_v29 = vshrl.u32 %v883_v24, 5  ;;  %v894_v52 = vshll.u32 %v8771_v35, %v885_v9 }
 0x1a2   : > { %v895_v34 = vshrl.u32 %v8773_v47, %v886_v46  ;;  %4566 = vcosq.f32 %v1063_v6  ;;  %v4237_v3 = vmin.u32 %v1249_v14, %v6022_v31  ;;  %v890_v42 = vor.u32 %v889_v15, %v888_v38 }
 0x1a3   : > { %v893_v50 = vor.u32 %v892_v59, %v891_v37  ;;  %4568 = vsinq.f32 %v1063_v6  ;;  %v897_v41 = vshll.u32 %v8773_v47, %v885_v9  ;;  %v898_v63 = vshrl.u32 %v8764_v62, %v886_v46 }
 0x1a4   : > { %v896_v44 = vor.u32 %v895_v34, %v894_v52  ;;  %vm6050_vm9 = vcmp.le.f32.partialorder %v1183_v33, 0.7853982  ;;  %v1251_v12 = vclz %v4237_v3  ;;  %v1269_v36 = vsub.s32 4, %v6004_v32 }
 0x1a5   : > { %v6055_v24 = vor.u32 %v1097_v0, %v1096_v11  ;;  %v1100_v20 = vshrl.u32 %v8771_v35, %v5740_v21  ;;  %v887_v13 = vshrl.u32 %v8774_v51, %v886_v46  ;;  %v899_v57 = vor.u32 %v898_v63, %v897_v41 }
 0x1a6   : > { %v900_v48 = vshll.u32 %v8764_v62, %v885_v9  ;;  %v901_v26 = vshrl.u32 %v8775_v7, %v886_v46  ;;  %v4238_v18 = vadd.s32 4294967294, %v1251_v12  ;;  %vm903_vm14 = vcmp.lt.s32.totalorder %v884_v29, 1 }
 0x1a7   : > { %vm904_vm15 = vcmp.lt.s32.totalorder %v884_v29, 2  ;;  %vm906_vm11 = vcmp.lt.s32.totalorder %v884_v29, 4  ;;  %vm905_vm13 = vcmp.lt.s32.totalorder %v884_v29, 3  ;;  %v911_v19 = vsel %vm903_vm14, %v890_v42, %v893_v50 }
 0x1a8   : > { %v902_v33 = vor.u32 %v901_v26, %v900_v48  ;;  %v908_v8 = vsel %vm906_vm11, %v896_v44, 2102212464  ;;  %vm4239_vm0 = vcmp.lt.s32.totalorder %v4238_v18, 0  ;;  %v907_v11 = vsel %vm903_vm14, %v887_v13, %v890_v42 }
 0x1a9   : > { %v909_v0 = vsel %vm905_vm13, %v893_v50, %v908_v8  ;;  %v912_v38 = vsel %vm906_vm11, %v899_v57, 920167782  ;;  %vm1074_vm1 = vcmp.eq.s32.totalorder %v6002_v17, 2  ;;  %v1254_v15 = vsel %vm4239_vm0, 0, %v4238_v18 }
 0x1aa   : > { %v913_v9 = vsel %vm905_vm13, %v896_v44, %v912_v38  ;;  %v915_v56 = vsel %vm903_vm14, %v893_v50, %v896_v44  ;;  %v916_v46 = vsel %vm906_vm11, %v902_v33, 1326507024  ;;  %vm1071_vm2 = vcmp.eq.s32.totalorder %v6002_v17, 0 }
 0x1ab   : > { %v1255_v14 = vsub.s32 32, %v1254_v15  ;;  %v1259_v37 = vsub.s32 4294967266, %v1254_v15  ;;  %v1270_v59 = vsel %vm1185_vm12, %v1269_v36, %v6004_v32  ;;  %v914_v6 = vsel %vm904_vm15, %v911_v19, %v913_v9 }
 0x1ac   : > { %vm1070_vm3 = vcmp.lt.s32.totalorder %v6002_v17, 2  ;;  %v910_v52 = vsel %vm904_vm15, %v907_v11, %v909_v0  ;;  %v917_v34 = vsel %vm905_vm13, %v899_v57, %v916_v46  ;;  %vm1067_vm5 = vweird.f32 %v8791_v25 }
 0x1ad   : > { %v6074_v3 = vmul.u32.u64.low %v6017_v28, %v914_v6  ;;  %v6075_v42 = vmul.u32.u64.high %v6017_v28, %v914_v6, %v6074_v3  ;;  %v1256_v50 = vshll.u32 %v6022_v31, %v1254_v15  ;;  %v1257_v44 = vshrl.u32 %v6007_v45, %v1255_v14 }
 0x1ae   : > { %v1260_v32 = vadd.s32 127, %v1259_v37  ;;  %v918_v41 = vsel %vm904_vm15, %v915_v56, %v917_v34  ;;  %v1272_v63 = vsel %vm6050_vm9, 0, %v1270_v59  ;;  %v1103_v13 = vshrl.u32 %v8773_v47, %v5740_v21 }
 0x1af   : > { %v6085_v12 = vmul.u32.u64.low %v6017_v28, %v918_v41  ;;  %v6086_v36 = vmul.u32.u64.high %v6017_v28, %v918_v41, %v6085_v12  ;;  %v1258_v57 = vor.u32 %v1257_v44, %v1256_v50  ;;  %v1102_v31 = vshll.u32 %v8771_v35, %v8792_v30  ;;  %v4567_v29 = vpop.eup %4566 }
 0x1b0   : > { %v1261_v48 = vshll.u32 %v1260_v32, 23  ;;  %v1106_v45 = vshrl.u32 %v8764_v62, %v5740_v21  ;;  %v926_v26 = vmul.u32 %v6017_v28, %v910_v52  ;;  %v929_v18 = vadd.s32 1, %v6075_v42  ;;  %v4569_v19 = vpop.eup %4568 }
 0x1b1   : > { %v1101_v33 = vor.u32 %v1100_v20, %v6032_v43  ;;  %v1109_v8 = vshrl.u32 %v8775_v7, %v5740_v21  ;;  %v1075_v11 = vxor.u32 2147483648, %v4567_v29  ;;  %v1104_v38 = vor.u32 %v1103_v13, %v1102_v31 }
 0x1b2   : > { %v1262_v0 = vor.u32 4788187, %v1261_v48  ;;  %v1105_v15 = vshll.u32 %v8773_v47, %v8792_v30  ;;  %v1072_v9 = vxor.u32 2147483648, %v4569_v19  ;;  %v1265_v56 = vcvt.s32.f32 %v1258_v57 }
 0x1b3   : > { %vm928_vm6 = vc.u32 %v6086_v36, %v6074_v3  ;;  %v1108_v28 = vshll.u32 %v8764_v62, %v8792_v30  ;;  %vm778_vm4 = vcmp.gt.s32.totalorder %v5867_v5, 0  ;;  %v1076_v21 = vsel %vm1074_vm1, %v1075_v11, %v4569_v19 }
 0x1b4   : > { %v1263_v43 = vand.u32 2147483647, %v1262_v0  ;;  %v930_v20 = vsel %vm928_vm6, %v929_v18, %v6075_v42  ;;  %v1107_v46 = vor.u32 %v1106_v45, %v1105_v15  ;;  %v1073_v14 = vsel %vm1071_vm2, %v4567_v29, %v1072_v9 }
 0x1b5   : > { %v1276_v37 = vadd.s32 3, %v1272_v63  ;;  %v931_v59 = vadd.s32 %v930_v20, %v926_v26  ;;  %v1110_v6 = vor.u32 %v1109_v8, %v1108_v28  ;;  %v1077_v52 = vsel %vm1070_vm3, %v1073_v14, %v1076_v21 }
 0x1b6   : > { %v1266_v34 = vmul.f32 %v1265_v56, %v1263_v43  ;;  %vm1111_vm8 = vcmp.lt.s32.totalorder %v5731_v10, 1  ;;  %vm1112_vm7 = vcmp.lt.s32.totalorder %v5731_v10, 2  ;;  %v1078_v30 = vsel %vm1067_vm5, nan, %v1077_v52 }
 0x1b7   : > { %v932_v50 = vadd.s32 536870912, %v931_v59  ;;  %vm1114_vm10 = vcmp.lt.s32.totalorder %v5731_v10, 4  ;;  %v1119_v42 = vsel %vm1111_vm8, %v6055_v24, %v1101_v33  ;;  %2188 = vmatprep.subr.mxu0 %v1078_v30  ;;  %vm1113_vm14 = vcmp.lt.s32.totalorder %v5731_v10, 3 }
 0x1b8   : > { %v1267_v44 = vxor.u32 2147483648, %v1266_v34  ;;  %v1120_v17 = vsel %vm1114_vm10, %v1107_v46, 920167782  ;;  %v1123_v32 = vsel %vm1111_vm8, %v1101_v33, %v1104_v38  ;;  %v1116_v63 = vsel %vm1114_vm10, %v1104_v38, 2102212464 }
 0x1b9   : > { %v933_v41 = vshrl.u32 %v932_v50, 30  ;;  %v1121_v25 = vsel %vm1113_vm14, %v1104_v38, %v1120_v17  ;;  %v1124_v12 = vsel %vm1114_vm10, %v1110_v6, 1326507024  ;;  %v1127_v31 = vshll.u32 %v1087_v54, 8 }
 0x1ba   : > { %v1268_v13 = vsel %vm1185_vm12, %v1267_v44, %v1266_v34  ;;  %v1122_v57 = vsel %vm1112_vm7, %v1119_v42, %v1121_v25  ;;  %v1125_v48 = vsel %vm1113_vm14, %v1107_v46, %v1124_v12  ;;  %vm873_vm12 = vcmp.lt.s32.totalorder %v5969_v60, 0 }
 0x1bb   : > { %v1271_v45 = vsel %vm6050_vm9, %v8802_v23, %v1268_v13  ;;  %v934_v29 = vshll.u32 %v933_v41, 30  ;;  %v957_v26 = vsub.s32 4, %v933_v41  ;;  %v1126_v18 = vsel %vm1112_vm7, %v1123_v32, %v1125_v48 }
 0x1bc   : > { %4570 = vcosq.f32 %v1271_v45  ;;  %v6140_v8 = vmul.u32.u64.low %v1127_v31, %v1126_v18  ;;  %v6141_v19 = vmul.u32.u64.high %v1127_v31, %v1126_v18, %v6140_v8  ;;  %v1115_v55 = vsel %vm1111_vm8, %v6014_v1, %v6055_v24 }
 0x1bd   : > { %4572 = vsinq.f32 %v1271_v45  ;;  %v6143_v11 = vsub.s32 %v931_v59, %v934_v29  ;;  %v1117_v54 = vsel %vm1113_vm14, %v1101_v33, %v1116_v63  ;;  %v6152_v61 = vsub.s32 32, %v5995_v49 }
 0x1be   : > { %v958_v0 = vsel %vm873_vm12, %v957_v26, %v933_v41  ;;  %v6156_v38 = vmul.u32.u64.low %v1127_v31, %v1122_v57  ;;  %v6157_v15 = vmul.u32.u64.high %v1127_v31, %v1122_v57, %v6156_v38  ;;  %v6163_v9 = vsel %vm778_vm4, %v5867_v5, 0 }
 0x1bf   : > { %v6165_v56 = vand.u32 3, %v1276_v37  ;;  %v937_v1 = vsub.s32 0, %v6143_v11  ;;  %v6169_v24 = vadd.s32 1, %v5862_v2  ;;  %vm6173_vm9 = vcmp.le.f32.partialorder %v871_v22, 0.7853982 }
 0x1c0   : > { %v1118_v28 = vsel %vm1112_vm7, %v1115_v55, %v1117_v54  ;;  %v960_v5 = vsel %vm6173_vm9, 0, %v958_v0  ;;  %vm1136_vm15 = vc.u32 %v6141_v19, %v6156_v38  ;;  %v559_v2 = vand.u32 2147483647, %v5122_v53 }
 0x1c1   : > { %v4225_v21 = vmin.u32 %v937_v1, %v6143_v11  ;;  %v6186_v43 = vshrl.u32 %v5859_v16, 5  ;;  %v6189_v22 = vand.u32 31, %v6163_v9  ;;  %v1137_v20 = vadd.s32 1, %v6157_v15 }
 0x1c2   : > { %v577_v10 = vshrl.u32 %v8772_v58, %v6152_v61  ;;  %vm1282_vm11 = vcmp.eq.s32.totalorder %v6165_v56, 2  ;;  %v1134_v14 = vmul.u32 %v1127_v31, %v1118_v28  ;;  %v580_v37 = vshrl.u32 %v8771_v35, %v6152_v61 }
 0x1c3   : > { %v939_v46 = vclz %v4225_v21  ;;  %vm1279_vm13 = vcmp.eq.s32.totalorder %v6165_v56, 0  ;;  %v927_v16 = vadd.s32 %v6074_v3, %v6086_v36  ;;  %v6200_v59 = vadd.s32 3, %v960_v5 }
 0x1c4   : > { %v1138_v6 = vsel %vm1136_vm15, %v1137_v20, %v6157_v15  ;;  %v576_v52 = vshll.u32 %v8774_v51, %v5995_v49  ;;  %vm1278_vm0 = vcmp.lt.s32.totalorder %v6165_v56, 2  ;;  %v566_v50 = vand.u32 8388607, %v559_v2 }
 0x1c5   : > { %v4226_v34 = vadd.s32 4294967294, %v939_v46  ;;  %v1139_v30 = vadd.s32 %v1138_v6, %v1134_v14  ;;  %v579_v42 = vshll.u32 %v8772_v58, %v5995_v49  ;;  %vm1275_vm1 = vweird.f32 %v8802_v23 }
 0x1c6   : > { %v578_v3 = vor.u32 %v577_v10, %v576_v52  ;;  %v583_v36 = vshrl.u32 %v8773_v47, %v6152_v61  ;;  %v585_v44 = vshll.u32 %v8773_v47, %v5995_v49  ;;  %v586_v17 = vshrl.u32 %v8764_v62, %v6152_v61 }
 0x1c7   : > { %vm4227_vm2 = vcmp.lt.s32.totalorder %v4226_v34, 0  ;;  %v1140_v32 = vadd.s32 536870912, %v1139_v30  ;;  %v581_v41 = vor.u32 %v580_v37, %v579_v42  ;;  %v582_v63 = vshll.u32 %v8771_v35, %v5995_v49 }
 0x1c8   : > { %v942_v25 = vsel %vm4227_vm2, 0, %v4226_v34  ;;  %v587_v12 = vor.u32 %v586_v17, %v585_v44  ;;  %v588_v13 = vshll.u32 %v8764_v62, %v5995_v49  ;;  %v589_v57 = vshrl.u32 %v8775_v7, %v6152_v61 }
 0x1c9   : > { %v4571_v48 = vpop.eup %4570  ;;  %v943_v31 = vsub.s32 32, %v942_v25  ;;  %v947_v45 = vsub.s32 4294967266, %v942_v25  ;;  %v6223_v29 = vshrl.u32 %v1140_v32, 30  ;;  %vm591_vm3 = vcmp.lt.s32.totalorder %v6186_v43, 1 }
 0x1ca   : > { %v4573_v26 = vpop.eup %4572  ;;  %vm674_vm5 = vcmp.gt.s32.totalorder %v6169_v24, 0  ;;  %v1283_v18 = vxor.u32 2147483648, %v4571_v48  ;;  %v944_v8 = vshll.u32 %v6143_v11, %v942_v25  ;;  %v584_v55 = vor.u32 %v583_v36, %v582_v63 }
 0x1cb   : > { %vm594_vm6 = vcmp.lt.s32.totalorder %v6186_v43, 4  ;;  %v1280_v49 = vxor.u32 2147483648, %v4573_v26  ;;  %v945_v54 = vshrl.u32 %v927_v16, %v943_v31  ;;  %v948_v0 = vadd.s32 127, %v947_v45 }
 0x1cc   : > { %v1142_v15 = vshll.u32 %v6223_v29, 30  ;;  %v1284_v1 = vsel %vm1282_vm11, %v1283_v18, %v4573_v26  ;;  %v590_v28 = vor.u32 %v589_v57, %v588_v13  ;;  %vm593_vm4 = vcmp.lt.s32.totalorder %v6186_v43, 3 }
 0x1cd   : > { %v600_v21 = vsel %vm594_vm6, %v587_v12, 920167782  ;;  %v1281_v11 = vsel %vm1279_vm13, %v4571_v48, %v1280_v49  ;;  %v946_v5 = vor.u32 %v945_v54, %v944_v8  ;;  %v949_v20 = vshll.u32 %v948_v0, 23 }
 0x1ce   : > { %v1143_v10 = vsub.s32 %v1139_v30, %v1142_v15  ;;  %v1285_v46 = vsel %vm1278_vm0, %v1281_v11, %v1284_v1  ;;  %v567_v14 = vor.u32 8388608, %v566_v50  ;;  %v599_v37 = vsel %vm591_vm3, %v578_v3, %v581_v41 }
 0x1cf   : > { %v601_v16 = vsel %vm593_vm4, %v584_v55, %v600_v21  ;;  %v1286_v6 = vsel %vm1275_vm1, nan, %v1285_v46  ;;  %v950_v52 = vor.u32 4788187, %v949_v20  ;;  %v575_v42 = vshrl.u32 %v8774_v51, %v6152_v61 }
 0x1d0   : > { %v1145_v34 = vsub.s32 0, %v1143_v10  ;;  %2277 = vmatprep.subr.mxu1 %v1286_v6  ;;  %v953_v30 = vcvt.s32.f32 %v946_v5  ;;  %vm592_vm8 = vcmp.lt.s32.totalorder %v6186_v43, 2  ;;  %v596_v56 = vsel %vm594_vm6, %v584_v55, 2102212464 }
 0x1d1   : > { %v603_v50 = vsel %vm591_vm3, %v581_v41, %v584_v55  ;;  %v951_v36 = vand.u32 2147483647, %v950_v52  ;;  %v602_v23 = vsel %vm592_vm8, %v599_v37, %v601_v16  ;;  %v604_v17 = vsel %vm594_vm6, %v590_v28, 1326507024 }
 0x1d2   : > { %v4233_v44 = vmin.u32 %v1145_v34, %v1143_v10  ;;  %v1165_v61 = vsub.s32 4, %v6223_v29  ;;  %v595_v32 = vsel %vm591_vm3, %v575_v42, %v578_v3  ;;  %v605_v63 = vsel %vm593_vm4, %v587_v12, %v604_v17 }
 0x1d3   : > { %v607_v25 = vshll.u32 %v567_v14, 8  ;;  %v954_v13 = vmul.f32 %v953_v30, %v951_v36  ;;  %v597_v48 = vsel %vm593_vm4, %v581_v41, %v596_v56  ;;  %v606_v31 = vsel %vm592_vm8, %v603_v50, %v605_v63 }
 0x1d4   : > { %v1147_v57 = vclz %v4233_v44  ;;  %v6275_v3 = vsel %vm674_vm5, %v6169_v24, 0  ;;  %v6278_v49 = vshrl.u32 %v6163_v9, 5  ;;  %v782_v41 = vsub.s32 32, %v6189_v22 }
 0x1d5   : > { %v6265_v45 = vmul.u32.u64.low %v607_v25, %v606_v31  ;;  %v6266_v26 = vmul.u32.u64.high %v607_v25, %v606_v31, %v6265_v45  ;;  %v6268_v18 = vmul.u32.u64.low %v607_v25, %v602_v23  ;;  %v6269_v8 = vmul.u32.u64.high %v607_v25, %v602_v23, %v6268_v18 }
 0x1d6   : > { %v955_v12 = vxor.u32 2147483648, %v954_v13  ;;  %v4234_v55 = vadd.s32 4294967294, %v1147_v57  ;;  %vm6283_vm7 = vcmp.le.f32.partialorder %v1079_v40, 0.7853982  ;;  %vm1081_vm10 = vcmp.lt.s32.totalorder %v8808_v39, 0 }
 0x1d7   : > { %v1135_v24 = vadd.s32 %v6156_v38, %v6141_v19  ;;  %v598_v9 = vsel %vm592_vm8, %v595_v32, %v597_v48  ;;  %v6298_v40 = vand.u32 3, %v6200_v59  ;;  %v1166_v28 = vsel %vm1081_vm10, %v1165_v61, %v6223_v29 }
 0x1d8   : > { %v956_v0 = vsel %vm873_vm12, %v955_v12, %v954_v13  ;;  %vm4235_vm14 = vcmp.lt.s32.totalorder %v4234_v55, 0  ;;  %vm616_vm12 = vc.u32 %v6266_v26, %v6268_v18  ;;  %v614_v19 = vmul.u32 %v607_v25, %v598_v9 }
 0x1d9   : > { %v959_v15 = vsel %vm6173_vm9, %v5969_v60, %v956_v0  ;;  %v1150_v1 = vsel %vm4235_vm14, 0, %v4234_v55  ;;  %v617_v38 = vadd.s32 1, %v6269_v8  ;;  %v767_v33 = vand.u32 2147483647, %v5143_v4 }
 0x1da   : > { %4574 = vcosq.f32 %v959_v15  ;;  %v1151_v21 = vsub.s32 32, %v1150_v1  ;;  %v1155_v11 = vsub.s32 4294967266, %v1150_v1  ;;  %v1152_v43 = vshll.u32 %v1143_v10, %v1150_v1 }
 0x1db   : > { %4576 = vsinq.f32 %v959_v15  ;;  %v785_v20 = vshrl.u32 %v8772_v58, %v782_v41  ;;  %v1168_v29 = vsel %vm6283_vm7, 0, %v1166_v28  ;;  %v618_v46 = vsel %vm616_vm12, %v617_v38, %v6269_v8 }
 0x1dc   : > { %v1153_v59 = vshrl.u32 %v1135_v24, %v1151_v21  ;;  %v1156_v5 = vadd.s32 127, %v1155_v11  ;;  %v784_v14 = vshll.u32 %v8774_v51, %v6189_v22  ;;  %v788_v37 = vshrl.u32 %v8771_v35, %v782_v41 }
 0x1dd   : > { %v619_v52 = vadd.s32 %v618_v46, %v614_v19  ;;  %v791_v34 = vshrl.u32 %v8773_v47, %v782_v41  ;;  %v774_v10 = vand.u32 8388607, %v767_v33  ;;  %v787_v42 = vshll.u32 %v8772_v58, %v6189_v22 }
 0x1de   : > { %v1154_v16 = vor.u32 %v1153_v59, %v1152_v43  ;;  %v1157_v6 = vshll.u32 %v1156_v5, 23  ;;  %v793_v30 = vshll.u32 %v8773_v47, %v6189_v22  ;;  %v794_v56 = vshrl.u32 %v8764_v62, %v782_v41 }
 0x1df   : > { %v620_v36 = vadd.s32 536870912, %v619_v52  ;;  %v786_v44 = vor.u32 %v785_v20, %v784_v14  ;;  %v790_v23 = vshll.u32 %v8771_v35, %v6189_v22  ;;  %vm970_vm9 = vcmp.eq.s32.totalorder %v6298_v40, 2 }
 0x1e0   : > { %v1158_v50 = vor.u32 4788187, %v1157_v6  ;;  %v789_v17 = vor.u32 %v788_v37, %v787_v42  ;;  %v795_v61 = vor.u32 %v794_v56, %v793_v30  ;;  %v796_v32 = vshll.u32 %v8764_v62, %v6189_v22 }
 0x1e1   : > { %v797_v63 = vshrl.u32 %v8775_v7, %v782_v41  ;;  %vm967_vm15 = vcmp.eq.s32.totalorder %v6298_v40, 0  ;;  %v1161_v13 = vcvt.s32.f32 %v1154_v16  ;;  %v621_v57 = vshrl.u32 %v620_v36, 30 }
 0x1e2   : > { %v1159_v25 = vand.u32 2147483647, %v1158_v50  ;;  %v792_v48 = vor.u32 %v791_v34, %v790_v23  ;;  %vm966_vm11 = vcmp.lt.s32.totalorder %v6298_v40, 2  ;;  %v1172_v31 = vadd.s32 3, %v1168_v29 }
 0x1e3   : > { %vm561_vm13 = vcmp.lt.s32.totalorder %v5122_v53, 0  ;;  %v775_v45 = vor.u32 8388608, %v774_v10  ;;  %v783_v8 = vshrl.u32 %v8774_v51, %v782_v41  ;;  %v798_v12 = vor.u32 %v797_v63, %v796_v32 }
 0x1e4   : > { %vm963_vm0 = vweird.f32 %v5969_v60  ;;  %v1162_v22 = vmul.f32 %v1161_v13, %v1159_v25  ;;  %v622_v55 = vshll.u32 %v621_v57, 30  ;;  %vm799_vm1 = vcmp.lt.s32.totalorder %v6278_v49, 1  ;;  %v8817_v25 = vld [vmem:[#allocation10_spill] sm:$0xff]  ;;  %v8818_v13 = vld [vmem:[#allocation15_spill] sm:$0xff] }
 0x1e5   : > { %vm802_vm2 = vcmp.lt.s32.totalorder %v6278_v49, 4  ;;  %vm800_vm3 = vcmp.lt.s32.totalorder %v6278_v49, 2  ;;  %vm801_vm5 = vcmp.lt.s32.totalorder %v6278_v49, 3  ;;  %v803_v1 = vsel %vm799_vm1, %v783_v8, %v786_v44  ;;  %v8819_v8 = vld [vmem:[#allocation20_spill] sm:$0xff] }
 0x1e6   : > { %v808_v0 = vsel %vm802_vm2, %v795_v61, 920167782  ;;  %v812_v24 = vsel %vm802_vm2, %v798_v12, 1326507024  ;;  %v1163_v9 = vxor.u32 2147483648, %v1162_v22  ;;  %v6337_v15 = vsub.s32 %v619_v52, %v622_v55 }
 0x1e7   : > { %v811_v41 = vsel %vm799_vm1, %v789_v17, %v792_v48  ;;  %v4575_v28 = vpop.eup %4574  ;;  %v804_v21 = vsel %vm802_vm2, %v792_v48, 2102212464  ;;  %v807_v11 = vsel %vm799_vm1, %v786_v44, %v789_v17  ;;  %v809_v19 = vsel %vm801_vm5, %v792_v48, %v808_v0 }
 0x1e8   : > { %v813_v38 = vsel %vm801_vm5, %v795_v61, %v812_v24  ;;  %v4577_v43 = vpop.eup %4576  ;;  %v971_v59 = vxor.u32 2147483648, %v4575_v28  ;;  %v1164_v5 = vsel %vm1081_vm10, %v1163_v9, %v1162_v22  ;;  %v625_v20 = vsub.s32 0, %v6337_v15 }
 0x1e9   : > { %v645_v29 = vsub.s32 4, %v621_v57  ;;  %v968_v46 = vxor.u32 2147483648, %v4577_v43  ;;  %v1167_v14 = vsel %vm6283_vm7, %v8808_v39, %v1164_v5  ;;  %v814_v37 = vsel %vm800_vm3, %v811_v41, %v813_v38 }
 0x1ea   : > { %v815_v16 = vshll.u32 %v775_v45, 8  ;;  %v972_v6 = vsel %vm970_vm9, %v971_v59, %v4577_v43  ;;  %4578 = vcosq.f32 %v1167_v14  ;;  %v4213_v52 = vmin.u32 %v625_v20, %v6337_v15 }
 0x1eb   : > { %v810_v34 = vsel %vm800_vm3, %v807_v11, %v809_v19  ;;  %v969_v10 = vsel %vm967_vm15, %v4575_v28, %v968_v46  ;;  %4580 = vsinq.f32 %v1167_v14  ;;  %v646_v50 = vsel %vm561_vm13, %v645_v29, %v621_v57 }
 0x1ec   : > { %v6358_v42 = vmul.u32.u64.low %v815_v16, %v814_v37  ;;  %v6359_v54 = vmul.u32.u64.high %v815_v16, %v814_v37, %v6358_v42  ;;  %v973_v30 = vsel %vm966_vm11, %v969_v10, %v972_v6  ;;  %v627_v56 = vclz %v4213_v52 }
 0x1ed   : > { %v805_v36 = vsel %vm801_vm5, %v789_v17, %v804_v21  ;;  %v6368_v44 = vand.u32 31, %v6275_v3  ;;  %v974_v23 = vsel %vm963_vm0, nan, %v973_v30  ;;  %vm6377_vm6 = vcmp.le.f32.partialorder %v559_v2, 0.7853982 }
 0x1ee   : > { %v6372_v61 = vmul.u32.u64.low %v815_v16, %v810_v34  ;;  %v6373_v32 = vmul.u32.u64.high %v815_v16, %v810_v34, %v6372_v61  ;;  %2189 = vmatpush1.msra.mxu0 %v974_v23  ;;  %v4214_v63 = vadd.s32 4294967294, %v627_v56  ;;  %v403_v17 = vadd.f32 %v8818_v13, %v8817_v25 }
 0x1ef   : > { %v1173_v57 = vand.u32 3, %v1172_v31  ;;  %v648_v48 = vsel %vm6377_vm6, 0, %v646_v50  ;;  %v806_v60 = vsel %vm800_vm3, %v803_v1, %v805_v36  ;;  %v4732_v45 = vmov 0.0  }
 0x1f0   : > { %2224 = vmatprep.mubr.f32.mxu0 %v4732_v45  ;;  %2313 = vmatprep.mubr.f32.mxu1 %v4732_v45  ;;  %v6390_v2 = vshrl.u32 %v6275_v3, 5  ;;  %vm4215_vm4 = vcmp.lt.s32.totalorder %v4214_v63, 0  ;;  %vm824_vm8 = vc.u32 %v6359_v54, %v6372_v61  ;;  %v6394_v12 = vadd.f32 %v8819_v8, %v403_v17 }
 0x1f1   : > { %v6397_v31 = vsub.s32 32, %v6368_v44  ;;  %v615_v49 = vadd.s32 %v6268_v18, %v6266_v26  ;;  %v630_v22 = vsel %vm4215_vm4, 0, %v4214_v63  ;;  %v825_v55 = vadd.s32 1, %v6373_v32 }
 0x1f2   : > { %v631_v0 = vsub.s32 32, %v630_v22  ;;  %v635_v24 = vsub.s32 4294967266, %v630_v22  ;;  %v652_v9 = vadd.s32 3, %v648_v48  ;;  %v822_v3 = vmul.u32 %v815_v16, %v806_v60 }
 0x1f3   : > { %vm1174_vm7 = vcmp.lt.s32.totalorder %v1173_v57, 2  ;;  %v826_v1 = vsel %vm824_vm8, %v825_v55, %v6373_v32  ;;  %v455_v41 = vand.u32 2147483647, %v6394_v12  ;;  %v458_v28 = vand.u32 2139095040, %v6394_v12 }
 0x1f4   : > { %vm1171_vm10 = vweird.f32 %v8808_v39  ;;  %v632_v21 = vshll.u32 %v6337_v15, %v630_v22  ;;  %v633_v11 = vshrl.u32 %v615_v49, %v631_v0  ;;  %v636_v26 = vadd.s32 127, %v635_v24 }
 0x1f5   : > { %v827_v18 = vadd.s32 %v826_v1, %v822_v3  ;;  %vm1175_vm14 = vcmp.eq.s32.totalorder %v1173_v57, 0  ;;  %vm1178_vm12 = vcmp.eq.s32.totalorder %v1173_v57, 2  ;;  %v459_v19 = vshrl.u32 %v458_v28, 23 }
 0x1f6   : > { %v663_v38 = vand.u32 2147483647, %v5139_v27  ;;  %v634_v43 = vor.u32 %v633_v11, %v632_v21  ;;  %v637_v59 = vshll.u32 %v636_v26, 23  ;;  %v6408_v5 = vand.u32 3, %v652_v9 }
 0x1f7   : > { %v828_v20 = vadd.s32 536870912, %v827_v18  ;;  %v4579_v29 = vpop.eup %4578  ;;  %vm769_vm9 = vcmp.lt.s32.totalorder %v5143_v4, 0  ;;  %v6412_v46 = vadd.s32 %v6372_v61, %v6359_v54  ;;  %v4208_v15 = vadd.s32 4294967169, %v459_v19 }
 0x1f8   : > { %v462_v14 = vand.u32 8388607, %v455_v41  ;;  %v6418_v37 = vshrl.u32 %v8774_v51, %v6397_v31  ;;  %v4581_v16 = vpop.eup %4580  ;;  %v1179_v6 = vxor.u32 2147483648, %v4579_v29  ;;  %v638_v52 = vor.u32 4788187, %v637_v59 }
 0x1f9   : > { %v829_v34 = vshrl.u32 %v828_v20, 30  ;;  %v680_v10 = vshll.u32 %v8774_v51, %v6368_v44  ;;  %v1176_v42 = vxor.u32 2147483648, %v4581_v16  ;;  %v465_v30 = vadd.s32 1, %v4208_v15 }
 0x1fa   : > { %v6424_v54 = vand.u32 8388607, %v663_v38  ;;  %v681_v56 = vshrl.u32 %v8772_v58, %v6397_v31  ;;  %v1180_v50 = vsel %vm1178_vm12, %v1179_v6, %v4581_v16  ;;  %v639_v36 = vand.u32 2147483647, %v638_v52 }
 0x1fb   : > { %v641_v23 = vcvt.s32.f32 %v634_v43  ;;  %v830_v61 = vshll.u32 %v829_v34, 30  ;;  %v1177_v32 = vsel %vm1175_vm14, %v4579_v29, %v1176_v42  ;;  %v463_v63 = vor.u32 8388608, %v462_v14 }
 0x1fc   : > { %vm466_vm15 = vcmp.gt.s32.totalorder %v465_v30, 0  ;;  %v684_v25 = vshrl.u32 %v8771_v35, %v6397_v31  ;;  %v1181_v13 = vsel %vm1174_vm7, %v1177_v32, %v1180_v50  ;;  %v853_v60 = vsub.s32 4, %v829_v34 }
 0x1fd   : > { %v642_v17 = vmul.f32 %v641_v23, %v639_v36  ;;  %v6433_v48 = vsub.s32 %v827_v18, %v830_v61  ;;  %v1182_v8 = vsel %vm1171_vm10, nan, %v1181_v13  ;;  %v467_v49 = vsel %vm466_vm15, %v465_v30, 0 }
 0x1fe   : > { %v671_v22 = vor.u32 8388608, %v6424_v54  ;;  %v687_v55 = vshrl.u32 %v8773_v47, %v6397_v31  ;;  %2278 = vmatpush1.msra.mxu1 %v1182_v8  ;;  %v6441_v9 = vshrl.u32 %v467_v49, 5  ;;  %v683_v57 = vshll.u32 %v8772_v58, %v6368_v44 }
 0x1ff   : > { %v643_v0 = vxor.u32 2147483648, %v642_v17  ;;  %v833_v24 = vsub.s32 0, %v6433_v48  ;;  %v469_v3 = vand.u32 31, %v467_v49  ;;  %v6445_v1 = vshll.u32 %v463_v63, 8 }
 0x200   : > { %v6447_v39 = vor.u32 %v681_v56, %v680_v10  ;;  %v686_v28 = vshll.u32 %v8771_v35, %v6368_v44  ;;  %v6456_v26 = vsel %vm769_vm9, %v853_v60, %v829_v34  ;;  %v6458_v18 = vor.u32 %v684_v25, %v683_v57 }
 0x201   : > { %v644_v21 = vsel %vm561_vm13, %v643_v0, %v642_v17  ;;  %v4221_v11 = vmin.u32 %v833_v24, %v6433_v48  ;;  %v470_v43 = vsub.s32 32, %v469_v3  ;;  %v689_v20 = vshll.u32 %v8773_v47, %v6368_v44 }
 0x202   : > { %v647_v19 = vsel %vm6377_vm6, %v5122_v53, %v644_v21  ;;  %v6463_v59 = vor.u32 %v687_v55, %v686_v28  ;;  %vm487_vm11 = vcmp.lt.s32.totalorder %v6441_v9, 1  ;;  %v690_v15 = vshrl.u32 %v8764_v62, %v6397_v31 }
 0x203   : > { %4582 = vcosq.f32 %v647_v19  ;;  %v835_v29 = vclz %v4221_v11  ;;  %v472_v14 = vshll.u32 %v8774_v51, %v469_v3  ;;  %v473_v16 = vshrl.u32 %v8772_v58, %v470_v43 }
 0x204   : > { %4584 = vsinq.f32 %v647_v19  ;;  %v475_v40 = vshll.u32 %v8772_v58, %v469_v3  ;;  %v476_v52 = vshrl.u32 %v8771_v35, %v470_v43  ;;  %v478_v34 = vshll.u32 %v8771_v35, %v469_v3 }
 0x205   : > { %v4222_v6 = vadd.s32 4294967294, %v835_v29  ;;  %v479_v10 = vshrl.u32 %v8773_v47, %v470_v43  ;;  %v474_v42 = vor.u32 %v473_v16, %v472_v14  ;;  %v481_v30 = vshll.u32 %v8773_v47, %v469_v3 }
 0x206   : > { %v482_v56 = vshrl.u32 %v8764_v62, %v470_v43  ;;  %v484_v50 = vshll.u32 %v8764_v62, %v469_v3  ;;  %v477_v36 = vor.u32 %v476_v52, %v475_v40  ;;  %v485_v61 = vshrl.u32 %v8775_v7, %v470_v43 }
 0x207   : > { %vm4223_vm13 = vcmp.lt.s32.totalorder %v4222_v6, 0  ;;  %v480_v23 = vor.u32 %v479_v10, %v478_v34  ;;  %v471_v63 = vshrl.u32 %v8774_v51, %v470_v43  ;;  %vm488_vm0 = vcmp.lt.s32.totalorder %v6441_v9, 2 }
 0x208   : > { %v838_v32 = vsel %vm4223_vm13, 0, %v4222_v6  ;;  %v483_v25 = vor.u32 %v482_v56, %v481_v30  ;;  %v486_v60 = vor.u32 %v485_v61, %v484_v50  ;;  %vm489_vm1 = vcmp.lt.s32.totalorder %v6441_v9, 3 }
 0x209   : > { %v839_v13 = vsub.s32 32, %v838_v32  ;;  %v843_v17 = vsub.s32 4294967266, %v838_v32  ;;  %vm658_vm2 = vcmp.eq.s32.totalorder %v6408_v5, 2  ;;  %v840_v8 = vshll.u32 %v6433_v48, %v838_v32 }
 0x20a   : > { %vm490_vm3 = vcmp.lt.s32.totalorder %v6441_v9, 4  ;;  %v491_v49 = vsel %vm487_vm11, %v471_v63, %v474_v42  ;;  %v495_v55 = vsel %vm487_vm11, %v474_v42, %v477_v36  ;;  %vm655_vm5 = vcmp.eq.s32.totalorder %v6408_v5, 0 }
 0x20b   : > { %v841_v0 = vshrl.u32 %v6412_v46, %v839_v13  ;;  %v844_v24 = vadd.s32 127, %v843_v17  ;;  %v492_v57 = vsel %vm490_vm3, %v480_v23, 2102212464  ;;  %v496_v3 = vsel %vm490_vm3, %v483_v25, 920167782 }
 0x20c   : > { %vm654_vm6 = vcmp.lt.s32.totalorder %v6408_v5, 2  ;;  %v493_v48 = vsel %vm489_vm1, %v477_v36, %v492_v57  ;;  %v497_v28 = vsel %vm489_vm1, %v480_v23, %v496_v3  ;;  %v499_v21 = vsel %vm487_vm11, %v477_v36, %v480_v23 }
 0x20d   : > { %v500_v11 = vsel %vm490_vm3, %v486_v60, 1326507024  ;;  %vm651_vm4 = vweird.f32 %v5122_v53  ;;  %v842_v19 = vor.u32 %v841_v0, %v840_v8  ;;  %v845_v43 = vshll.u32 %v844_v24, 23 }
 0x20e   : > { %v494_v46 = vsel %vm488_vm0, %v491_v49, %v493_v48  ;;  %v498_v29 = vsel %vm488_vm0, %v495_v55, %v497_v28  ;;  %v501_v14 = vsel %vm489_vm1, %v483_v25, %v500_v11  ;;  %v692_v6 = vshll.u32 %v8764_v62, %v6368_v44 }
 0x20f   : > { %v6507_v16 = vmul.u32.u64.low %v6445_v1, %v498_v29  ;;  %v6508_v40 = vmul.u32.u64.high %v6445_v1, %v498_v29, %v6507_v16  ;;  %vm6515_vm8 = vcmp.le.f32.partialorder %v767_v33, 0.7853982  ;;  %v846_v34 = vor.u32 4788187, %v845_v43 }
 0x210   : > { %v502_v10 = vsel %vm488_vm0, %v499_v21, %v501_v14  ;;  %v691_v42 = vor.u32 %v690_v15, %v689_v20  ;;  %v693_v30 = vshrl.u32 %v8775_v7, %v6397_v31  ;;  %v4583_v56 = vpop.eup %4582  ;;  %v849_v50 = vcvt.s32.f32 %v842_v19 }
 0x211   : > { %v6524_v36 = vmul.u32.u64.low %v6445_v1, %v502_v10  ;;  %v6525_v23 = vmul.u32.u64.high %v6445_v1, %v502_v10, %v6524_v36  ;;  %v510_v44 = vmul.u32 %v6445_v1, %v494_v46  ;;  %v4585_v33 = vpop.eup %4584  ;;  %v659_v61 = vxor.u32 2147483648, %v4583_v56 }
 0x212   : > { %v847_v32 = vand.u32 2147483647, %v846_v34  ;;  %vm695_vm7 = vcmp.lt.s32.totalorder %v6390_v2, 1  ;;  %vm696_vm10 = vcmp.lt.s32.totalorder %v6390_v2, 2  ;;  %v656_v9 = vxor.u32 2147483648, %v4585_v33 }
 0x213   : > { %v513_v20 = vadd.s32 1, %v6508_v40  ;;  %v694_v15 = vor.u32 %v693_v30, %v692_v6  ;;  %vm698_vm14 = vcmp.lt.s32.totalorder %v6390_v2, 4  ;;  %v660_v31 = vsel %vm658_vm2, %v659_v61, %v4585_v33 }
 0x214   : > { %v850_v63 = vmul.f32 %v849_v50, %v847_v32  ;;  %vm697_vm12 = vcmp.lt.s32.totalorder %v6390_v2, 3  ;;  %v700_v1 = vsel %vm698_vm14, %v6463_v59, 2102212464  ;;  %v657_v25 = vsel %vm655_vm5, %v4583_v56, %v656_v9 }
 0x215   : > { %vm512_vm15 = vc.u32 %v6525_v23, %v6507_v16  ;;  %v699_v13 = vsel %vm695_vm7, %v6418_v37, %v6447_v39  ;;  %v703_v17 = vsel %vm695_vm7, %v6447_v39, %v6458_v18  ;;  %v661_v60 = vsel %vm654_vm6, %v657_v25, %v660_v31 }
 0x216   : > { %v851_v8 = vxor.u32 2147483648, %v850_v63  ;;  %v514_v49 = vsel %vm512_vm15, %v513_v20, %v6508_v40  ;;  %v701_v55 = vsel %vm697_vm12, %v6458_v18, %v700_v1  ;;  %v662_v0 = vsel %vm651_vm4, nan, %v661_v60 }
 0x217   : > { %v515_v24 = vadd.s32 %v514_v49, %v510_v44  ;;  %v704_v37 = vsel %vm698_vm14, %v691_v42, 920167782  ;;  %v707_v5 = vsel %vm695_vm7, %v6458_v18, %v6463_v59  ;;  %2190 = vmatprep.subr.mxu0 %v662_v0  ;;  %v708_v53 = vsel %vm698_vm14, %v694_v15, 1326507024 }
 0x218   : > { %v852_v39 = vsel %vm769_vm9, %v851_v8, %v850_v63  ;;  %v705_v57 = vsel %vm697_vm12, %v6463_v59, %v704_v37  ;;  %v711_v3 = vshll.u32 %v671_v22, 8  ;;  %v709_v21 = vsel %vm697_vm12, %v691_v42, %v708_v53 }
 0x219   : > { %v855_v48 = vsel %vm6515_vm8, %v5143_v4, %v852_v39  ;;  %v516_v28 = vadd.s32 536870912, %v515_v24  ;;  %v706_v18 = vsel %vm696_vm10, %v703_v17, %v705_v57  ;;  %v710_v59 = vsel %vm696_vm10, %v707_v5, %v709_v21 }
 0x21a   : > { %4586 = vcosq.f32 %v855_v48  ;;  %v6582_v11 = vmul.u32.u64.low %v711_v3, %v706_v18  ;;  %v6583_v19 = vmul.u32.u64.high %v711_v3, %v706_v18, %v6582_v11  ;;  %v702_v46 = vsel %vm696_vm10, %v699_v13, %v701_v55 }
 0x21b   : > { %4588 = vsinq.f32 %v855_v48  ;;  %v6585_v54 = vshrl.u32 %v516_v28, 30  ;;  %v6587_v22 = vmul.u32.u64.low %v711_v3, %v710_v59  ;;  %v6588_v43 = vmul.u32.u64.high %v711_v3, %v710_v59, %v6587_v22 }
 0x21c   : > { %v856_v14 = vsel %vm6515_vm8, 0, %v6456_v26  ;;  %v721_v40 = vadd.s32 1, %v6583_v19  ;;  %v718_v34 = vmul.u32 %v711_v3, %v702_v46  ;;  %v511_v25 = vadd.s32 %v6507_v16, %v6525_v23 }
 0x21d   : > { %v518_v29 = vshll.u32 %v6585_v54, 30  ;;  %vm720_vm9 = vc.u32 %v6588_v43, %v6582_v11  ;;  %v860_v42 = vadd.s32 3, %v856_v14  ;;  %vm859_vm2 = vweird.f32 %v5143_v4 }
 0x21e   : > { %v722_v10 = vsel %vm720_vm9, %v721_v40, %v6583_v19  ;;  %v719_v4 = vadd.s32 %v6582_v11, %v6588_v43  ;;  %vm457_vm5 = vcmp.lt.s32.totalorder %v6394_v12, 0  ;;  %v541_v19 = vsub.s32 4, %v6585_v54 }
 0x21f   : > { %v519_v6 = vsub.s32 %v515_v24, %v518_v29  ;;  %v723_v56 = vadd.s32 %v722_v10, %v718_v34  ;;  %v861_v36 = vand.u32 3, %v860_v42  ;;  %vm456_vm6 = vcmp.le.f32.partialorder %v455_v41, 0.7853982 }
 0x220   : > { %v542_v11 = vsel %vm457_vm5, %v541_v19, %v6585_v54  ;;  %vm665_vm4 = vcmp.lt.s32.totalorder %v5139_v27, 0  ;;  %vm6616_vm8 = vcmp.le.f32.partialorder %v663_v38, 0.7853982  ;;  %vm547_vm12 = vweird.f32 %v6394_v12 }
 0x221   : > { %v521_v30 = vsub.s32 0, %v519_v6  ;;  %v724_v2 = vadd.s32 536870912, %v723_v56  ;;  %vm862_vm11 = vcmp.lt.s32.totalorder %v861_v36, 2  ;;  %vm866_vm13 = vcmp.eq.s32.totalorder %v861_v36, 2 }
 0x222   : > { %vm863_vm1 = vcmp.eq.s32.totalorder %v861_v36, 0  ;;  %vm2147_vm15 = vcmask 261120  }
 0x223   : > { %v4209_v50 = vmin.u32 %v521_v30, %v519_v6  ;;  %v6599_v33 = vshrl.u32 %v724_v2, 30  ;;  %v544_v30 = vsel %vm456_vm6, 0, %v542_v11 }
 0x225   : > { %v523_v44 = vclz %v4209_v50  ;;  %v726_v9 = vshll.u32 %v6599_v33, 30  ;;  %v548_v50 = vadd.s32 3, %v544_v30  ;;  %v749_v41 = vsub.s32 4, %v6599_v33 }
 0x227   : > { %v4587_v61 = vpop.eup %4586  ;;  %v4210_v52 = vadd.s32 4294967294, %v523_v44  ;;  %v727_v63 = vsub.s32 %v723_v56, %v726_v9 }
 0x228   : > { %v4589_v26 = vpop.eup %4588  ;;  %v867_v32 = vxor.u32 2147483648, %v4587_v61 }
 0x229   : > { %v864_v20 = vxor.u32 2147483648, %v4589_v26  ;;  %vm4211_vm0 = vcmp.lt.s32.totalorder %v4210_v52, 0  ;;  %v729_v8 = vsub.s32 0, %v727_v63 }
 0x22a   : > { %v868_v15 = vsel %vm866_vm13, %v867_v32, %v4589_v26  ;;  %v526_v31 = vsel %vm4211_vm0, 0, %v4210_v52  ;;  %v750_v52 = vsel %vm665_vm4, %v749_v41, %v6599_v33  ;;  %v2119_v33 = vld [vmem:[%s8660_s3] sm:$0xff]  ;;  %vm755_vm0 = vweird.f32 %v5139_v27 }
 0x22b   : > { %v865_v1 = vsel %vm863_vm1, %v4587_v61, %v864_v20  ;;  %v527_v13 = vsub.s32 32, %v526_v31  ;;  %v531_v17 = vsub.s32 4294967266, %v526_v31  ;;  %v528_v55 = vshll.u32 %v519_v6, %v526_v31 }
 0x22c   : > { %v869_v60 = vsel %vm862_vm11, %v865_v1, %v868_v15  ;;  %v4217_v37 = vmin.u32 %v729_v8, %v727_v63  ;;  %v549_v61 = vand.u32 3, %v548_v50  ;;  %v752_v38 = vsel %vm6616_vm8, 0, %v750_v52 }
 0x22d   : > { %v870_v49 = vsel %vm859_vm2, nan, %v869_v60  ;;  %v529_v0 = vshrl.u32 %v511_v25, %v527_v13  ;;  %v532_v24 = vadd.s32 127, %v531_v17  ;;  %v756_v1 = vadd.s32 3, %v752_v38  ;;  %v2120_v17 = vld [vmem:[%s8660_s3 + $0x8] sm:$0xff] }
 0x22e   : > { %2279 = vmatprep.subr.mxu1 %v870_v49  ;;  %v731_v57 = vclz %v4217_v37  ;;  %vm554_vm7 = vcmp.eq.s32.totalorder %v549_v61, 2  ;;  %vm551_vm10 = vcmp.eq.s32.totalorder %v549_v61, 0  ;;  %vm550_vm14 = vcmp.lt.s32.totalorder %v549_v61, 2 }
 0x22f   : > { %v530_v5 = vor.u32 %v529_v0, %v528_v55  ;;  %v533_v39 = vshll.u32 %v532_v24, 23  ;;  %v757_v13 = vand.u32 3, %v756_v1  ;;  %v2121_v55 = vld [vmem:[%s8660_s3 + $0x10] sm:$0xff] }
 0x230   : > { %v4218_v3 = vadd.s32 4294967294, %v731_v57 }
 0x231   : > { %v534_v53 = vor.u32 4788187, %v533_v39  ;;  %v537_v28 = vcvt.s32.f32 %v530_v5  ;;  %vm762_vm9 = vcmp.eq.s32.totalorder %v757_v13, 2  ;;  %vm759_vm11 = vcmp.eq.s32.totalorder %v757_v13, 0  ;;  %v2122_v39 = vld [vmem:[%s8660_s3 + $0x18] sm:$0xff] }
 0x232   : > { %vm4219_vm3 = vcmp.lt.s32.totalorder %v4218_v3, 0  ;;  %vm758_vm13 = vcmp.lt.s32.totalorder %v757_v13, 2 }
 0x233   : > { %v535_v48 = vand.u32 2147483647, %v534_v53  ;;  %v734_v23 = vsel %vm4219_vm3, 0, %v4218_v3 }
 0x234   : > { %v735_v18 = vsub.s32 32, %v734_v23  ;;  %v739_v21 = vsub.s32 4294967266, %v734_v23  ;;  %v736_v22 = vshll.u32 %v727_v63, %v734_v23 }
 0x235   : > { %v538_v16 = vmul.f32 %v537_v28, %v535_v48 }
 0x236   : > { %v737_v46 = vshrl.u32 %v719_v4, %v735_v18  ;;  %v740_v29 = vadd.s32 127, %v739_v21 }
 0x237   : > { %v539_v59 = vxor.u32 2147483648, %v538_v16 }
 0x238   : > { %v738_v6 = vor.u32 %v737_v46, %v736_v22  ;;  %v741_v34 = vshll.u32 %v740_v29, 23 }
 0x239   : > { %v540_v14 = vsel %vm457_vm5, %v539_v59, %v538_v16 }
 0x23a   : > { %v543_v40 = vsel %vm456_vm6, %v6394_v12, %v540_v14  ;;  %v742_v43 = vor.u32 4788187, %v741_v34  ;;  %v745_v42 = vcvt.s32.f32 %v738_v6 }
 0x23b   : > { %4590 = vcosq.f32 %v543_v40 }
 0x23c   : > { %4592 = vsinq.f32 %v543_v40  ;;  %v743_v10 = vand.u32 2147483647, %v742_v43 }
 0x23e   : > { %v746_v56 = vmul.f32 %v745_v42, %v743_v10 }
 0x240   : > { %v747_v2 = vxor.u32 2147483648, %v746_v56 }
 0x242   : > { %v748_v44 = vsel %vm665_vm4, %v747_v2, %v746_v56 }
 0x243   : > { %v751_v54 = vsel %vm6616_vm8, %v5139_v27, %v748_v44  ;;  %v6654_v27 = vpop.permute.xlu0 %2129 }
 0x244   : > { %4594 = vcosq.f32 %v751_v54 }
 0x245   : > { %4596 = vsinq.f32 %v751_v54 }
 0x248   : > { %v4591_v26 = vpop.eup %4590 }
 0x249   : > { %v4593_v32 = vpop.eup %4592  ;;  %v555_v9 = vxor.u32 2147483648, %v4591_v26 }
 0x24a   : > { %v552_v20 = vxor.u32 2147483648, %v4593_v32 }
 0x24b   : > { %v556_v15 = vsel %vm554_vm7, %v555_v9, %v4593_v32 }
 0x24c   : > { %v553_v31 = vsel %vm551_vm10, %v4591_v26, %v552_v20 }
 0x24d   : > { %v557_v63 = vsel %vm550_vm14, %v553_v31, %v556_v15 }
 0x24e   : > { %v558_v25 = vsel %vm547_vm12, nan, %v557_v63 }
 0x24f   : > { %2191 = vmatpush1.msra.mxu0 %v558_v25 }
 0x250   : > { %4272 = vmatmul.mubr.msk.f32.vlgmr.msra.gmra.mxu0 %vm2147_vm15, %v2119_v33 }
 0x251   : > { %2230 = vmatprep.mubr.f32.mxu0 %v4732_v45  ;;  %v4595_v60 = vpop.eup %4594 }
 0x252   : > { %v4597_v12 = vpop.eup %4596  ;;  %v763_v8 = vxor.u32 2147483648, %v4595_v60 }
 0x253   : > { %v760_v49 = vxor.u32 2147483648, %v4597_v12 }
 0x254   : > { %4273 = vmatmul.mubr.msk.f32.gmra.mxu0 %vm2147_vm15, %v2120_v17  ;;  %v764_v0 = vsel %vm762_vm9, %v763_v8, %v4597_v12 }
 0x255   : > { %2236 = vmatprep.mubr.f32.mxu0 %v4732_v45  ;;  %v761_v24 = vsel %vm759_vm11, %v4595_v60, %v760_v49 }
 0x256   : > { %v765_v37 = vsel %vm758_vm13, %v761_v24, %v764_v0 }
 0x257   : > { %v766_v5 = vsel %vm755_vm0, nan, %v765_v37 }
 0x258   : > { %4274 = vmatmul.mubr.msk.f32.gmra.mxu0 %vm2147_vm15, %v2121_v55  ;;  %2280 = vmatpush1.msra.mxu1 %v766_v5 }
 0x259   : > { %2242 = vmatprep.mubr.f32.mxu0 %v4732_v45  ;;  %4276 = vmatmul.mubr.msk.f32.vlgmr.msra.gmra.mxu1 %vm2147_vm15, %v2119_v33 }
 0x25a   : > { %2319 = vmatprep.mubr.f32.mxu1 %v4732_v45 }
 0x25c   : > { %4275 = vmatmul.mubr.msk.f32.gmra.mxu0 %vm2147_vm15, %v2122_v39 }
 0x25d   : > { %4277 = vmatmul.mubr.msk.f32.gmra.mxu1 %vm2147_vm15, %v2120_v17 }
 0x25e   : > { %2325 = vmatprep.mubr.f32.mxu1 %v4732_v45 }
 0x261   : > { %4278 = vmatmul.mubr.msk.f32.gmra.mxu1 %vm2147_vm15, %v2121_v55 }
 0x262   : > { %2331 = vmatprep.mubr.f32.mxu1 %v4732_v45 }
 0x265   : > { %4279 = vmatmul.mubr.msk.f32.gmra.mxu1 %vm2147_vm15, %v2122_v39 }
 0x310   : > { %v2226_v57 = vpop.f32.mrf.mxu0 }
 0x311   : > { %v6657_v53 = vadd.f32 %v2226_v57, %v6654_v27 }
 0x312   : > { %v2228_v61 = vpop.f32.mrf.mxu0 }
 0x313   : > { %v2341_v3 = vand.u32 2139095040, %v6657_v53  ;;  %v8703_v14 = vand.u32 2147483647, %v6657_v53  ;;  %v6687_v9 = vadd.f32 %v2228_v61, %v6654_v27 }
 0x315   : > { %v2342_v48 = vshrl.u32 %v2341_v3, 23  ;;  %v2345_v36 = vand.u32 8388607, %v8703_v14  ;;  %8824 = vst [vmem:[#allocation19_spill] sm:$0xff] %v6687_v9  ;;  %v2445_v60 = vand.u32 2139095040, %v6687_v9 }
 0x317   : > { %v4280_v28 = vadd.s32 4294967169, %v2342_v48  ;;  %v2346_v20 = vor.u32 8388608, %v2345_v36  ;;  %v2446_v24 = vshrl.u32 %v2445_v60, 23 }
 0x319   : > { %v2348_v16 = vadd.s32 1, %v4280_v28  ;;  %v2315_v23 = vpop.f32.mrf.mxu1  ;;  %v2386_v17 = vshll.u32 %v2346_v20, 8  ;;  %v4284_v48 = vadd.s32 4294967169, %v2446_v24 }
 0x31a   : > { %v6661_v4 = vadd.f32 %v2315_v23, %v6654_v27 }
 0x31b   : > { %vm2349_vm1 = vcmp.gt.s32.totalorder %v2348_v16, 0  ;;  %v2317_v60 = vpop.f32.mrf.mxu1 }
 0x31c   : > { %v2350_v18 = vsel %vm2349_vm1, %v2348_v16, 0  ;;  %v2549_v21 = vand.u32 2139095040, %v6661_v4  ;;  %v8702_v57 = vand.u32 2147483647, %v6661_v4 }
 0x31d   : > { %v2352_v45 = vand.u32 31, %v2350_v18  ;;  %v6668_v6 = vshrl.u32 %v2350_v18, 5 }
 0x31e   : > { %v2550_v19 = vshrl.u32 %v2549_v21, 23 }
 0x31f   : > { %v2353_v59 = vsub.s32 32, %v2352_v45  ;;  %v2367_v40 = vshll.u32 %v8764_v62, %v2352_v45  ;;  %v2364_v43 = vshll.u32 %v8773_v47, %v2352_v45  ;;  %v2358_v56 = vshll.u32 %v8772_v58, %v2352_v45 }
 0x320   : > { %v4288_v46 = vadd.s32 4294967169, %v2550_v19  ;;  %v2361_v50 = vshll.u32 %v8771_v35, %v2352_v45  ;;  %v2355_v41 = vshll.u32 %v8774_v51, %v2352_v45  ;;  %vm2373_vm2 = vcmp.lt.s32.totalorder %v6668_v6, 4 }
 0x321   : > { %v2368_v22 = vshrl.u32 %v8775_v7, %v2353_v59  ;;  %v2365_v29 = vshrl.u32 %v8764_v62, %v2353_v59  ;;  %v2359_v34 = vshrl.u32 %v8771_v35, %v2353_v59  ;;  %v2362_v11 = vshrl.u32 %v8773_v47, %v2353_v59 }
 0x322   : > { %v2356_v10 = vshrl.u32 %v8772_v58, %v2353_v59  ;;  %v2556_v30 = vadd.s32 1, %v4288_v46  ;;  %vm2370_vm5 = vcmp.lt.s32.totalorder %v6668_v6, 1  ;;  %vm2372_vm6 = vcmp.lt.s32.totalorder %v6668_v6, 3 }
 0x323   : > { %v2369_v42 = vor.u32 %v2368_v22, %v2367_v40  ;;  %v2366_v2 = vor.u32 %v2365_v29, %v2364_v43  ;;  %v2360_v44 = vor.u32 %v2359_v34, %v2358_v56  ;;  %v2363_v54 = vor.u32 %v2362_v11, %v2361_v50 }
 0x324   : > { %v2357_v52 = vor.u32 %v2356_v10, %v2355_v41  ;;  %vm2557_vm3 = vcmp.gt.s32.totalorder %v2556_v30, 0  ;;  %vm2371_vm4 = vcmp.lt.s32.totalorder %v6668_v6, 2  ;;  %v2354_v5 = vshrl.u32 %v8774_v51, %v2353_v59 }
 0x325   : > { %v2383_v26 = vsel %vm2373_vm2, %v2369_v42, 1326507024  ;;  %v2379_v32 = vsel %vm2373_vm2, %v2366_v2, 920167782  ;;  %v2382_v38 = vsel %vm2370_vm5, %v2360_v44, %v2363_v54  ;;  %v2558_v31 = vsel %vm2557_vm3, %v2556_v30, 0 }
 0x326   : > { %v2384_v15 = vsel %vm2372_vm6, %v2366_v2, %v2383_v26  ;;  %v2378_v63 = vsel %vm2370_vm5, %v2357_v52, %v2360_v44  ;;  %v2380_v1 = vsel %vm2372_vm6, %v2363_v54, %v2379_v32  ;;  %v2560_v25 = vand.u32 31, %v2558_v31 }
 0x327   : > { %v2385_v33 = vsel %vm2371_vm4, %v2382_v38, %v2384_v15  ;;  %v2381_v13 = vsel %vm2371_vm4, %v2378_v63, %v2380_v1  ;;  %v2375_v37 = vsel %vm2373_vm2, %v2363_v54, 2102212464  ;;  %v2374_v28 = vsel %vm2370_vm5, %v2354_v5, %v2357_v52 }
 0x328   : > { %v6703_v12 = vmul.u32.u64.low %v2386_v17, %v2385_v33  ;;  %v6704_v8 = vmul.u32.u64.high %v2386_v17, %v2385_v33, %v6703_v12  ;;  %v6706_v49 = vmul.u32.u64.low %v2386_v17, %v2381_v13  ;;  %v6707_v55 = vmul.u32.u64.high %v2386_v17, %v2381_v13, %v6706_v49 }
 0x329   : > { %v2561_v0 = vsub.s32 32, %v2560_v25  ;;  %v2376_v16 = vsel %vm2372_vm6, %v2360_v44, %v2375_v37  ;;  %v6720_v23 = vshrl.u32 %v2558_v31, 5  ;;  %v2572_v18 = vshll.u32 %v8773_v47, %v2560_v25 }
 0x32a   : > { %v2575_v19 = vshll.u32 %v8764_v62, %v2560_v25  ;;  %vm2395_vm8 = vc.u32 %v6704_v8, %v6706_v49  ;;  %v2396_v22 = vadd.s32 1, %v6707_v55  ;;  %v2563_v29 = vshll.u32 %v8774_v51, %v2560_v25 }
 0x32b   : > { %v2573_v39 = vshrl.u32 %v8764_v62, %v2561_v0  ;;  %v2576_v3 = vshrl.u32 %v8775_v7, %v2561_v0  ;;  %v2564_v45 = vshrl.u32 %v8772_v58, %v2561_v0  ;;  %v2567_v21 = vshrl.u32 %v8771_v35, %v2561_v0 }
 0x32c   : > { %v2570_v59 = vshrl.u32 %v8773_v47, %v2561_v0  ;;  %v2566_v40 = vshll.u32 %v8772_v58, %v2560_v25  ;;  %v2569_v34 = vshll.u32 %v8771_v35, %v2560_v25  ;;  %v2377_v43 = vsel %vm2371_vm4, %v2374_v28, %v2376_v16  ;;  %v6780_v16 = vpop.permute.xlu1 %2134 }
 0x32d   : > { %v2574_v46 = vor.u32 %v2573_v39, %v2572_v18  ;;  %v2577_v11 = vor.u32 %v2576_v3, %v2575_v19  ;;  %v2553_v10 = vand.u32 8388607, %v8702_v57  ;;  %v2452_v42 = vadd.s32 1, %v4284_v48  ;;  %v2232_v3 = vpop.f32.mrf.mxu0 }
 0x32e   : > { %v2565_v30 = vor.u32 %v2564_v45, %v2563_v29  ;;  %v2568_v56 = vor.u32 %v2567_v21, %v2566_v40  ;;  %v2571_v50 = vor.u32 %v2570_v59, %v2569_v34  ;;  %vm2581_vm7 = vcmp.lt.s32.totalorder %v6720_v23, 4 }
 0x32f   : > { %v2397_v2 = vsel %vm2395_vm8, %v2396_v22, %v6707_v55  ;;  %v2587_v41 = vsel %vm2581_vm7, %v2574_v46, 920167782  ;;  %v2393_v36 = vmul.u32 %v2386_v17, %v2377_v43  ;;  %v2591_v44 = vsel %vm2581_vm7, %v2577_v11, 1326507024 }
 0x330   : > { %v2554_v6 = vor.u32 8388608, %v2553_v10  ;;  %vm2578_vm10 = vcmp.lt.s32.totalorder %v6720_v23, 1  ;;  %vm2580_vm14 = vcmp.lt.s32.totalorder %v6720_v23, 3  ;;  %vm2453_vm12 = vcmp.gt.s32.totalorder %v2452_v42, 0 }
 0x331   : > { %v2398_v54 = vadd.s32 %v2397_v2, %v2393_v36  ;;  %v2586_v61 = vsel %vm2578_vm10, %v2565_v30, %v2568_v56  ;;  %v2588_v52 = vsel %vm2580_vm14, %v2571_v50, %v2587_v41  ;;  %v2590_v26 = vsel %vm2578_vm10, %v2568_v56, %v2571_v50 }
 0x332   : > { %v2592_v32 = vsel %vm2580_vm14, %v2574_v46, %v2591_v44  ;;  %vm2579_vm15 = vcmp.lt.s32.totalorder %v6720_v23, 2  ;;  %v2454_v38 = vsel %vm2453_vm12, %v2452_v42, 0  ;;  %v2594_v63 = vshll.u32 %v2554_v6, 8 }
 0x333   : > { %v2589_v20 = vsel %vm2579_vm15, %v2586_v61, %v2588_v52  ;;  %v2399_v15 = vadd.s32 536870912, %v2398_v54  ;;  %v2593_v31 = vsel %vm2579_vm15, %v2590_v26, %v2592_v32  ;;  %v2456_v25 = vand.u32 31, %v2454_v38 }
 0x334   : > { %v6758_v1 = vmul.u32.u64.low %v2594_v63, %v2589_v20  ;;  %v6759_v33 = vmul.u32.u64.high %v2594_v63, %v2589_v20, %v6758_v1  ;;  %v6762_v13 = vmul.u32.u64.low %v2594_v63, %v2593_v31  ;;  %v6763_v17 = vmul.u32.u64.high %v2594_v63, %v2593_v31, %v6762_v13 }
 0x335   : > { %v6765_v12 = vshrl.u32 %v2399_v15, 30  ;;  %v2583_v55 = vsel %vm2581_vm7, %v2571_v50, 2102212464  ;;  %v6769_v24 = vsub.s32 32, %v2456_v25  ;;  %v6772_v37 = vadd.f32 %v2317_v60, %v6654_v27 }
 0x336   : > { %v2562_v5 = vshrl.u32 %v8774_v51, %v2561_v0  ;;  %v2584_v28 = vsel %vm2580_vm14, %v2568_v56, %v2583_v55  ;;  %v2604_v18 = vadd.s32 1, %v6759_v33  ;;  %vm2603_vm9 = vc.u32 %v6763_v17, %v6758_v1 }
 0x337   : > { %8825 = vst [vmem:[#allocation12_spill] sm:$0xff] %v6772_v37  ;;  %v2401_v39 = vshll.u32 %v6765_v12, 30  ;;  %v2469_v45 = vshrl.u32 %v8764_v62, %v6769_v24  ;;  %v2653_v27 = vand.u32 2139095040, %v6772_v37  ;;  %v8701_v0 = vand.u32 2147483647, %v6687_v9 }
 0x338   : > { %v2582_v48 = vsel %vm2578_vm10, %v2562_v5, %v2565_v30  ;;  %v2472_v21 = vshrl.u32 %v8775_v7, %v6769_v24  ;;  %v6792_v59 = vadd.f32 %v2232_v3, %v6780_v16  ;;  %v2460_v46 = vshrl.u32 %v8772_v58, %v6769_v24 }
 0x339   : > { %v6794_v19 = vsub.s32 %v2398_v54, %v2401_v39  ;;  %v2585_v22 = vsel %vm2579_vm15, %v2582_v48, %v2584_v28  ;;  %v2468_v29 = vshll.u32 %v8773_v47, %v2456_v25  ;;  %v6801_v40 = vshrl.u32 %v2454_v38, 5 }
 0x33a   : > { %8826 = vst [vmem:[#allocation21_spill] sm:$0xff] %v6792_v59  ;;  %v2463_v34 = vshrl.u32 %v8771_v35, %v6769_v24  ;;  %v2466_v11 = vshrl.u32 %v8773_v47, %v6769_v24  ;;  %v2471_v43 = vshll.u32 %v8764_v62, %v2456_v25  ;;  %v2605_v10 = vsel %vm2603_vm9, %v2604_v18, %v6759_v33 }
 0x33b   : > { %v2459_v23 = vshll.u32 %v8774_v51, %v2456_v25  ;;  %v2470_v42 = vor.u32 %v2469_v45, %v2468_v29  ;;  %v2654_v30 = vshrl.u32 %v2653_v27, 23  ;;  %v2601_v56 = vmul.u32 %v2594_v63, %v2585_v22 }
 0x33c   : > { %v2462_v50 = vshll.u32 %v8772_v58, %v2456_v25  ;;  %v2465_v2 = vshll.u32 %v8771_v35, %v2456_v25  ;;  %v2473_v41 = vor.u32 %v2472_v21, %v2471_v43  ;;  %v2404_v36 = vsub.s32 0, %v6794_v19 }
 0x33d   : > { %v2449_v44 = vand.u32 8388607, %v8701_v0  ;;  %v2461_v6 = vor.u32 %v2460_v46, %v2459_v23  ;;  %v2606_v54 = vadd.s32 %v2605_v10, %v2601_v56  ;;  %vm2477_vm11 = vcmp.lt.s32.totalorder %v6801_v40, 4 }
 0x33e   : > { %v2464_v61 = vor.u32 %v2463_v34, %v2462_v50  ;;  %v2467_v52 = vor.u32 %v2466_v11, %v2465_v2  ;;  %v2483_v26 = vsel %vm2477_vm11, %v2470_v42, 920167782  ;;  %v4292_v32 = vadd.s32 4294967169, %v2654_v30 }
 0x33f   : > { %v2487_v20 = vsel %vm2477_vm11, %v2473_v41, 1326507024  ;;  %v2757_v38 = vand.u32 2139095040, %v6792_v59  ;;  %v2450_v15 = vor.u32 8388608, %v2449_v44  ;;  %vm2474_vm13 = vcmp.lt.s32.totalorder %v6801_v40, 1 }
 0x340   : > { %vm2476_vm0 = vcmp.lt.s32.totalorder %v6801_v40, 3  ;;  %v4281_v31 = vmin.u32 %v2404_v36, %v6794_v19  ;;  %v2607_v63 = vadd.s32 536870912, %v2606_v54  ;;  %v2482_v33 = vsel %vm2474_vm13, %v2461_v6, %v2464_v61 }
 0x341   : > { %v2484_v25 = vsel %vm2476_vm0, %v2467_v52, %v2483_v26  ;;  %v2486_v13 = vsel %vm2474_vm13, %v2464_v61, %v2467_v52  ;;  %v2488_v60 = vsel %vm2476_vm0, %v2470_v42, %v2487_v20  ;;  %v2660_v55 = vadd.s32 1, %v4292_v32  ;;  %v2234_v26 = vpop.f32.mrf.mxu0 }
 0x342   : > { %vm2475_vm1 = vcmp.lt.s32.totalorder %v6801_v40, 2  ;;  %v2758_v5 = vshrl.u32 %v2757_v38, 23  ;;  %v2406_v3 = vclz %v4281_v31  ;;  %v6835_v48 = vshrl.u32 %v2607_v63, 30 }
 0x343   : > { %v2485_v39 = vsel %vm2475_vm1, %v2482_v33, %v2484_v25  ;;  %v2489_v28 = vsel %vm2475_vm1, %v2486_v13, %v2488_v60  ;;  %v2490_v18 = vshll.u32 %v2450_v15, 8  ;;  %vm2661_vm2 = vcmp.gt.s32.totalorder %v2660_v55, 0 }
 0x344   : > { %8827 = vst [vmem:[#allocation22_spill] sm:$0xff] %v6835_v48  ;;  %v8699_v21 = vand.u32 2147483647, %v6792_v59  ;;  %v4296_v22 = vadd.s32 4294967169, %v2758_v5  ;;  %v4282_v34 = vadd.s32 4294967294, %v2406_v3  ;;  %v2609_v11 = vshll.u32 %v6835_v48, 30 }
 0x345   : > { %v6839_v45 = vmul.u32.u64.low %v2490_v18, %v2485_v39  ;;  %v6840_v27 = vmul.u32.u64.high %v2490_v18, %v2485_v39, %v6839_v45  ;;  %v6844_v46 = vmul.u32.u64.low %v2490_v18, %v2489_v28  ;;  %v6845_v29 = vmul.u32.u64.high %v2490_v18, %v2489_v28, %v6844_v46 }
 0x346   : > { %v2662_v43 = vsel %vm2661_vm2, %v2660_v55, 0  ;;  %v2479_v10 = vsel %vm2477_vm11, %v2467_v52, 2102212464  ;;  %v2761_v23 = vand.u32 8388607, %v8699_v21  ;;  %v2764_v42 = vadd.s32 1, %v4296_v22 }
 0x347   : > { %v2458_v30 = vshrl.u32 %v8774_v51, %v6769_v24  ;;  %v2664_v56 = vand.u32 31, %v2662_v43  ;;  %vm4283_vm3 = vcmp.lt.s32.totalorder %v4282_v34, 0  ;;  %v6854_v50 = vsub.s32 %v2606_v54, %v2609_v11 }
 0x348   : > { %v2480_v41 = vsel %vm2476_vm0, %v2464_v61, %v2479_v10  ;;  %v2500_v36 = vadd.s32 1, %v6840_v27  ;;  %v8700_v44 = vand.u32 2147483647, %v6772_v37  ;;  %v2762_v52 = vor.u32 8388608, %v2761_v23  ;;  %v2321_v61 = vpop.f32.mrf.mxu1 }
 0x349   : > { %v2478_v2 = vsel %vm2474_vm13, %v2458_v30, %v2461_v6  ;;  %vm2765_vm5 = vcmp.gt.s32.totalorder %v2764_v42, 0  ;;  %v6862_v32 = vsel %vm4283_vm3, 0, %v4282_v34  ;;  %vm2499_vm6 = vc.u32 %v6845_v29, %v6839_v45 }
 0x34a   : > { %v6866_v24 = vsub.s32 32, %v2664_v56  ;;  %v2612_v54 = vsub.s32 0, %v6854_v50  ;;  %v2481_v6 = vsel %vm2475_vm1, %v2478_v2, %v2480_v41  ;;  %v2766_v20 = vsel %vm2765_vm5, %v2764_v42, 0 }
 0x34b   : > { %v6872_v38 = vadd.f32 %v2234_v26, %v6780_v16  ;;  %v2414_v15 = vsub.s32 4294967266, %v6862_v32  ;;  %v2501_v31 = vsel %vm2499_vm6, %v2500_v36, %v6840_v27  ;;  %v2657_v63 = vand.u32 8388607, %v8700_v44 }
 0x34c   : > { %v6878_v33 = vshll.u32 %v2762_v52, 8  ;;  %v2394_v25 = vadd.s32 %v6706_v49, %v6704_v8  ;;  %v2497_v13 = vmul.u32 %v2490_v18, %v2481_v6  ;;  %v2677_v40 = vshrl.u32 %v8764_v62, %v6866_v24 }
 0x34d   : > { %v6885_v60 = vadd.f32 %v2321_v61, %v6780_v16  ;;  %v2410_v55 = vsub.s32 32, %v6862_v32  ;;  %v6890_v5 = vadd.s32 %v6758_v1, %v6763_v17  ;;  %v4289_v39 = vmin.u32 %v2612_v54, %v6854_v50 }
 0x34e   : > { %v2768_v3 = vand.u32 31, %v2766_v20  ;;  %v6893_v28 = vadd.s32 %v2501_v31, %v2497_v13  ;;  %v2668_v8 = vshrl.u32 %v8772_v58, %v6866_v24  ;;  %v2671_v49 = vshrl.u32 %v8771_v35, %v6866_v24 }
 0x34f   : > { %v2676_v18 = vshll.u32 %v8773_v47, %v2664_v56  ;;  %v2415_v27 = vadd.s32 127, %v2414_v15  ;;  %v2658_v22 = vor.u32 8388608, %v2657_v63  ;;  %v6900_v46 = vshrl.u32 %v2662_v43, 5 }
 0x350   : > { %v2674_v1 = vshrl.u32 %v8773_v47, %v6866_v24  ;;  %v2667_v17 = vshll.u32 %v8774_v51, %v2664_v56  ;;  %v2670_v34 = vshll.u32 %v8772_v58, %v2664_v56  ;;  %v2680_v10 = vshrl.u32 %v8775_v7, %v6866_v24 }
 0x351   : > { %v2678_v11 = vor.u32 %v2677_v40, %v2676_v18  ;;  %v2411_v23 = vshll.u32 %v6794_v19, %v6862_v32  ;;  %v2614_v42 = vclz %v4289_v39  ;;  %v2673_v30 = vshll.u32 %v8771_v35, %v2664_v56 }
 0x352   : > { %v6911_v2 = vsub.s32 32, %v2768_v3  ;;  %v2503_v43 = vadd.s32 536870912, %v6893_v28  ;;  %v2669_v41 = vor.u32 %v2668_v8, %v2667_v17  ;;  %v2672_v36 = vor.u32 %v2671_v49, %v2670_v34 }
 0x353   : > { %v2679_v52 = vshll.u32 %v8764_v62, %v2664_v56  ;;  %v6915_v26 = vshrl.u32 %v2394_v25, %v2410_v55  ;;  %v2675_v54 = vor.u32 %v2674_v1, %v2673_v30  ;;  %vm2685_vm4 = vcmp.lt.s32.totalorder %v6900_v46, 4 }
 0x354   : > { %v2965_v6 = vand.u32 2139095040, %v6885_v60  ;;  %v2416_v61 = vshll.u32 %v2415_v27, 23  ;;  %v2691_v31 = vsel %vm2685_vm4, %v2678_v11, 920167782  ;;  %v6921_v63 = vshll.u32 %v2658_v22, 8 }
 0x355   : > { %v2681_v15 = vor.u32 %v2680_v10, %v2679_v52  ;;  %v4290_v13 = vadd.s32 4294967294, %v2614_v42  ;;  %vm2682_vm8 = vcmp.lt.s32.totalorder %v6900_v46, 1  ;;  %v2781_v56 = vshrl.u32 %v8764_v62, %v6911_v2 }
 0x356   : > { %v2966_v25 = vshrl.u32 %v2965_v6, 23  ;;  %v6926_v40 = vshrl.u32 %v2503_v43, 30  ;;  %vm2684_vm7 = vcmp.lt.s32.totalorder %v6900_v46, 3  ;;  %v2690_v55 = vsel %vm2682_vm8, %v2669_v41, %v2672_v36 }
 0x357   : > { %v6931_v39 = vshrl.u32 %v2766_v20, 5  ;;  %v2692_v8 = vsel %vm2684_vm7, %v2675_v54, %v2691_v31  ;;  %v2772_v49 = vshrl.u32 %v8772_v58, %v6911_v2  ;;  %v2780_v18 = vshll.u32 %v8773_v47, %v2768_v3 }
 0x358   : > { %8828 = vst [vmem:[#allocation18_spill] sm:$0xff] %v6926_v40  ;;  %v4304_v27 = vadd.s32 4294967169, %v2966_v25  ;;  %v2695_v22 = vsel %vm2685_vm4, %v2681_v15, 1326507024  ;;  %v2775_v1 = vshrl.u32 %v8771_v35, %v6911_v2  ;;  %v2778_v17 = vshrl.u32 %v8773_v47, %v6911_v2 }
 0x359   : > { %v2784_v20 = vshrl.u32 %v8775_v7, %v6911_v2  ;;  %vm2683_vm10 = vcmp.lt.s32.totalorder %v6900_v46, 2  ;;  %v2771_v34 = vshll.u32 %v8774_v51, %v2768_v3  ;;  %v2782_v10 = vor.u32 %v2781_v56, %v2780_v18 }
 0x35a   : > { %v2972_v42 = vadd.s32 1, %v4304_v27  ;;  %v2694_v30 = vsel %vm2682_vm8, %v2672_v36, %v2675_v54  ;;  %v2774_v43 = vshll.u32 %v8772_v58, %v2768_v3  ;;  %v2777_v52 = vshll.u32 %v8771_v35, %v2768_v3 }
 0x35b   : > { %v2783_v6 = vshll.u32 %v8764_v62, %v2768_v3  ;;  %v2693_v15 = vsel %vm2683_vm10, %v2690_v55, %v2692_v8  ;;  %v2696_v31 = vsel %vm2684_vm7, %v2678_v11, %v2695_v22  ;;  %v6957_v25 = vor.u32 %v2772_v49, %v2771_v34 }
 0x35c   : > { %vm2973_vm14 = vcmp.gt.s32.totalorder %v2972_v42, 0  ;;  %v6959_v56 = vor.u32 %v2775_v1, %v2774_v43  ;;  %v2779_v18 = vor.u32 %v2778_v17, %v2777_v52  ;;  %vm2789_vm12 = vcmp.lt.s32.totalorder %v6931_v39, 4 }
 0x35d   : > { %v2785_v27 = vor.u32 %v2784_v20, %v2783_v6  ;;  %v6962_v21 = vor.u32 4788187, %v2416_v61  ;;  %v2505_v44 = vshll.u32 %v6926_v40, 30  ;;  %v2795_v3 = vsel %vm2789_vm12, %v2782_v10, 920167782 }
 0x35e   : > { %v2974_v55 = vsel %vm2973_vm14, %v2972_v42, 0  ;;  %vm4291_vm15 = vcmp.lt.s32.totalorder %v4290_v13, 0  ;;  %v2697_v11 = vsel %vm2683_vm10, %v2694_v30, %v2696_v31  ;;  %v2687_v22 = vsel %vm2685_vm4, %v2675_v54, 2102212464 }
 0x35f   : > { %v6970_v8 = vmul.u32.u64.low %v6921_v63, %v2693_v15  ;;  %v6971_v49 = vmul.u32.u64.high %v6921_v63, %v2693_v15, %v6970_v8  ;;  %vm2786_vm9 = vcmp.lt.s32.totalorder %v6931_v39, 1  ;;  %vm2788_vm11 = vcmp.lt.s32.totalorder %v6931_v39, 3 }
 0x360   : > { %v2976_v61 = vand.u32 31, %v2974_v55  ;;  %v2666_v1 = vshrl.u32 %v8774_v51, %v6866_v24  ;;  %v2794_v17 = vsel %vm2786_vm9, %v6957_v25, %v6959_v56  ;;  %v2796_v20 = vsel %vm2788_vm11, %v2779_v18, %v2795_v3 }
 0x361   : > { %v2799_v34 = vsel %vm2789_vm12, %v2785_v27, 1326507024  ;;  %v6988_v54 = vsel %vm4291_vm15, 0, %v4290_v13  ;;  %v6991_v42 = vsub.s32 %v6893_v28, %v2505_v44  ;;  %v2688_v52 = vsel %vm2684_vm7, %v2672_v36, %v2687_v22 }
 0x362   : > { %v6994_v30 = vmul.u32.u64.low %v6921_v63, %v2697_v11  ;;  %v6995_v43 = vmul.u32.u64.high %v6921_v63, %v2697_v11, %v6994_v30  ;;  %v2686_v24 = vsel %vm2682_vm8, %v2666_v1, %v2669_v41  ;;  %vm2787_vm13 = vcmp.lt.s32.totalorder %v6931_v39, 2 }
 0x363   : > { %v2798_v13 = vsel %vm2786_vm9, %v6959_v56, %v2779_v18  ;;  %v2797_v44 = vsel %vm2787_vm13, %v2794_v17, %v2796_v20  ;;  %v2800_v28 = vsel %vm2788_vm11, %v2782_v10, %v2799_v34  ;;  %v7009_v6 = vsub.s32 32, %v2976_v61 }
 0x364   : > { %v2861_v15 = vand.u32 2139095040, %v6872_v38  ;;  %v7016_v41 = vor.u32 %v6915_v26, %v2411_v23  ;;  %v2618_v31 = vsub.s32 32, %v6988_v54  ;;  %v2962_v27 = vand.u32 2147483647, %v6885_v60 }
 0x365   : > { %v2622_v3 = vsub.s32 4294967266, %v6988_v54  ;;  %v2508_v10 = vsub.s32 0, %v6991_v42  ;;  %v2689_v11 = vsel %vm2683_vm10, %v2686_v24, %v2688_v52  ;;  %v2770_v22 = vshrl.u32 %v8774_v51, %v6911_v2 }
 0x366   : > { %v2708_v19 = vadd.s32 1, %v6971_v49  ;;  %v2801_v32 = vsel %vm2787_vm13, %v2798_v13, %v2800_v28  ;;  %v7031_v23 = vmul.u32.u64.low %v6878_v33, %v2797_v44  ;;  %v7032_v26 = vmul.u32.u64.high %v6878_v33, %v2797_v44, %v7031_v23 }
 0x367   : > { %v7035_v1 = vshrl.u32 %v2974_v55, 5  ;;  %v2980_v17 = vshrl.u32 %v8772_v58, %v7009_v6  ;;  %v2989_v46 = vshrl.u32 %v8764_v62, %v7009_v6  ;;  %v2862_v20 = vshrl.u32 %v2861_v15, 23 }
 0x368   : > { %v2983_v2 = vshrl.u32 %v8771_v35, %v7009_v6  ;;  %v2986_v34 = vshrl.u32 %v8773_v47, %v7009_v6  ;;  %v2988_v30 = vshll.u32 %v8773_v47, %v2976_v61  ;;  %v2992_v24 = vshrl.u32 %v8775_v7, %v7009_v6 }
 0x369   : > { %vm2707_vm0 = vc.u32 %v6995_v43, %v6970_v8  ;;  %v7051_v55 = vmul.u32.u64.low %v6878_v33, %v2801_v32  ;;  %v7052_v52 = vmul.u32.u64.high %v6878_v33, %v2801_v32, %v7051_v55  ;;  %v2991_v13 = vshll.u32 %v8764_v62, %v2976_v61 }
 0x36a   : > { %v2979_v44 = vshll.u32 %v8774_v51, %v2976_v61  ;;  %v2982_v28 = vshll.u32 %v8772_v58, %v2976_v61  ;;  %v2985_v15 = vshll.u32 %v8771_v35, %v2976_v61  ;;  %v2990_v0 = vor.u32 %v2989_v46, %v2988_v30 }
 0x36b   : > { %v2791_v57 = vsel %vm2789_vm12, %v2779_v18, 2102212464  ;;  %v2969_v14 = vand.u32 8388607, %v2962_v27  ;;  %v2993_v36 = vor.u32 %v2992_v24, %v2991_v13  ;;  %v4300_v59 = vadd.s32 4294967169, %v2862_v20 }
 0x36c   : > { %v2981_v37 = vor.u32 %v2980_v17, %v2979_v44  ;;  %v2984_v32 = vor.u32 %v2983_v2, %v2982_v28  ;;  %v2987_v55 = vor.u32 %v2986_v34, %v2985_v15  ;;  %vm2997_vm1 = vcmp.lt.s32.totalorder %v7035_v1, 4 }
 0x36d   : > { %v2620_v9 = vshrl.u32 %v6890_v5, %v2618_v31  ;;  %v2623_v40 = vadd.s32 127, %v2622_v3  ;;  %v4285_v48 = vmin.u32 %v2508_v10, %v6991_v42  ;;  %v3003_v61 = vsel %vm2997_vm1, %v2990_v0, 920167782 }
 0x36e   : > { %v2705_v18 = vmul.u32 %v6921_v63, %v2689_v11  ;;  %v2709_v46 = vsel %vm2707_vm0, %v2708_v19, %v6971_v49  ;;  %v2790_v17 = vsel %vm2786_vm9, %v2770_v22, %v6957_v25  ;;  %v2792_v5 = vsel %vm2788_vm11, %v6959_v56, %v2791_v57 }
 0x36f   : > { %vm2994_vm2 = vcmp.lt.s32.totalorder %v7035_v1, 1  ;;  %vm2996_vm3 = vcmp.lt.s32.totalorder %v7035_v1, 3  ;;  %v3007_v63 = vsel %vm2997_vm1, %v2993_v36, 1326507024  ;;  %v2868_v31 = vadd.s32 1, %v4300_v59 }
 0x370   : > { %v2812_v3 = vadd.s32 1, %v7032_v26  ;;  %v2970_v10 = vor.u32 8388608, %v2969_v14  ;;  %v3002_v49 = vsel %vm2994_vm2, %v2981_v37, %v2984_v32  ;;  %v3004_v25 = vsel %vm2996_vm3, %v2987_v55, %v3003_v61 }
 0x371   : > { %v2624_v11 = vshll.u32 %v2623_v40, 23  ;;  %vm2811_vm5 = vc.u32 %v7052_v52, %v7031_v23  ;;  %v3006_v57 = vsel %vm2994_vm2, %v2984_v32, %v2987_v55  ;;  %v3008_v56 = vsel %vm2996_vm3, %v2990_v0, %v3007_v63 }
 0x372   : > { %v2420_v59 = vcvt.s32.f32 %v7016_v41  ;;  %v2710_v36 = vadd.s32 %v2709_v46, %v2705_v18  ;;  %v2793_v14 = vsel %vm2787_vm13, %v2790_v17, %v2792_v5  ;;  %vm2995_vm6 = vcmp.lt.s32.totalorder %v7035_v1, 2 }
 0x373   : > { %v2619_v40 = vshll.u32 %v6854_v50, %v6988_v54  ;;  %v2510_v22 = vclz %v4285_v48  ;;  %v3005_v19 = vsel %vm2995_vm6, %v3002_v49, %v3004_v25  ;;  %vm2869_vm4 = vcmp.gt.s32.totalorder %v2868_v31, 0 }
 0x374   : > { %v2813_v20 = vsel %vm2811_vm5, %v2812_v3, %v7032_v26  ;;  %v3009_v0 = vsel %vm2995_vm6, %v3006_v57, %v3008_v56  ;;  %v3010_v41 = vshll.u32 %v2970_v10, 8  ;;  %v8829_v2 = vand.u32 2147483647, %v6962_v21 }
 0x375   : > { %v2621_v34 = vor.u32 %v2620_v9, %v2619_v40  ;;  %v2625_v30 = vor.u32 4788187, %v2624_v11  ;;  %v2809_v24 = vmul.u32 %v6878_v33, %v2793_v14  ;;  %v2711_v13 = vadd.s32 536870912, %v2710_v36 }
 0x376   : > { %v2421_v39 = vmul.f32 %v2420_v59, %v8829_v2  ;;  %v7107_v50 = vmul.u32.u64.low %v3010_v41, %v3005_v19  ;;  %v7108_v48 = vmul.u32.u64.high %v3010_v41, %v3005_v19, %v7107_v50  ;;  %v2870_v54 = vsel %vm2869_vm4, %v2868_v31, 0 }
 0x377   : > { %v4286_v44 = vadd.s32 4294967294, %v2510_v22  ;;  %v2814_v28 = vadd.s32 %v2813_v20, %v2809_v24  ;;  %v7111_v26 = vmul.u32.u64.low %v3010_v41, %v3009_v0  ;;  %v7112_v15 = vmul.u32.u64.high %v3010_v41, %v3009_v0, %v7111_v26 }
 0x378   : > { %v2626_v61 = vand.u32 2147483647, %v2625_v30  ;;  %v2872_v18 = vand.u32 31, %v2870_v54  ;;  %v2422_v46 = vxor.u32 2147483648, %v2421_v39  ;;  %v7114_v21 = vshrl.u32 %v2711_v13, 30 }
 0x379   : > { %v2999_v9 = vsel %vm2997_vm1, %v2987_v55, 2102212464  ;;  %v2628_v33 = vcvt.s32.f32 %v2621_v34  ;;  %vm4287_vm8 = vcmp.lt.s32.totalorder %v4286_v44, 0  ;;  %v2815_v17 = vadd.s32 536870912, %v2814_v28 }
 0x37a   : > { %v2978_v5 = vshrl.u32 %v8774_v51, %v7009_v6  ;;  %vm2340_vm7 = vcmp.lt.s32.totalorder %v6657_v53, 0  ;;  %v2424_v63 = vsub.s32 4, %v6765_v12  ;;  %v3000_v10 = vsel %vm2996_vm3, %v2984_v32, %v2999_v9 }
 0x37b   : > { %v2629_v31 = vmul.f32 %v2628_v33, %v2626_v61  ;;  %v7126_v49 = vsub.s32 32, %v2872_v18  ;;  %v2423_v55 = vsel %vm2340_vm7, %v2422_v46, %v2421_v39  ;;  %v7128_v25 = vsel %vm4287_vm8, 0, %v4286_v44 }
 0x37c   : > { %v2998_v3 = vsel %vm2994_vm2, %v2978_v5, %v2981_v37  ;;  %v2713_v11 = vshll.u32 %v7114_v21, 30  ;;  %v3020_v6 = vadd.s32 1, %v7108_v48  ;;  %v8830_v57 = vand.u32 2147483647, %v6657_v53  ;;  %v2323_v5 = vpop.f32.mrf.mxu1 }
 0x37d   : > { %v7138_v59 = vshrl.u32 %v2815_v17, 30  ;;  %vm3019_vm14 = vc.u32 %v7112_v15, %v7107_v50  ;;  %v7143_v37 = vsel %vm2340_vm7, %v2424_v63, %v6765_v12  ;;  %vm2548_vm12 = vcmp.lt.s32.totalorder %v6661_v4, 0 }
 0x37e   : > { %vm7134_vm10 = vcmp.le.f32.partialorder %v8830_v57, 0.7853982  ;;  %v2498_v32 = vadd.s32 %v6839_v45, %v6845_v29  ;;  %v3001_v14 = vsel %vm2995_vm6, %v2998_v3, %v3000_v10  ;;  %v8833_v22 = vand.u32 2147483647, %v6661_v4 }
 0x37f   : > { %v2426_v40 = vsel %vm7134_vm10, %v6657_v53, %v2423_v55  ;;  %v2630_v12 = vxor.u32 2147483648, %v2629_v31  ;;  %v2518_v20 = vsub.s32 4294967266, %v7128_v25  ;;  %v2885_v0 = vshrl.u32 %v8764_v62, %v7126_v49 }
 0x380   : > { %vm7155_vm15 = vcmp.le.f32.partialorder %v8833_v22, 0.7853982  ;;  %v7162_v45 = vsub.s32 %v2710_v36, %v2713_v11  ;;  %v3021_v29 = vsel %vm3019_vm14, %v3020_v6, %v7108_v48  ;;  %v8716_v1 = vand.u32 2147483647, %v6872_v38 }
 0x381   : > { %v2888_v2 = vshrl.u32 %v8775_v7, %v7126_v49  ;;  %v2817_v39 = vshll.u32 %v7138_v59, 30  ;;  %v3017_v34 = vmul.u32 %v3010_v41, %v3001_v14  ;;  %v7169_v30 = vshrl.u32 %v2870_v54, 5 }
 0x382   : > { %v2884_v24 = vshll.u32 %v8773_v47, %v2872_v18  ;;  %v2876_v13 = vshrl.u32 %v8772_v58, %v7126_v49  ;;  %v2879_v36 = vshrl.u32 %v8771_v35, %v7126_v49  ;;  %v2882_v48 = vshrl.u32 %v8773_v47, %v7126_v49 }
 0x383   : > { %v2887_v44 = vshll.u32 %v8764_v62, %v2872_v18  ;;  %v2631_v26 = vsel %vm2548_vm12, %v2630_v12, %v2629_v31  ;;  %v2514_v41 = vsub.s32 32, %v7128_v25  ;;  %v3022_v54 = vadd.s32 %v3021_v29, %v3017_v34 }
 0x384   : > { %v2886_v61 = vor.u32 %v2885_v0, %v2884_v24  ;;  %v2875_v46 = vshll.u32 %v8774_v51, %v2872_v18  ;;  %v2878_v9 = vshll.u32 %v8772_v58, %v2872_v18  ;;  %v2881_v33 = vshll.u32 %v8771_v35, %v2872_v18 }
 0x385   : > { %v2889_v17 = vor.u32 %v2888_v2, %v2887_v44  ;;  %v2519_v63 = vadd.s32 127, %v2518_v20  ;;  %v2716_v3 = vsub.s32 0, %v7162_v45  ;;  %v7186_v10 = vsub.s32 %v2814_v28, %v2817_v39 }
 0x386   : > { %v2865_v31 = vand.u32 8388607, %v8716_v1  ;;  %v7190_v55 = vor.u32 %v2876_v13, %v2875_v46  ;;  %v7192_v11 = vor.u32 %v2879_v36, %v2878_v9  ;;  %v2883_v6 = vor.u32 %v2882_v48, %v2881_v33  ;;  %v8836_v36 = vld [vmem:[#allocation22_spill] sm:$0xff] }
 0x387   : > { %vm2893_vm9 = vcmp.lt.s32.totalorder %v7169_v30, 4  ;;  %4598 = vcosq.f32 %v2426_v40  ;;  %v3023_v57 = vadd.s32 536870912, %v3022_v54  ;;  %v7198_v14 = vadd.f32 %v2323_v5, %v6780_v16 }
 0x388   : > { %v2899_v18 = vsel %vm2893_vm9, %v2886_v61, 920167782  ;;  %4600 = vsinq.f32 %v2426_v40  ;;  %v2634_v28 = vsel %vm7155_vm15, %v6661_v4, %v2631_v26  ;;  %v2516_v22 = vshrl.u32 %v2498_v32, %v2514_v41 }
 0x389   : > { %v2903_v12 = vsel %vm2893_vm9, %v2889_v17, 1326507024  ;;  %v2520_v20 = vshll.u32 %v2519_v63, 23  ;;  %v4293_v0 = vmin.u32 %v2716_v3, %v7162_v45  ;;  %vm2890_vm11 = vcmp.lt.s32.totalorder %v7169_v30, 1 }
 0x38a   : > { %vm2892_vm13 = vcmp.lt.s32.totalorder %v7169_v30, 3  ;;  %v2820_v29 = vsub.s32 0, %v7186_v10  ;;  %v2866_v16 = vor.u32 8388608, %v2865_v31  ;;  %v2898_v40 = vsel %vm2890_vm11, %v7190_v55, %v7192_v11 }
 0x38b   : > { %v2900_v32 = vsel %vm2892_vm13, %v2883_v6, %v2899_v18  ;;  %v7215_v2 = vshrl.u32 %v3023_v57, 30  ;;  %v2902_v39 = vsel %vm2890_vm11, %v7192_v11, %v2883_v6  ;;  %v2904_v34 = vsel %vm2892_vm13, %v2886_v61, %v2903_v12 }
 0x38c   : > { %v3069_v24 = vand.u32 2139095040, %v7198_v14  ;;  %v2427_v13 = vsel %vm7134_vm10, 0, %v7143_v37  ;;  %v2632_v48 = vsub.s32 4, %v8836_v36  ;;  %4602 = vcosq.f32 %v2634_v28 }
 0x38d   : > { %vm2891_vm0 = vcmp.lt.s32.totalorder %v7169_v30, 2  ;;  %4604 = vsinq.f32 %v2634_v28  ;;  %v2515_v44 = vshll.u32 %v6991_v42, %v7128_v25  ;;  %v2521_v26 = vor.u32 4788187, %v2520_v20 }
 0x38e   : > { %v2901_v41 = vsel %vm2891_vm0, %v2898_v40, %v2900_v32  ;;  %v2718_v61 = vclz %v4293_v0  ;;  %v4297_v46 = vmin.u32 %v2820_v29, %v7186_v10  ;;  %v2905_v56 = vsel %vm2891_vm0, %v2902_v39, %v2904_v34 }
 0x38f   : > { %v7235_v37 = vshll.u32 %v2866_v16, 8  ;;  %v2517_v9 = vor.u32 %v2516_v22, %v2515_v44  ;;  %v3025_v33 = vshll.u32 %v7215_v2, 30  ;;  %v3070_v17 = vshrl.u32 %v3069_v24, 23 }
 0x390   : > { %v2633_v42 = vsel %vm2548_vm12, %v2632_v48, %v8836_v36  ;;  %v2431_v63 = vadd.s32 3, %v2427_v13  ;;  %v2522_v3 = vand.u32 2147483647, %v2521_v26  ;;  %v4294_v18 = vadd.s32 4294967294, %v2718_v61  ;;  %v8837_v13 = vld [vmem:[#allocation18_spill] sm:$0xff]  ;;  %v8838_v61 = vld [vmem:[#allocation19_spill] sm:$0xff] }
 0x391   : > { %v7242_v25 = vmul.u32.u64.low %v7235_v37, %v2901_v41  ;;  %v7243_v5 = vmul.u32.u64.high %v7235_v37, %v2901_v41, %v7242_v25  ;;  %v7247_v31 = vmul.u32.u64.low %v7235_v37, %v2905_v56  ;;  %v7248_v57 = vmul.u32.u64.high %v7235_v37, %v2905_v56, %v7247_v31 }
 0x392   : > { %v2822_v28 = vclz %v4297_v46  ;;  %v2635_v22 = vsel %vm7155_vm15, 0, %v2633_v42  ;;  %v2524_v12 = vcvt.s32.f32 %v2517_v9  ;;  %v7252_v20 = vsub.s32 %v3022_v54, %v3025_v33 }
 0x393   : > { %v4308_v0 = vadd.s32 4294967169, %v3070_v17  ;;  %v2895_v16 = vsel %vm2893_vm9, %v2883_v6, 2102212464  ;;  %v2432_v32 = vand.u32 3, %v2431_v63  ;;  %v2874_v34 = vshrl.u32 %v8774_v51, %v7126_v49 }
 0x394   : > { %v4599_v29 = vpop.eup %4598  ;;  %v2525_v39 = vmul.f32 %v2524_v12, %v2522_v3  ;;  %v2639_v24 = vadd.s32 3, %v2635_v22  ;;  %v2528_v36 = vsub.s32 4, %v8837_v13  ;;  %vm4295_vm1 = vcmp.lt.s32.totalorder %v4294_v18, 0 }
 0x395   : > { %v4601_v40 = vpop.eup %4600  ;;  %v4298_v19 = vadd.s32 4294967294, %v2822_v28  ;;  %v3028_v48 = vsub.s32 0, %v7252_v20  ;;  %v2894_v54 = vsel %vm2890_vm11, %v2874_v34, %v7190_v55  ;;  %v2896_v6 = vsel %vm2892_vm13, %v7192_v11, %v2895_v16 }
 0x396   : > { %v3076_v44 = vadd.s32 1, %v4308_v0  ;;  %v2435_v26 = vxor.u32 2147483648, %v4601_v40  ;;  %v2438_v41 = vxor.u32 2147483648, %v4599_v29  ;;  %vm2444_vm2 = vcmp.lt.s32.totalorder %v8838_v61, 0 }
 0x397   : > { %v2916_v49 = vadd.s32 1, %v7243_v5  ;;  %vm2434_vm3 = vcmp.eq.s32.totalorder %v2432_v32, 0  ;;  %v8839_v56 = vand.u32 2147483647, %v8838_v61  ;;  %v2526_v55 = vxor.u32 2147483648, %v2525_v39 }
 0x398   : > { %vm2915_vm6 = vc.u32 %v7248_v57, %v7242_v25  ;;  %vm2430_vm4 = vweird.f32 %v6657_v53  ;;  %vm2437_vm8 = vcmp.eq.s32.totalorder %v2432_v32, 2  ;;  %v2640_v33 = vand.u32 3, %v2639_v24 }
 0x399   : > { %v4603_v46 = vpop.eup %4602  ;;  %vm7270_vm5 = vcmp.le.f32.partialorder %v8839_v56, 0.7853982  ;;  %v2721_v17 = vsel %vm4295_vm1, 0, %v4294_v18  ;;  %v2897_v42 = vsel %vm2891_vm0, %v2894_v54, %v2896_v6  ;;  %v2529_v63 = vsel %vm2444_vm2, %v2528_v36, %v8837_v13  ;;  %v7290_v13 = vpop.permute.xlu0 %2139 }
 0x39a   : > { %v4605_v11 = vpop.eup %4604  ;;  %vm4299_vm7 = vcmp.lt.s32.totalorder %v4298_v19, 0  ;;  %v4305_v3 = vmin.u32 %v3028_v48, %v7252_v20  ;;  %vm3077_vm10 = vcmp.gt.s32.totalorder %v3076_v44, 0  ;;  %v2436_v31 = vsel %vm2434_vm3, %v4599_v29, %v2435_v26 }
 0x39b   : > { %v2439_v28 = vsel %vm2437_vm8, %v2438_v41, %v4601_v40  ;;  %v2646_v22 = vxor.u32 2147483648, %v4603_v46  ;;  %v2917_v12 = vsel %vm2915_vm6, %v2916_v49, %v7243_v5  ;;  %v2643_v0 = vxor.u32 2147483648, %v4605_v11  ;;  %v8842_v41 = vld [vmem:[#allocation12_spill] sm:$0xff] }
 0x39c   : > { %v2527_v18 = vsel %vm2444_vm2, %v2526_v55, %v2525_v39  ;;  %v2726_v16 = vsub.s32 4294967266, %v2721_v17  ;;  %v2913_v30 = vmul.u32 %v7235_v37, %v2897_v42  ;;  %vm2433_vm14 = vcmp.lt.s32.totalorder %v2432_v32, 2 }
 0x39d   : > { %vm2642_vm12 = vcmp.eq.s32.totalorder %v2640_v33, 0  ;;  %v7288_v34 = vsel %vm4299_vm7, 0, %v4298_v19  ;;  %v3078_v24 = vsel %vm3077_vm10, %v3076_v44, 0  ;;  %vm2638_vm15 = vweird.f32 %v6661_v4  ;;  %v2238_v19 = vpop.f32.mrf.mxu0 }
 0x39e   : > { %vm2645_vm9 = vcmp.eq.s32.totalorder %v2640_v33, 2  ;;  %v2531_v5 = vsel %vm7270_vm5, 0, %v2529_v63  ;;  %v3030_v29 = vclz %v4305_v3  ;;  %v7295_v40 = vadd.s32 %v2917_v12, %v2913_v30  ;;  %v7311_v63 = vpop.permute.xlu0 %4009 }
 0x39f   : > { %v2440_v39 = vsel %vm2433_vm14, %v2436_v31, %v2439_v28  ;;  %v2647_v36 = vsel %vm2645_vm9, %v2646_v22, %v4605_v11  ;;  %v2530_v37 = vsel %vm7270_vm5, %v8838_v61, %v2527_v18  ;;  %v2722_v32 = vsub.s32 32, %v2721_v17  ;;  %8844 = vst [vmem:[#allocation17_spill] sm:$0xff] %v7311_v63 }
 0x3a0   : > { %v2644_v48 = vsel %vm2642_vm12, %v4603_v46, %v2643_v0  ;;  %v2727_v54 = vadd.s32 127, %v2726_v16  ;;  %v2830_v6 = vsub.s32 4294967266, %v7288_v34  ;;  %v3080_v44 = vand.u32 31, %v3078_v24 }
 0x3a1   : > { %vm2641_vm11 = vcmp.lt.s32.totalorder %v2640_v33, 2  ;;  %v2535_v26 = vadd.s32 3, %v2531_v5  ;;  %vm2652_vm13 = vcmp.lt.s32.totalorder %v8842_v41, 0  ;;  %v2706_v49 = vadd.s32 %v6970_v8, %v6995_v43 }
 0x3a2   : > { %v2441_v56 = vsel %vm2430_vm4, nan, %v2440_v39  ;;  %v4306_v55 = vadd.s32 4294967294, %v3030_v29  ;;  %v2919_v9 = vadd.s32 536870912, %v7295_v40  ;;  %v7308_v11 = vadd.f32 %v2238_v19, %v7290_v13 }
 0x3a3   : > { %v2648_v46 = vsel %vm2641_vm11, %v2644_v48, %v2647_v36  ;;  %4606 = vcosq.f32 %v2530_v37  ;;  %v2724_v42 = vshrl.u32 %v2706_v49, %v2722_v32  ;;  %v2736_v33 = vsub.s32 4, %v7114_v21 }
 0x3a4   : > { %8843 = vst [vmem:[#allocation16_spill] sm:$0xff] %v7308_v11  ;;  %v2728_v3 = vshll.u32 %v2727_v54, 23  ;;  %v2826_v31 = vsub.s32 32, %v7288_v34  ;;  %v2831_v8 = vadd.s32 127, %v2830_v6  ;;  %v7314_v43 = vsub.s32 32, %v3080_v44 }
 0x3a5   : > { %v7317_v53 = vmul.f32 %v7311_v63, %v2441_v56  ;;  %4608 = vsinq.f32 %v2530_v37  ;;  %v7319_v28 = vand.u32 3, %v2535_v26  ;;  %v2723_v22 = vshll.u32 %v7162_v45, %v2721_v17 }
 0x3a6   : > { %v2810_v12 = vadd.s32 %v7031_v23, %v7052_v52  ;;  %vm4307_vm0 = vcmp.lt.s32.totalorder %v4306_v55, 0  ;;  %v7324_v0 = vshrl.u32 %v2919_v9, 30  ;;  %v3173_v18 = vand.u32 2139095040, %v7308_v11 }
 0x3a7   : > { %v7329_v16 = vsel %vm2638_vm15, nan, %v2648_v46  ;;  %v7331_v30 = vor.u32 %v2724_v42, %v2723_v22  ;;  %v7336_v5 = vsel %vm2652_vm13, %v2736_v33, %v7114_v21  ;;  %v2840_v45 = vsub.s32 4, %v7138_v59 }
 0x3a8   : > { %v2729_v17 = vor.u32 4788187, %v2728_v3  ;;  %v2828_v23 = vshrl.u32 %v2810_v12, %v2826_v31  ;;  %v2832_v52 = vshll.u32 %v2831_v8, 23  ;;  %v3093_v29 = vshrl.u32 %v8764_v62, %v7314_v43 }
 0x3a9   : > { %v2827_v4 = vshll.u32 %v7186_v10, %v7288_v34  ;;  %v7343_v39 = vsel %vm4307_vm0, 0, %v4306_v55  ;;  %v8715_v36 = vand.u32 2147483647, %v7198_v14  ;;  %v3096_v37 = vshrl.u32 %v8775_v7, %v7314_v43 }
 0x3aa   : > { %v2921_v21 = vshll.u32 %v7324_v0, 30  ;;  %v7349_v32 = vshrl.u32 %v3078_v24, 5  ;;  %v3092_v19 = vshll.u32 %v8773_v47, %v3080_v44  ;;  %v3174_v48 = vshrl.u32 %v3173_v18, 23  ;;  %v8848_v18 = vld [vmem:[#allocation21_spill] sm:$0xff] }
 0x3ab   : > { %v3084_v54 = vshrl.u32 %v8772_v58, %v7314_v43  ;;  %v3087_v10 = vshrl.u32 %v8771_v35, %v7314_v43  ;;  %v3090_v34 = vshrl.u32 %v8773_v47, %v7314_v43  ;;  %v3095_v6 = vshll.u32 %v8764_v62, %v3080_v44 }
 0x3ac   : > { %v8845_v26 = vand.u32 2147483647, %v8842_v41  ;;  %v2829_v24 = vor.u32 %v2828_v23, %v2827_v4  ;;  %v2833_v56 = vor.u32 4788187, %v2832_v52  ;;  %v3038_v55 = vsub.s32 4294967266, %v7343_v39 }
 0x3ad   : > { %v3094_v9 = vor.u32 %v3093_v29, %v3092_v19  ;;  %v3083_v46 = vshll.u32 %v8774_v51, %v3080_v44  ;;  %v3086_v42 = vshll.u32 %v8772_v58, %v3080_v44  ;;  %v3089_v33 = vshll.u32 %v8771_v35, %v3080_v44 }
 0x3ae   : > { %vm7361_vm1 = vcmp.le.f32.partialorder %v8845_v26, 0.7853982  ;;  %v3097_v3 = vor.u32 %v3096_v37, %v3095_v6  ;;  %v2730_v31 = vand.u32 2147483647, %v2729_v17  ;;  %v7370_v8 = vsub.s32 %v7295_v40, %v2921_v21  ;;  %v2327_v21 = vpop.f32.mrf.mxu1 }
 0x3af   : > { %v3073_v22 = vand.u32 8388607, %v8715_v36  ;;  %v4312_v12 = vadd.s32 4294967169, %v3174_v48  ;;  %vm2756_vm2 = vcmp.lt.s32.totalorder %v8848_v18, 0  ;;  %v7375_v23 = vor.u32 %v3084_v54, %v3083_v46 }
 0x3b0   : > { %v7377_v52 = vor.u32 %v3087_v10, %v3086_v42  ;;  %v3091_v29 = vor.u32 %v3090_v34, %v3089_v33  ;;  %vm3101_vm3 = vcmp.lt.s32.totalorder %v7349_v32, 4  ;;  %v7380_v4 = vpop.eup %4606  ;;  %v2732_v44 = vcvt.s32.f32 %v7331_v30 }
 0x3b1   : > { %v2834_v17 = vand.u32 2147483647, %v2833_v56  ;;  %v3039_v40 = vadd.s32 127, %v3038_v55  ;;  %v3107_v37 = vsel %vm3101_vm3, %v3094_v9, 920167782  ;;  %v2836_v19 = vcvt.s32.f32 %v2829_v24 }
 0x3b2   : > { %v3018_v48 = vadd.s32 %v7107_v50, %v7112_v15  ;;  %v3034_v54 = vsub.s32 32, %v7343_v39  ;;  %v3111_v10 = vsel %vm3101_vm3, %v3097_v3, 1326507024  ;;  %v7390_v34 = vpop.eup %4608  ;;  %v8849_v6 = vand.u32 2147483647, %v8848_v18 }
 0x3b3   : > { %v2924_v26 = vsub.s32 0, %v7370_v8  ;;  %vm3098_vm6 = vcmp.lt.s32.totalorder %v7349_v32, 1  ;;  %vm3100_vm4 = vcmp.lt.s32.totalorder %v7349_v32, 3  ;;  %v3180_v50 = vadd.s32 1, %v4312_v12 }
 0x3b4   : > { %vm7394_vm5 = vcmp.le.f32.partialorder %v8849_v6, 0.7853982  ;;  %v3074_v15 = vor.u32 8388608, %v3073_v22  ;;  %v3106_v24 = vsel %vm3098_vm6, %v7375_v23, %v7377_v52  ;;  %v3108_v56 = vsel %vm3100_vm4, %v3091_v29, %v3107_v37 }
 0x3b5   : > { %v7408_v55 = vadd.f32 %v2327_v21, %v7290_v13  ;;  %v2837_v46 = vmul.f32 %v2836_v19, %v2834_v17  ;;  %v3040_v42 = vshll.u32 %v3039_v40, 23  ;;  %v3110_v33 = vsel %vm3098_vm6, %v7377_v52, %v3091_v29 }
 0x3b6   : > { %v3112_v3 = vsel %vm3100_vm4, %v3094_v9, %v3111_v10  ;;  %v7417_v22 = vmul.f32 %v7311_v63, %v7329_v16  ;;  %vm2541_vm8 = vcmp.eq.s32.totalorder %v7319_v28, 2  ;;  %v2733_v12 = vmul.f32 %v2732_v44, %v2730_v31 }
 0x3b7   : > { %8852 = vst [vmem:[#allocation14_spill] sm:$0xff] %v7408_v55  ;;  %v2739_v37 = vsel %vm7361_vm1, 0, %v7336_v5  ;;  %vm3099_vm7 = vcmp.lt.s32.totalorder %v7349_v32, 2  ;;  %v3036_v17 = vshrl.u32 %v3018_v48, %v3034_v54  ;;  %v4301_v40 = vmin.u32 %v2924_v26, %v7370_v8 }
 0x3b8   : > { %8853 = vst [vmem:[#allocation9_spill] sm:$0xff] %v7417_v22  ;;  %v3109_v21 = vsel %vm3099_vm7, %v3106_v24, %v3108_v56  ;;  %vm3181_vm10 = vcmp.gt.s32.totalorder %v3180_v50, 0  ;;  %vm2538_vm14 = vcmp.eq.s32.totalorder %v7319_v28, 0  ;;  %v2542_v16 = vxor.u32 2147483648, %v7380_v4 }
 0x3b9   : > { %v3113_v9 = vsel %vm3099_vm7, %v3110_v33, %v3112_v3  ;;  %v7431_v31 = vshll.u32 %v3074_v15, 8  ;;  %v3381_v5 = vand.u32 2139095040, %v7408_v55  ;;  %v2838_v44 = vxor.u32 2147483648, %v2837_v46 }
 0x3ba   : > { %v2841_v19 = vsel %vm2756_vm2, %v2840_v45, %v7138_v59  ;;  %v3035_v48 = vshll.u32 %v7252_v20, %v7343_v39  ;;  %v3041_v54 = vor.u32 4788187, %v3040_v42  ;;  %v2734_v10 = vxor.u32 2147483648, %v2733_v12 }
 0x3bb   : > { %v7442_v6 = vmul.u32.u64.low %v7431_v31, %v3109_v21  ;;  %v7443_v26 = vmul.u32.u64.high %v7431_v31, %v3109_v21, %v7442_v6  ;;  %v3182_v15 = vsel %vm3181_vm10, %v3180_v50, 0  ;;  %vm2537_vm12 = vcmp.lt.s32.totalorder %v7319_v28, 2 }
 0x3bc   : > { %v3037_v24 = vor.u32 %v3036_v17, %v3035_v48  ;;  %v2926_v56 = vclz %v4301_v40  ;;  %v7448_v33 = vmul.u32.u64.low %v7431_v31, %v3113_v9  ;;  %v7449_v3 = vmul.u32.u64.high %v7431_v31, %v3113_v9, %v7448_v33 }
 0x3bd   : > { %8854 = vst [vmem:[#allocation8_spill] sm:$0xff] %v7442_v6  ;;  %v2539_v59 = vxor.u32 2147483648, %v7390_v34  ;;  %v2743_v45 = vadd.s32 3, %v2739_v37  ;;  %v2843_v20 = vsel %vm7394_vm5, 0, %v2841_v19  ;;  %v3382_v39 = vshrl.u32 %v3381_v5, 23 }
 0x3be   : > { %v2839_v42 = vsel %vm2756_vm2, %v2838_v44, %v2837_v46  ;;  %v3042_v21 = vand.u32 2147483647, %v3041_v54  ;;  %v3103_v50 = vsel %vm3101_vm3, %v3091_v29, 2102212464  ;;  %v3184_v17 = vand.u32 31, %v3182_v15 }
 0x3bf   : > { %v2735_v40 = vsel %vm2652_vm13, %v2734_v10, %v2733_v12  ;;  %vm2964_vm15 = vcmp.lt.s32.totalorder %v6885_v60, 0  ;;  %v3048_v9 = vsub.s32 4, %v7215_v2  ;;  %v3082_v37 = vshrl.u32 %v8774_v51, %v7314_v43 }
 0x3c0   : > { %v2543_v5 = vsel %vm2541_vm8, %v2542_v16, %v7390_v34  ;;  %v2847_v46 = vadd.s32 3, %v2843_v20  ;;  %v3044_v44 = vcvt.s32.f32 %v3037_v24  ;;  %v4302_v19 = vadd.s32 4294967294, %v2926_v56 }
 0x3c1   : > { %v2842_v29 = vsel %vm7394_vm5, %v8848_v18, %v2839_v42  ;;  %v3102_v12 = vsel %vm3098_vm6, %v3082_v37, %v7375_v23  ;;  %v3104_v48 = vsel %vm3100_vm4, %v7377_v52, %v3103_v50  ;;  %v4320_v43 = vadd.s32 4294967169, %v3382_v39 }
 0x3c2   : > { %v2540_v34 = vsel %vm2538_vm14, %v7380_v4, %v2539_v59  ;;  %v7482_v16 = vsel %vm7361_vm1, %v8842_v41, %v2735_v40  ;;  %v3045_v30 = vmul.f32 %v3044_v44, %v3042_v21  ;;  %v7484_v54 = vsub.s32 32, %v3184_v17 }
 0x3c3   : > { %v7486_v10 = vand.u32 3, %v2743_v45  ;;  %vm7490_vm9 = vcmp.le.f32.partialorder %v2962_v27, 0.7853982  ;;  %v3049_v52 = vsel %vm2964_vm15, %v3048_v9, %v7215_v2  ;;  %v3124_v4 = vadd.s32 1, %v7443_v26  ;;  %v2240_v2 = vpop.f32.mrf.mxu0 }
 0x3c4   : > { %4610 = vcosq.f32 %v2842_v29  ;;  %vm4303_vm11 = vcmp.lt.s32.totalorder %v4302_v19, 0  ;;  %v3105_v49 = vsel %vm3099_vm7, %v3102_v12, %v3104_v48  ;;  %vm3123_vm13 = vc.u32 %v7449_v3, %v7442_v6 }
 0x3c5   : > { %8855 = vst [vmem:[#allocation11_spill] sm:$0xff] %v7486_v10  ;;  %v7504_v27 = vsel %vm2537_vm12, %v2540_v34, %v2543_v5  ;;  %4612 = vcosq.f32 %v7482_v16  ;;  %v7507_v24 = vand.u32 3, %v2847_v46  ;;  %v3388_v56 = vadd.s32 1, %v4320_v43 }
 0x3c6   : > { %v3046_v33 = vxor.u32 2147483648, %v3045_v30  ;;  %v3051_v59 = vsel %vm7490_vm9, 0, %v3049_v52  ;;  %v8714_v32 = vand.u32 2147483647, %v7308_v11  ;;  %v3197_v45 = vshrl.u32 %v8764_v62, %v7484_v54 }
 0x3c7   : > { %v7514_v20 = vsel %vm4303_vm11, 0, %v4302_v19  ;;  %v3121_v28 = vmul.u32 %v7431_v31, %v3105_v49  ;;  %v3125_v39 = vsel %vm3123_vm13, %v3124_v4, %v7443_v26  ;;  %v3200_v42 = vshrl.u32 %v8775_v7, %v7484_v54 }
 0x3c8   : > { %v7520_v21 = vshrl.u32 %v3182_v15, 5  ;;  %v3188_v50 = vshrl.u32 %v8772_v58, %v7484_v54  ;;  %v3196_v40 = vshll.u32 %v8773_v47, %v3184_v17  ;;  %v7526_v9 = vadd.f32 %v2240_v2, %v7290_v13 }
 0x3c9   : > { %v3191_v37 = vshrl.u32 %v8771_v35, %v7484_v54  ;;  %v3194_v31 = vshrl.u32 %v8773_v47, %v7484_v54  ;;  %v3199_v26 = vshll.u32 %v8764_v62, %v3184_v17  ;;  %vm3389_vm0 = vcmp.gt.s32.totalorder %v3388_v56, 0 }
 0x3ca   : > { %v2934_v15 = vsub.s32 4294967266, %v7514_v20  ;;  %v7534_v5 = vadd.s32 %v3125_v39, %v3121_v28  ;;  %v3177_v46 = vand.u32 8388607, %v8714_v32  ;;  %v3198_v44 = vor.u32 %v3197_v45, %v3196_v40 }
 0x3cb   : > { %v3187_v19 = vshll.u32 %v8774_v51, %v3184_v17  ;;  %v3190_v12 = vshll.u32 %v8772_v58, %v3184_v17  ;;  %v3193_v48 = vshll.u32 %v8771_v35, %v3184_v17  ;;  %v3201_v43 = vor.u32 %v3200_v42, %v3199_v26 }
 0x3cc   : > { %v3047_v34 = vsel %vm2964_vm15, %v3046_v33, %v3045_v30  ;;  %v2930_v52 = vsub.s32 32, %v7514_v20  ;;  %v3390_v4 = vsel %vm3389_vm0, %v3388_v56, 0  ;;  %v3277_v49 = vand.u32 2139095040, %v7526_v9 }
 0x3cd   : > { %v7545_v2 = vor.u32 %v3188_v50, %v3187_v19  ;;  %v7547_v28 = vor.u32 %v3191_v37, %v3190_v12  ;;  %v3195_v45 = vor.u32 %v3194_v31, %v3193_v48  ;;  %vm3205_vm1 = vcmp.lt.s32.totalorder %v7520_v21, 4  ;;  %v2329_v12 = vpop.f32.mrf.mxu1 }
 0x3ce   : > { %4614 = vsinq.f32 %v2842_v29  ;;  %v2935_v39 = vadd.s32 127, %v2934_v15  ;;  %v3127_v17 = vadd.s32 536870912, %v7534_v5  ;;  %v3211_v42 = vsel %vm3205_vm1, %v3198_v44, 920167782 }
 0x3cf   : > { %v7553_v30 = vadd.s32 3, %v3051_v59  ;;  %v2914_v56 = vadd.s32 %v7242_v25, %v7248_v57  ;;  %v3215_v33 = vsel %vm3205_vm1, %v3201_v43, 1326507024  ;;  %v3392_v50 = vand.u32 31, %v3390_v4 }
 0x3d0   : > { %v3050_v40 = vsel %vm7490_vm9, %v6885_v60, %v3047_v34  ;;  %vm3202_vm2 = vcmp.lt.s32.totalorder %v7520_v21, 1  ;;  %vm3204_vm3 = vcmp.lt.s32.totalorder %v7520_v21, 3  ;;  %v3278_v29 = vshrl.u32 %v3277_v49, 23 }
 0x3d1   : > { %v7564_v37 = vpop.eup %4610  ;;  %v2932_v59 = vshrl.u32 %v2914_v56, %v2930_v52  ;;  %v3178_v31 = vor.u32 8388608, %v3177_v46  ;;  %v3210_v25 = vsel %vm3202_vm2, %v7545_v2, %v7547_v28  ;;  %v3212_v57 = vsel %vm3204_vm3, %v3195_v45, %v3211_v42 }
 0x3d2   : > { %v7572_v26 = vpop.eup %4612  ;;  %v2936_v23 = vshll.u32 %v2935_v39, 23  ;;  %v7574_v15 = vshrl.u32 %v3127_v17, 30  ;;  %v3214_v19 = vsel %vm3202_vm2, %v7547_v28, %v3195_v45  ;;  %v3216_v46 = vsel %vm3204_vm3, %v3198_v44, %v3215_v33 }
 0x3d3   : > { %8858 = vst [vmem:[#allocation13_spill] sm:$0xff] %v7572_v26  ;;  %4616 = vcosq.f32 %v3050_v40  ;;  %vm3203_vm5 = vcmp.lt.s32.totalorder %v7520_v21, 2  ;;  %v7582_v48 = vsub.s32 32, %v3392_v50  ;;  %v4316_v43 = vadd.s32 4294967169, %v3278_v29 }
 0x3d4   : > { %4618 = vsinq.f32 %v3050_v40  ;;  %v2931_v52 = vshll.u32 %v7370_v8, %v7514_v20  ;;  %v3213_v49 = vsel %vm3203_vm5, %v3210_v25, %v3212_v57  ;;  %v3217_v39 = vsel %vm3203_vm5, %v3214_v19, %v3216_v46 }
 0x3d5   : > { %v7591_v44 = vshll.u32 %v3178_v31, 8  ;;  %v3284_v17 = vadd.s32 1, %v4316_v43  ;;  %v7594_v42 = vadd.f32 %v2329_v12, %v7290_v13  ;;  %v7598_v33 = vor.u32 4788187, %v2936_v23 }
 0x3d6   : > { %v7596_v56 = vor.u32 %v2932_v59, %v2931_v52  ;;  %v3129_v40 = vshll.u32 %v7574_v15, 30  ;;  %v8718_v8 = vand.u32 2147483647, %v7408_v55  ;;  %v3405_v31 = vshrl.u32 %v8764_v62, %v7582_v48 }
 0x3d7   : > { %8859 = vst [vmem:[#allocation10_spill] sm:$0xff] %v7594_v42  ;;  %v7603_v20 = vmul.u32.u64.low %v7591_v44, %v3213_v49  ;;  %v7604_v29 = vmul.u32.u64.high %v7591_v44, %v3213_v49, %v7603_v20  ;;  %vm3285_vm6 = vcmp.gt.s32.totalorder %v3284_v17, 0  ;;  %v3186_v13 = vshrl.u32 %v8774_v51, %v7484_v54 }
 0x3d8   : > { %v7612_v59 = vmul.u32.u64.low %v7591_v44, %v3217_v39  ;;  %v7613_v25 = vmul.u32.u64.high %v7591_v44, %v3217_v39, %v7612_v59  ;;  %v3286_v57 = vsel %vm3285_vm6, %v3284_v17, 0  ;;  %v3207_v23 = vsel %vm3205_vm1, %v3195_v45, 2102212464 }
 0x3d9   : > { %v3396_v19 = vshrl.u32 %v8772_v58, %v7582_v48  ;;  %v3399_v46 = vshrl.u32 %v8771_v35, %v7582_v48  ;;  %v3404_v12 = vshll.u32 %v8773_v47, %v3392_v50  ;;  %v7623_v43 = vsub.s32 %v7534_v5, %v3129_v40 }
 0x3da   : > { %v7625_v54 = vshrl.u32 %v3390_v4, 5  ;;  %v3402_v52 = vshrl.u32 %v8773_v47, %v7582_v48  ;;  %v3288_v49 = vand.u32 31, %v3286_v57  ;;  %v3395_v45 = vshll.u32 %v8774_v51, %v3392_v50 }
 0x3db   : > { %v7629_v39 = vpop.eup %4614  ;;  %v3398_v17 = vshll.u32 %v8772_v58, %v3392_v50  ;;  %v3406_v59 = vor.u32 %v3405_v31, %v3404_v12  ;;  %v3408_v32 = vshrl.u32 %v8775_v7, %v7582_v48  ;;  %v3206_v5 = vsel %vm3202_vm2, %v3186_v13, %v7545_v2 }
 0x3dc   : > { %v3208_v4 = vsel %vm3204_vm3, %v7547_v28, %v3207_v23  ;;  %v3385_v40 = vand.u32 8388607, %v8718_v8  ;;  %v3401_v36 = vshll.u32 %v8771_v35, %v3392_v50  ;;  %v7644_v34 = vor.u32 %v3396_v19, %v3395_v45 }
 0x3dd   : > { %v7646_v1 = vor.u32 %v3399_v46, %v3398_v17  ;;  %v3407_v31 = vshll.u32 %v8764_v62, %v3392_v50  ;;  %v7649_v12 = vsub.s32 32, %v3288_v49  ;;  %v2938_v41 = vand.u32 2147483647, %v7598_v33 }
 0x3de   : > { %v2940_v2 = vcvt.s32.f32 %v7596_v56  ;;  %v7653_v13 = vor.u32 %v3402_v52, %v3401_v36  ;;  %vm3413_vm4 = vcmp.lt.s32.totalorder %v7625_v54, 4  ;;  %v3209_v23 = vsel %vm3203_vm5, %v3206_v5, %v3208_v4 }
 0x3df   : > { %v3409_v19 = vor.u32 %v3408_v32, %v3407_v31  ;;  %v3419_v46 = vsel %vm3413_vm4, %v3406_v59, 920167782  ;;  %vm3227_vm8 = vc.u32 %v7613_v25, %v7603_v20  ;;  %v3228_v56 = vadd.s32 1, %v7604_v29 }
 0x3e0   : > { %v7661_v50 = vpop.eup %4616  ;;  %vm3410_vm7 = vcmp.lt.s32.totalorder %v7625_v54, 1  ;;  %v3386_v52 = vor.u32 8388608, %v3385_v40  ;;  %vm3412_vm10 = vcmp.lt.s32.totalorder %v7625_v54, 3  ;;  %v3292_v21 = vshrl.u32 %v8772_v58, %v7649_v12 }
 0x3e1   : > { %v7668_v33 = vpop.eup %4618  ;;  %v3418_v32 = vsel %vm3410_vm7, %v7644_v34, %v7646_v1  ;;  %v3420_v45 = vsel %vm3412_vm10, %v7653_v13, %v3419_v46  ;;  %v7680_v17 = vshrl.u32 %v3286_v57, 5  ;;  %v3295_v5 = vshrl.u32 %v8771_v35, %v7649_v12 }
 0x3e2   : > { %v3298_v4 = vshrl.u32 %v8773_v47, %v7649_v12  ;;  %v3423_v40 = vsel %vm3413_vm4, %v3409_v19, 1326507024  ;;  %v3291_v31 = vshll.u32 %v8774_v51, %v3288_v49  ;;  %v3300_v8 = vshll.u32 %v8773_v47, %v3288_v49 }
 0x3e3   : > { %v3301_v28 = vshrl.u32 %v8764_v62, %v7649_v12  ;;  %v3294_v46 = vshll.u32 %v8772_v58, %v3288_v49  ;;  %v3297_v57 = vshll.u32 %v8771_v35, %v3288_v49  ;;  %v3303_v36 = vshll.u32 %v8764_v62, %v3288_v49 }
 0x3e4   : > { %v3304_v22 = vshrl.u32 %v8775_v7, %v7649_v12  ;;  %v8860_v10 = vand.u32 2147483647, %v7526_v9  ;;  %v7699_v19 = vor.u32 %v3292_v21, %v3291_v31  ;;  %v3485_v47 = vand.u32 2139095040, %v7594_v42 }
 0x3e5   : > { %v3302_v11 = vor.u32 %v3301_v28, %v3300_v8  ;;  %vm2850_vm14 = vcmp.eq.s32.totalorder %v7507_v24, 0  ;;  %vm2853_vm12 = vcmp.eq.s32.totalorder %v7507_v24, 2  ;;  %v7704_v58 = vor.u32 %v3295_v5, %v3294_v46 }
 0x3e6   : > { %v3281_v55 = vand.u32 8388607, %v8860_v10  ;;  %v3299_v35 = vor.u32 %v3298_v4, %v3297_v57  ;;  %v3305_v6 = vor.u32 %v3304_v22, %v3303_v36  ;;  %vm3309_vm15 = vcmp.lt.s32.totalorder %v7680_v17, 4 }
 0x3e7   : > { %vm3411_vm9 = vcmp.lt.s32.totalorder %v7625_v54, 2  ;;  %v3422_v10 = vsel %vm3410_vm7, %v7646_v1, %v7653_v13  ;;  %v3424_v8 = vsel %vm3412_vm10, %v3406_v59, %v3423_v40  ;;  %v3315_v49 = vsel %vm3309_vm15, %v3302_v11, 920167782 }
 0x3e8   : > { %v3225_v28 = vmul.u32 %v7591_v44, %v3209_v23  ;;  %v3229_v22 = vsel %vm3227_vm8, %v3228_v56, %v7604_v29  ;;  %v3421_v36 = vsel %vm3411_vm9, %v3418_v32, %v3420_v45  ;;  %v7723_v21 = vshll.u32 %v3386_v52, 8 }
 0x3e9   : > { %vm2534_vm11 = vweird.f32 %v8838_v61  ;;  %vm3306_vm13 = vcmp.lt.s32.totalorder %v7680_v17, 1  ;;  %vm3308_vm0 = vcmp.lt.s32.totalorder %v7680_v17, 3  ;;  %v3319_v59 = vsel %vm3309_vm15, %v3305_v6, 1326507024 }
 0x3ea   : > { %v3486_v44 = vshrl.u32 %v3485_v47, 23  ;;  %vm2860_vm1 = vcmp.lt.s32.totalorder %v6872_v38, 0  ;;  %v3425_v29 = vsel %vm3411_vm9, %v3422_v10, %v3424_v8  ;;  %v3282_v23 = vor.u32 8388608, %v3281_v55 }
 0x3eb   : > { %v3314_v56 = vsel %vm3306_vm13, %v7699_v19, %v7704_v58  ;;  %v3316_v52 = vsel %vm3308_vm0, %v3299_v35, %v3315_v49  ;;  %v2851_v32 = vxor.u32 2147483648, %v7629_v39  ;;  %v2941_v45 = vmul.f32 %v2940_v2, %v2938_v41 }
 0x3ec   : > { %v3318_v47 = vsel %vm3306_vm13, %v7704_v58, %v3299_v35  ;;  %v3320_v6 = vsel %vm3308_vm0, %v3302_v11, %v3319_v59  ;;  %v7745_v5 = vadd.s32 %v3229_v22, %v3225_v28  ;;  %vm3307_vm2 = vcmp.lt.s32.totalorder %v7680_v17, 2 }
 0x3ed   : > { %v7748_v55 = vmul.u32.u64.low %v7723_v21, %v3421_v36  ;;  %v7749_v4 = vmul.u32.u64.high %v7723_v21, %v3421_v36, %v7748_v55  ;;  %v8861_v40 = vand.u32 2147483647, %v6872_v38  ;;  %v3317_v11 = vsel %vm3307_vm2, %v3314_v56, %v3316_v52 }
 0x3ee   : > { %v7760_v2 = vmul.u32.u64.low %v7723_v21, %v3425_v29  ;;  %v7761_v31 = vmul.u32.u64.high %v7723_v21, %v3425_v29, %v7760_v2  ;;  %v4324_v46 = vadd.s32 4294967169, %v3486_v44  ;;  %v7766_v57 = vand.u32 3, %v7553_v30 }
 0x3ef   : > { %vm7755_vm3 = vcmp.le.f32.partialorder %v8861_v40, 0.7853982  ;;  %v8864_v10 = vsub.s32 0, %v7623_v43  ;;  %v3321_v49 = vsel %vm3307_vm2, %v3318_v47, %v3320_v6  ;;  %v7773_v28 = vshll.u32 %v3282_v23, 8  ;;  %v7818_v2 = vpop.permute.xlu1 %2144 }
 0x3f0   : > { %4620 = vsinq.f32 %v7482_v16  ;;  %vm2846_vm5 = vweird.f32 %v8848_v18  ;;  %v2852_v22 = vsel %vm2850_vm14, %v7564_v37, %v2851_v32  ;;  %v8865_v30 = vxor.u32 2147483648, %v7564_v37 }
 0x3f1   : > { %v4309_v8 = vmin.u32 %v8864_v10, %v7623_v43  ;;  %v2942_v59 = vxor.u32 2147483648, %v2941_v45  ;;  %v3231_v44 = vadd.s32 536870912, %v7745_v5  ;;  %v3415_v29 = vsel %vm3413_vm4, %v7653_v13, 2102212464 }
 0x3f2   : > { %v2855_v36 = vsel %vm2853_vm12, %v8865_v30, %v7629_v39  ;;  %v7790_v16 = vmul.u32.u64.low %v7773_v28, %v3317_v11  ;;  %v7791_v23 = vmul.u32.u64.high %v7773_v28, %v3317_v11, %v7790_v16  ;;  %v3394_v56 = vshrl.u32 %v8774_v51, %v7582_v48 }
 0x3f3   : > { %v7797_v37 = vmul.u32.u64.low %v7773_v28, %v3321_v49  ;;  %v7798_v52 = vmul.u32.u64.high %v7773_v28, %v3321_v49, %v7797_v37  ;;  %v3492_v39 = vadd.s32 1, %v4324_v46  ;;  %v2545_v32 = vsel %vm2534_vm11, nan, %v7504_v27 }
 0x3f4   : > { %vm2849_vm6 = vcmp.lt.s32.totalorder %v7507_v24, 2  ;;  %vm3058_vm4 = vcmp.eq.s32.totalorder %v7766_v57, 0  ;;  %v3134_v13 = vclz %v4309_v8  ;;  %v2943_v47 = vsel %vm2860_vm1, %v2942_v59, %v2941_v45 }
 0x3f5   : > { %v2944_v6 = vsub.s32 4, %v7324_v0  ;;  %v3414_v48 = vsel %vm3410_vm7, %v3394_v56, %v7644_v34  ;;  %v3416_v40 = vsel %vm3412_vm10, %v7646_v1, %v3415_v29  ;;  %v2856_v61 = vsel %vm2849_vm6, %v2852_v22, %v2855_v36 }
 0x3f6   : > { %vm3061_vm8 = vcmp.eq.s32.totalorder %v7766_v57, 2  ;;  %v3436_v27 = vadd.s32 1, %v7749_v4  ;;  %v3311_v24 = vsel %vm3309_vm15, %v3299_v35, 2102212464  ;;  %v7820_v45 = vshrl.u32 %v3231_v44, 30 }
 0x3f7   : > { %vm3435_vm14 = vc.u32 %v7761_v31, %v7748_v55  ;;  %v3290_v34 = vshrl.u32 %v8774_v51, %v7649_v12  ;;  %vm3493_vm7 = vcmp.gt.s32.totalorder %v3492_v39, 0  ;;  %v3062_v1 = vxor.u32 2147483648, %v7661_v50 }
 0x3f8   : > { %v2946_v11 = vsel %vm7755_vm3, %v6872_v38, %v2943_v47  ;;  %v4310_v46 = vadd.s32 4294967294, %v3134_v13  ;;  %v3417_v35 = vsel %vm3411_vm9, %v3414_v48, %v3416_v40  ;;  %v3059_v10 = vxor.u32 2147483648, %v7668_v33  ;;  %v2244_v47 = vpop.f32.mrf.mxu0 }
 0x3f9   : > { %v2945_v8 = vsel %vm2860_vm1, %v2944_v6, %v7324_v0  ;;  %v3310_v12 = vsel %vm3306_vm13, %v3290_v34, %v7699_v19  ;;  %v3312_v49 = vsel %vm3308_vm0, %v7704_v58, %v3311_v24  ;;  %v2857_v22 = vsel %vm2846_vm5, nan, %v2856_v61 }
 0x3fa   : > { %v3437_v54 = vsel %vm3435_vm14, %v3436_v27, %v7749_v4  ;;  %v3332_v30 = vadd.s32 1, %v7791_v23  ;;  %v3494_v36 = vsel %vm3493_vm7, %v3492_v39, 0  ;;  %4622 = vcosq.f32 %v2946_v11  ;;  %v7857_v4 = vpop.permute.xlu1 %4014 }
 0x3fb   : > { %v3233_v59 = vshll.u32 %v7820_v45, 30  ;;  %v3433_v0 = vmul.u32 %v7723_v21, %v3417_v35  ;;  %vm3331_vm10 = vc.u32 %v7798_v52, %v7790_v16  ;;  %v3063_v58 = vsel %vm3061_vm8, %v3062_v1, %v7668_v33  ;;  %8866 = vst [vmem:[#allocation15_spill] sm:$0xff] %v7857_v4  ;;  %v8875_v35 = vld [vmem:[#allocation8_spill] sm:$0xff] }
 0x3fc   : > { %v2947_v18 = vsel %vm7755_vm3, 0, %v2945_v8  ;;  %vm4311_vm12 = vcmp.lt.s32.totalorder %v4310_v46, 0  ;;  %v3313_v19 = vsel %vm3307_vm2, %v3310_v12, %v3312_v49  ;;  %v3060_v21 = vsel %vm3058_vm4, %v7661_v50, %v3059_v10 }
 0x3fd   : > { %v3152_v44 = vsub.s32 4, %v7574_v15  ;;  %v7863_v29 = vadd.s32 %v3437_v54, %v3433_v0  ;;  %v3496_v56 = vand.u32 31, %v3494_v36  ;;  %v7865_v37 = vpop.eup %4620  ;;  %v4031_v33 = vmul.f32 %v7857_v4, %v2857_v22 }
 0x3fe   : > { %8867 = vst [vmem:[#allocation20_spill] sm:$0xff] %v7865_v37  ;;  %vm3054_vm15 = vweird.f32 %v6885_v60  ;;  %vm3057_vm9 = vcmp.lt.s32.totalorder %v7766_v57, 2  ;;  %v3333_v17 = vsel %vm3331_vm10, %v3332_v30, %v7791_v23  ;;  %v2951_v41 = vadd.s32 3, %v2947_v18 }
 0x3ff   : > { %v7871_v39 = vsel %vm4311_vm12, 0, %v4310_v46  ;;  %v7874_v50 = vsub.s32 %v7745_v5, %v3233_v59  ;;  %v3329_v13 = vmul.u32 %v7773_v28, %v3313_v19  ;;  %v7878_v6 = vmul.f32 %v7311_v63, %v2545_v32 }
 0x400   : > { %v3064_v40 = vsel %vm3057_vm9, %v3060_v21, %v3063_v58  ;;  %vm3068_vm11 = vcmp.lt.s32.totalorder %v7198_v14, 0  ;;  %v3439_v23 = vadd.s32 536870912, %v7863_v29  ;;  %v7890_v61 = vsub.s32 32, %v3496_v56 }
 0x401   : > { %8868 = vst [vmem:[#allocation22_spill] sm:$0xff] %v7878_v6  ;;  %v7885_v57 = vsel %vm3068_vm11, %v3152_v44, %v7574_v15  ;;  %v7888_v5 = vadd.s32 %v3333_v17, %v3329_v13  ;;  %4624 = vsinq.f32 %v2946_v11  ;;  %v3142_v32 = vsub.s32 4294967266, %v7871_v39 }
 0x402   : > { %v7895_v27 = vadd.f32 %v2244_v47, %v7818_v2  ;;  %v7898_v24 = vadd.f32 %v4031_v33, %v7317_v53  ;;  %v7900_v34 = vand.u32 3, %v2951_v41  ;;  %v8871_v15 = vand.u32 2147483647, %v7198_v14 }
 0x403   : > { %v3236_v46 = vsub.s32 0, %v7874_v50  ;;  %v7911_v11 = vsel %vm3054_vm15, nan, %v3064_v40  ;;  %v3122_v10 = vadd.s32 %v8875_v35, %v7449_v3  ;;  %v3138_v53 = vsub.s32 32, %v7871_v39 }
 0x404   : > { %8869 = vst [vmem:[#allocation18_spill] sm:$0xff] %v7895_v27  ;;  %8870 = vst [vmem:[#allocation19_spill] sm:$0xff] %v7898_v24  ;;  %vm7904_vm13 = vcmp.le.f32.partialorder %v8871_v15, 0.7853982  ;;  %v7919_v12 = vshrl.u32 %v3439_v23, 30  ;;  %v3335_v49 = vadd.s32 536870912, %v7888_v5  ;;  %v3509_v60 = vshrl.u32 %v8764_v62, %v7890_v61 }
 0x405   : > { %8874 = vst [vmem:[#allocation21_spill] sm:$0xff] %v7911_v11  ;;  %v8729_v22 = vand.u32 2147483647, %v7594_v42  ;;  %v3139_v54 = vshll.u32 %v7623_v43, %v7871_v39  ;;  %v3143_v30 = vadd.s32 127, %v3142_v32  ;;  %v3512_v3 = vshrl.u32 %v8775_v7, %v7890_v61 }
 0x406   : > { %v3589_v59 = vand.u32 2139095040, %v7895_v27  ;;  %v4313_v0 = vmin.u32 %v3236_v46, %v7874_v50  ;;  %v7931_v58 = vshrl.u32 %v3494_v36, 5  ;;  %v8876_v18 = vmov 2475754826  }
 0x407   : > { %v3500_v19 = vshrl.u32 %v8876_v18, %v7890_v61  ;;  %v8877_v21 = vmov 2102212464   ;;  %v7936_v33 = vpop.eup %4622  ;;  %v8878_v17 = vmov 2131351028   ;;  %v3511_v39 = vshll.u32 %v8764_v62, %v3496_v56 }
 0x408   : > { %v3508_v44 = vshll.u32 %v8877_v21, %v3496_v56  ;;  %v3503_v43 = vshrl.u32 %v8878_v17, %v7890_v61  ;;  %v3506_v41 = vshrl.u32 %v8877_v21, %v7890_v61  ;;  %v3590_v13 = vshrl.u32 %v3589_v59, 23 }
 0x409   : > { %v3441_v47 = vshll.u32 %v7919_v12, 30  ;;  %v7944_v36 = vshrl.u32 %v3335_v49, 30  ;;  %v3489_v40 = vand.u32 8388607, %v8729_v22  ;;  %v3499_v32 = vshll.u32 %v8774_v51, %v3496_v56 }
 0x40a   : > { %v3510_v23 = vor.u32 %v3509_v60, %v3508_v44  ;;  %v3502_v15 = vshll.u32 %v8876_v18, %v3496_v56  ;;  %v3505_v46 = vshll.u32 %v8878_v17, %v3496_v56  ;;  %v3513_v35 = vor.u32 %v3512_v3, %v3511_v39  ;;  %v2333_v39 = vpop.f32.mrf.mxu1 }
 0x40b   : > { %v3140_v28 = vshrl.u32 %v3122_v10, %v3138_v53  ;;  %v7954_v59 = vadd.s32 %v7603_v20, %v7613_v25  ;;  %v4328_v49 = vadd.s32 4294967169, %v3590_v13  ;;  %v3501_v8 = vor.u32 %v3500_v19, %v3499_v32 }
 0x40c   : > { %v7956_v63 = vor.u32 %v3503_v43, %v3502_v15  ;;  %v3507_v22 = vor.u32 %v3506_v41, %v3505_v46  ;;  %vm3517_vm0 = vcmp.lt.s32.totalorder %v7931_v58, 4  ;;  %v3144_v60 = vshll.u32 %v3143_v30, 23 }
 0x40d   : > { %v3337_v44 = vshll.u32 %v7944_v36, 30  ;;  %v3523_v56 = vsel %vm3517_vm0, %v3510_v23, 920167782  ;;  %v3596_v3 = vadd.s32 1, %v4328_v49  ;;  %v3238_v10 = vclz %v4313_v0 }
 0x40e   : > { %v7963_v53 = vsub.s32 %v7863_v29, %v3441_v47  ;;  %v3490_v20 = vor.u32 8388608, %v3489_v40  ;;  %v3527_v25 = vsel %vm3517_vm0, %v3513_v35, 1326507024  ;;  %v7967_v19 = vpop.eup %4624  ;;  %vm3514_vm1 = vcmp.lt.s32.totalorder %v7931_v58, 1 }
 0x40f   : > { %vm3516_vm2 = vcmp.lt.s32.totalorder %v7931_v58, 3  ;;  %v8730_v30 = vand.u32 2147483647, %v7895_v27  ;;  %vm3597_vm3 = vcmp.gt.s32.totalorder %v3596_v3, 0  ;;  %v3522_v0 = vsel %vm3514_vm1, %v3501_v8, %v7956_v63 }
 0x410   : > { %v3524_v29 = vsel %vm3516_vm2, %v3507_v22, %v3523_v56  ;;  %v3598_v43 = vsel %vm3597_vm3, %v3596_v3, 0  ;;  %v7978_v41 = vadd.f32 %v2333_v39, %v7818_v2  ;;  %v7981_v13 = vsub.s32 %v7888_v5, %v3337_v44 }
 0x411   : > { %v3526_v47 = vsel %vm3514_vm1, %v7956_v63, %v3507_v22  ;;  %v3528_v40 = vsel %vm3516_vm2, %v3510_v23, %v3527_v25  ;;  %v3600_v32 = vand.u32 31, %v3598_v43  ;;  %v7989_v46 = vor.u32 %v3140_v28, %v3139_v54 }
 0x412   : > { %v7991_v35 = vor.u32 4788187, %v3144_v60  ;;  %vm3515_vm5 = vcmp.lt.s32.totalorder %v7931_v58, 2  ;;  %v7994_v49 = vadd.s32 4294967294, %v3238_v10  ;;  %v3593_v44 = vand.u32 8388607, %v8730_v30 }
 0x413   : > { %v3525_v5 = vsel %vm3515_vm5, %v3522_v0, %v3524_v29  ;;  %v3601_v56 = vsub.s32 32, %v3600_v32  ;;  %v3444_v23 = vsub.s32 0, %v7963_v53  ;;  %v3529_v3 = vsel %vm3515_vm5, %v3526_v47, %v3528_v40 }
 0x414   : > { %v8003_v28 = vshll.u32 %v3490_v20, 8  ;;  %v3797_v54 = vand.u32 2139095040, %v7978_v41  ;;  %v3340_v60 = vsub.s32 0, %v7981_v13  ;;  %v3498_v39 = vshrl.u32 %v8774_v51, %v7890_v61 }
 0x415   : > { %v3604_v10 = vshrl.u32 %v8876_v18, %v3601_v56  ;;  %v3607_v25 = vshrl.u32 %v8878_v17, %v3601_v56  ;;  %v3519_v0 = vsel %vm3517_vm0, %v3507_v22, 2102212464  ;;  %v3603_v20 = vshll.u32 %v8774_v51, %v3600_v32 }
 0x416   : > { %v8014_v29 = vmul.u32.u64.low %v8003_v28, %v3525_v5  ;;  %v8015_v30 = vmul.u32.u64.high %v8003_v28, %v3525_v5, %v8014_v29  ;;  %v8020_v47 = vmul.u32.u64.low %v8003_v28, %v3529_v3  ;;  %v8021_v40 = vmul.u32.u64.high %v8003_v28, %v3529_v3, %v8020_v47 }
 0x417   : > { %v3594_v15 = vor.u32 8388608, %v3593_v44  ;;  %v3606_v61 = vshll.u32 %v8876_v18, %v3600_v32  ;;  %v3599_v48 = vshrl.u32 %v3598_v43, 5  ;;  %v3605_v26 = vor.u32 %v3604_v10, %v3603_v20 }
 0x418   : > { %v3610_v37 = vshrl.u32 %v8877_v21, %v3601_v56  ;;  %v3798_v24 = vshrl.u32 %v3797_v54, 23  ;;  %v3609_v6 = vshll.u32 %v8878_v17, %v3600_v32  ;;  %v3612_v5 = vshll.u32 %v8877_v21, %v3600_v32 }
 0x419   : > { %v3608_v22 = vor.u32 %v3607_v25, %v3606_v61  ;;  %v3613_v42 = vshrl.u32 %v8764_v62, %v3601_v56  ;;  %v3146_v11 = vand.u32 2147483647, %v7991_v35  ;;  %vm4315_vm6 = vcmp.lt.s32.totalorder %v7994_v49, 0 }
 0x41a   : > { %v4321_v44 = vmin.u32 %v3444_v23, %v7963_v53  ;;  %v3518_v43 = vsel %vm3514_vm1, %v3498_v39, %v3501_v8  ;;  %v3611_v3 = vor.u32 %v3610_v37, %v3609_v6  ;;  %v3615_v54 = vshll.u32 %v8764_v62, %v3600_v32 }
 0x41b   : > { %v3614_v10 = vor.u32 %v3613_v42, %v3612_v5  ;;  %v3616_v25 = vshrl.u32 %v8775_v7, %v3601_v56  ;;  %v4317_v20 = vmin.u32 %v3340_v60, %v7981_v13  ;;  %v3520_v47 = vsel %vm3516_vm2, %v7956_v63, %v3519_v0  ;;  %v8879_v63 = vld [vmem:[#allocation16_spill] sm:$0xff] }
 0x41c   : > { %vm3618_vm4 = vcmp.lt.s32.totalorder %v3599_v48, 1  ;;  %v3634_v35 = vshll.u32 %v3594_v15, 8  ;;  %vm3621_vm8 = vcmp.lt.s32.totalorder %v3599_v48, 4  ;;  %v4336_v4 = vadd.s32 4294967169, %v3798_v24 }
 0x41d   : > { %v3617_v61 = vor.u32 %v3616_v25, %v3615_v54  ;;  %v3626_v23 = vsel %vm3618_vm4, %v3605_v26, %v3608_v22  ;;  %v3602_v37 = vshrl.u32 %v8774_v51, %v3601_v56  ;;  %vm3620_vm14 = vcmp.lt.s32.totalorder %v3599_v48, 3 }
 0x41e   : > { %v3623_v42 = vsel %vm3621_vm8, %v3611_v3, 2102212464  ;;  %v3627_v6 = vsel %vm3621_vm8, %v3614_v10, 920167782  ;;  %vm2957_vm7 = vcmp.eq.s32.totalorder %v7900_v34, 2  ;;  %vm3619_vm10 = vcmp.lt.s32.totalorder %v3599_v48, 2 }
 0x41f   : > { %v3628_v8 = vsel %vm3620_vm14, %v3611_v3, %v3627_v6  ;;  %v3630_v32 = vsel %vm3618_vm4, %v3608_v22, %v3611_v3  ;;  %v3631_v60 = vsel %vm3621_vm8, %v3617_v61, 1326507024  ;;  %vm2954_vm12 = vcmp.eq.s32.totalorder %v7900_v34, 0 }
 0x420   : > { %vm3172_vm15 = vcmp.lt.s32.totalorder %v8879_v63, 0  ;;  %vm3539_vm9 = vc.u32 %v8021_v40, %v8014_v29  ;;  %v3540_v24 = vadd.s32 1, %v8015_v30  ;;  %v3622_v15 = vsel %vm3618_vm4, %v3602_v37, %v3605_v26 }
 0x421   : > { %v3629_v56 = vsel %vm3619_vm10, %v3626_v23, %v3628_v8  ;;  %v3624_v39 = vsel %vm3620_vm14, %v3608_v22, %v3623_v42  ;;  %v3632_v0 = vsel %vm3620_vm14, %v3614_v10, %v3631_v60  ;;  %v3446_v3 = vclz %v4321_v44 }
 0x422   : > { %v8050_v5 = vmul.u32.u64.low %v3634_v35, %v3629_v56  ;;  %v8051_v54 = vmul.u32.u64.high %v3634_v35, %v3629_v56, %v8050_v5  ;;  %v3521_v25 = vsel %vm3515_vm5, %v3518_v43, %v3520_v47  ;;  %v3633_v61 = vsel %vm3619_vm10, %v3630_v32, %v3632_v0 }
 0x423   : > { %v3804_v6 = vadd.s32 1, %v4336_v4  ;;  %v3148_v27 = vcvt.s32.f32 %v7989_v46  ;;  %v3241_v26 = vsel %vm4315_vm6, 0, %v7994_v49  ;;  %v3342_v10 = vclz %v4317_v20 }
 0x424   : > { %v8061_v23 = vmul.u32.u64.low %v3634_v35, %v3633_v61  ;;  %v8062_v22 = vmul.u32.u64.high %v3634_v35, %v3633_v61, %v8061_v23  ;;  %v3541_v44 = vsel %vm3539_vm9, %v3540_v24, %v8015_v30  ;;  %v3625_v58 = vsel %vm3619_vm10, %v3622_v15, %v3624_v39 }
 0x425   : > { %vm3805_vm0 = vcmp.gt.s32.totalorder %v3804_v6, 0  ;;  %v3256_v4 = vsub.s32 4, %v7820_v45  ;;  %v3537_v46 = vmul.u32 %v8003_v28, %v3521_v25  ;;  %v3644_v43 = vadd.s32 1, %v8051_v54 }
 0x426   : > { %v3806_v47 = vsel %vm3805_vm0, %v3804_v6, 0  ;;  %v8072_v49 = vmul.f32 %v3148_v27, %v3146_v11  ;;  %v3242_v37 = vsub.s32 32, %v3241_v26  ;;  %v3246_v42 = vsub.s32 4294967266, %v3241_v26  ;;  %v2246_v6 = vpop.f32.mrf.mxu0 }
 0x427   : > { %v4322_v20 = vadd.s32 4294967294, %v3446_v3  ;;  %v8074_v8 = vadd.s32 %v3541_v44, %v3537_v46  ;;  %v3641_v32 = vmul.u32 %v3634_v35, %v3625_v58  ;;  %vm3643_vm1 = vc.u32 %v8062_v22, %v8050_v5 }
 0x428   : > { %v3808_v48 = vand.u32 31, %v3806_v47  ;;  %v8880_v30 = vxor.u32 2147483648, %v7936_v33  ;;  %v4318_v60 = vadd.s32 4294967294, %v3342_v10  ;;  %v3645_v27 = vsel %vm3643_vm1, %v3644_v43, %v8051_v54 }
 0x429   : > { %v8741_v11 = vand.u32 2147483647, %v7978_v41  ;;  %v8881_v24 = vxor.u32 2147483648, %v7967_v19  ;;  %v8097_v15 = vsel %vm3172_vm15, %v3256_v4, %v7820_v45  ;;  %v3646_v56 = vadd.s32 %v3645_v27, %v3641_v32 }
 0x42a   : > { %v8083_v28 = vsel %vm2957_vm7, %v8880_v30, %v7967_v19  ;;  %v3809_v39 = vsub.s32 32, %v3808_v48  ;;  %v3243_v54 = vshll.u32 %v7874_v50, %v3241_v26  ;;  %v3244_v3 = vshrl.u32 %v7954_v59, %v3242_v37 }
 0x42b   : > { %v8092_v35 = vsel %vm2954_vm12, %v7936_v33, %v8881_v24  ;;  %v3247_v25 = vadd.s32 127, %v3246_v42  ;;  %vm4323_vm2 = vcmp.lt.s32.totalorder %v4322_v20, 0  ;;  %v3543_v19 = vadd.s32 536870912, %v8074_v8 }
 0x42c   : > { %v3647_v61 = vadd.s32 536870912, %v3646_v56  ;;  %v3812_v33 = vshrl.u32 %v8876_v18, %v3809_v39  ;;  %vm4319_vm3 = vcmp.lt.s32.totalorder %v4318_v60, 0  ;;  %v3801_v45 = vand.u32 8388607, %v8741_v11 }
 0x42d   : > { %v3815_v23 = vshrl.u32 %v8878_v17, %v3809_v39  ;;  %v3818_v10 = vshrl.u32 %v8877_v21, %v3809_v39  ;;  %v3811_v50 = vshll.u32 %v8774_v51, %v3808_v48  ;;  %v3814_v59 = vshll.u32 %v8876_v18, %v3808_v48 }
 0x42e   : > { %v8108_v44 = vshrl.u32 %v3647_v61, 30  ;;  %v3821_v26 = vshrl.u32 %v8764_v62, %v3809_v39  ;;  %v3807_v58 = vshrl.u32 %v3806_v47, 5  ;;  %v3817_v4 = vshll.u32 %v8878_v17, %v3808_v48 }
 0x42f   : > { %v3820_v46 = vshll.u32 %v8877_v21, %v3808_v48  ;;  %v8116_v43 = vadd.f32 %v2246_v6, %v7818_v2  ;;  %v8118_v37 = vor.u32 %v3244_v3, %v3243_v54  ;;  %v8120_v42 = vshrl.u32 %v3543_v19, 30 }
 0x430   : > { %8882 = vst [vmem:[#allocation8_spill] sm:$0xff] %v8108_v44  ;;  %v3813_v32 = vor.u32 %v3812_v33, %v3811_v50  ;;  %v3816_v30 = vor.u32 %v3815_v23, %v3814_v59  ;;  %v3819_v27 = vor.u32 %v3818_v10, %v3817_v4  ;;  %v3823_v61 = vshll.u32 %v8764_v62, %v3808_v48 }
 0x431   : > { %8883 = vst [vmem:[#allocation16_spill] sm:$0xff] %v8120_v42  ;;  %v3822_v24 = vor.u32 %v3821_v26, %v3820_v46  ;;  %v3824_v11 = vshrl.u32 %v8775_v7, %v3809_v39  ;;  %vm2953_vm5 = vcmp.lt.s32.totalorder %v7900_v34, 2  ;;  %v3248_v47 = vshll.u32 %v3247_v25, 23 }
 0x432   : > { %v8126_v0 = vsel %vm4323_vm2, 0, %v4322_v20  ;;  %v8129_v6 = vsel %vm4319_vm3, 0, %v4318_v60  ;;  %v3649_v54 = vshll.u32 %v8108_v44, 30  ;;  %v8884_v3 = vand.u32 2147483647, %v8879_v63 }
 0x433   : > { %v3802_v48 = vor.u32 8388608, %v3801_v45  ;;  %v3825_v33 = vor.u32 %v3824_v11, %v3823_v61  ;;  %vm3826_vm4 = vcmp.lt.s32.totalorder %v3807_v58, 1  ;;  %v3693_v23 = vand.u32 2139095040, %v8116_v43 }
 0x434   : > { %vm8134_vm6 = vcmp.le.f32.partialorder %v8884_v3, 0.7853982  ;;  %v3545_v25 = vshll.u32 %v8120_v42, 30  ;;  %vm3828_vm8 = vcmp.lt.s32.totalorder %v3807_v58, 3  ;;  %vm3829_vm14 = vcmp.lt.s32.totalorder %v3807_v58, 4 }
 0x435   : > { %v3834_v20 = vsel %vm3826_vm4, %v3813_v32, %v3816_v30  ;;  %v3810_v60 = vshrl.u32 %v8774_v51, %v3809_v39  ;;  %v3831_v10 = vsel %vm3829_vm14, %v3819_v27, 2102212464  ;;  %v3835_v50 = vsel %vm3829_vm14, %v3822_v24, 920167782 }
 0x436   : > { %v3839_v59 = vsel %vm3829_vm14, %v3825_v33, 1326507024  ;;  %v8142_v26 = vsub.s32 %v3646_v56, %v3649_v54  ;;  %vm3827_vm7 = vcmp.lt.s32.totalorder %v3807_v58, 2  ;;  %v3836_v45 = vsel %vm3828_vm8, %v3819_v27, %v3835_v50 }
 0x437   : > { %v3838_v11 = vsel %vm3826_vm4, %v3816_v30, %v3819_v27  ;;  %vm2950_vm10 = vweird.f32 %v6872_v38  ;;  %v3837_v4 = vsel %vm3827_vm7, %v3834_v20, %v3836_v45  ;;  %v3840_v46 = vsel %vm3828_vm8, %v3822_v24, %v3839_v59 }
 0x438   : > { %v3842_v61 = vshll.u32 %v3802_v48, 8  ;;  %v3694_v3 = vshrl.u32 %v3693_v23, 23  ;;  %v3249_v42 = vor.u32 4788187, %v3248_v47  ;;  %v3454_v39 = vsub.s32 4294967266, %v8126_v0 }
 0x439   : > { %v3830_v33 = vsel %vm3826_vm4, %v3810_v60, %v3813_v32  ;;  %v3832_v56 = vsel %vm3828_vm8, %v3816_v30, %v3831_v10  ;;  %v3841_v54 = vsel %vm3827_vm7, %v3838_v11, %v3840_v46  ;;  %v3350_v20 = vsub.s32 4294967266, %v8129_v6 }
 0x43a   : > { %v8153_v50 = vmul.u32.u64.low %v3842_v61, %v3837_v4  ;;  %v8154_v44 = vmul.u32.u64.high %v3842_v61, %v3837_v4, %v8153_v50  ;;  %v4332_v27 = vadd.s32 4294967169, %v3694_v3  ;;  %v3652_v24 = vsub.s32 0, %v8142_v26 }
 0x43b   : > { %v8159_v48 = vmul.u32.u64.low %v3842_v61, %v3841_v54  ;;  %v8160_v23 = vmul.u32.u64.high %v3842_v61, %v3841_v54, %v8159_v48  ;;  %v2960_v32 = vsel %vm2953_vm5, %v8092_v35, %v8083_v28  ;;  %v8887_v30 = vsel %vm7904_vm13, 0, %v7885_v57 }
 0x43c   : > { %v8170_v47 = vadd.s32 3, %v8887_v30  ;;  %v8173_v60 = vsub.s32 %v8074_v8, %v3545_v25  ;;  %v3700_v10 = vadd.s32 1, %v4332_v27  ;;  %v8888_v59 = vxor.u32 2147483648, %v8072_v49 }
 0x43d   : > { %v3250_v11 = vand.u32 2147483647, %v3249_v42  ;;  %v3259_v34 = vsel %vm8134_vm6, 0, %v8097_v15  ;;  %v3833_v28 = vsel %vm3827_vm7, %v3830_v33, %v3832_v56  ;;  %v3450_v57 = vsub.s32 32, %v8126_v0 }
 0x43e   : > { %v3151_v45 = vsel %vm3068_vm11, %v8888_v59, %v8072_v49  ;;  %v3455_v35 = vadd.s32 127, %v3454_v39  ;;  %v3852_v8 = vadd.s32 1, %v8154_v44  ;;  %vm3701_vm12 = vcmp.gt.s32.totalorder %v3700_v10, 0 }
 0x43f   : > { %v3252_v25 = vcvt.s32.f32 %v8118_v37  ;;  %v3434_v4 = vadd.s32 %v7748_v55, %v7761_v31  ;;  %v3351_v46 = vadd.s32 127, %v3350_v20  ;;  %v4329_v49 = vmin.u32 %v3652_v24, %v8142_v26 }
 0x440   : > { %v3548_v42 = vsub.s32 0, %v8173_v60  ;;  %v3849_v3 = vmul.u32 %v3842_v61, %v3833_v28  ;;  %vm3851_vm11 = vc.u32 %v8160_v23, %v8153_v50  ;;  %v3702_v15 = vsel %vm3701_vm12, %v3700_v10, 0 }
 0x441   : > { %v8195_v58 = vsel %vm2950_vm10, nan, %v2960_v32  ;;  %v8197_v39 = vmul.f32 %v3252_v25, %v3250_v11  ;;  %v3263_v37 = vadd.s32 3, %v3259_v34  ;;  %v3853_v33 = vsel %vm3851_vm11, %v3852_v8, %v8154_v44 }
 0x442   : > { %v3452_v55 = vshrl.u32 %v3434_v4, %v3450_v57  ;;  %v3456_v31 = vshll.u32 %v3455_v35, 23  ;;  %v3854_v56 = vadd.s32 %v3853_v33, %v3849_v3  ;;  %v3704_v54 = vand.u32 31, %v3702_v15 }
 0x443   : > { %v8203_v61 = vsel %vm7904_vm13, %v7198_v14, %v3151_v45  ;;  %v3451_v27 = vshll.u32 %v7963_v53, %v8126_v0  ;;  %v3346_v38 = vsub.s32 32, %v8129_v6  ;;  %v3654_v20 = vclz %v4329_v49 }
 0x444   : > { %v3352_v24 = vshll.u32 %v3351_v46, 23  ;;  %v4325_v48 = vmin.u32 %v3548_v42, %v8173_v60  ;;  %v3855_v32 = vadd.s32 536870912, %v3854_v56  ;;  %v3705_v44 = vsub.s32 32, %v3704_v54 }
 0x445   : > { %v3254_v30 = vxor.u32 2147483648, %v8197_v39  ;;  %v8210_v10 = vand.u32 3, %v3263_v37  ;;  %v3330_v1 = vadd.s32 %v7790_v16, %v7798_v52  ;;  %v8746_v59 = vand.u32 2147483647, %v8116_v43 }
 0x446   : > { %v8215_v45 = vor.u32 %v3452_v55, %v3451_v27  ;;  %v8217_v53 = vor.u32 4788187, %v3456_v31  ;;  %v3347_v0 = vshll.u32 %v7981_v13, %v8129_v6  ;;  %v8221_v11 = vshrl.u32 %v3855_v32, 30 }
 0x447   : > { %v3348_v34 = vshrl.u32 %v3330_v1, %v3346_v38  ;;  %v4330_v28 = vadd.s32 4294967294, %v3654_v20  ;;  %v3708_v57 = vshrl.u32 %v8876_v18, %v3705_v44  ;;  %v3711_v35 = vshrl.u32 %v8878_v17, %v3705_v44 }
 0x448   : > { %v8225_v8 = vor.u32 4788187, %v3352_v24  ;;  %v3550_v16 = vclz %v4325_v48  ;;  %v3857_v52 = vshll.u32 %v8221_v11, 30  ;;  %v3714_v25 = vshrl.u32 %v8877_v21, %v3705_v44  ;;  %v2335_v24 = vpop.f32.mrf.mxu1 }
 0x449   : > { %v3697_v4 = vand.u32 8388607, %v8746_v59  ;;  %v3703_v46 = vshrl.u32 %v3702_v15, 5  ;;  %v3707_v13 = vshll.u32 %v8774_v51, %v3704_v54  ;;  %v3710_v6 = vshll.u32 %v8876_v18, %v3704_v54 }
 0x44a   : > { %v8233_v49 = vsub.s32 %v3854_v56, %v3857_v52  ;;  %v3713_v42 = vshll.u32 %v8878_v17, %v3704_v54  ;;  %v3716_v3 = vshll.u32 %v8877_v21, %v3704_v54  ;;  %v3717_v37 = vshrl.u32 %v8764_v62, %v3705_v44 }
 0x44b   : > { %vm4331_vm13 = vcmp.lt.s32.totalorder %v4330_v28, 0  ;;  %v3709_v33 = vor.u32 %v3708_v57, %v3707_v13  ;;  %v3712_v55 = vor.u32 %v3711_v35, %v3710_v6  ;;  %v3720_v31 = vshrl.u32 %v8775_v7, %v3705_v44 }
 0x44c   : > { %v3860_v27 = vsub.s32 0, %v8233_v49  ;;  %v3715_v15 = vor.u32 %v3714_v25, %v3713_v42  ;;  %v3718_v38 = vor.u32 %v3717_v37, %v3716_v3  ;;  %v3719_v20 = vshll.u32 %v8764_v62, %v3704_v54 }
 0x44d   : > { %v3349_v56 = vor.u32 %v3348_v34, %v3347_v0  ;;  %v3354_v48 = vand.u32 2147483647, %v8225_v8  ;;  %v4326_v32 = vadd.s32 4294967294, %v3550_v16  ;;  %v3698_v1 = vor.u32 8388608, %v3697_v4 }
 0x44e   : > { %v4337_v52 = vmin.u32 %v3860_v27, %v8233_v49  ;;  %v3721_v59 = vor.u32 %v3720_v31, %v3719_v20  ;;  %vm3722_vm9 = vcmp.lt.s32.totalorder %v3703_v46, 1  ;;  %vm3725_vm0 = vcmp.lt.s32.totalorder %v3703_v46, 4 }
 0x44f   : > { %v8244_v57 = vsel %vm4331_vm13, 0, %v4330_v28  ;;  %v3730_v35 = vsel %vm3722_vm9, %v3709_v33, %v3712_v55  ;;  %v3731_v25 = vsel %vm3725_vm0, %v3718_v38, 920167782  ;;  %v8249_v54 = vadd.f32 %v2335_v24, %v7818_v2  ;;  %v8889_v28 = vld [vmem:[#allocation14_spill] sm:$0xff] }
 0x450   : > { %v3862_v0 = vclz %v4337_v52  ;;  %v3706_v34 = vshrl.u32 %v8774_v51, %v3705_v44  ;;  %vm3724_vm1 = vcmp.lt.s32.totalorder %v3703_v46, 3  ;;  %v3727_v8 = vsel %vm3725_vm0, %v3715_v15, 2102212464 }
 0x451   : > { %vm3723_vm2 = vcmp.lt.s32.totalorder %v3703_v46, 2  ;;  %v3732_v16 = vsel %vm3724_vm1, %v3715_v15, %v3731_v25  ;;  %v3734_v4 = vsel %vm3722_vm9, %v3712_v55, %v3715_v15  ;;  %v3738_v13 = vshll.u32 %v3698_v1, 8 }
 0x452   : > { %vm3380_vm3 = vcmp.lt.s32.totalorder %v8889_v28, 0  ;;  %vm4327_vm5 = vcmp.lt.s32.totalorder %v4326_v32, 0  ;;  %v3726_v6 = vsel %vm3722_vm9, %v3706_v34, %v3709_v33  ;;  %v3733_v42 = vsel %vm3723_vm2, %v3730_v35, %v3732_v16 }
 0x453   : > { %v3735_v2 = vsel %vm3725_vm0, %v3721_v59, 1326507024  ;;  %v3728_v3 = vsel %vm3724_vm1, %v3712_v55, %v3727_v8  ;;  %v8258_v44 = vmul.u32.u64.low %v3738_v13, %v3733_v42  ;;  %v8259_v31 = vmul.u32.u64.high %v3738_v13, %v3733_v42, %v8258_v44 }
 0x454   : > { %v3736_v37 = vsel %vm3724_vm1, %v3718_v38, %v3735_v2  ;;  %v3662_v27 = vsub.s32 4294967266, %v8244_v57  ;;  %v4338_v20 = vadd.s32 4294967294, %v3862_v0  ;;  %v3901_v24 = vand.u32 2139095040, %v8249_v54 }
 0x455   : > { %v3737_v15 = vsel %vm3723_vm2, %v3734_v4, %v3736_v37  ;;  %v3464_v1 = vsub.s32 4, %v7919_v12  ;;  %v3356_v33 = vcvt.s32.f32 %v3349_v56  ;;  %v3255_v59 = vsel %vm3172_vm15, %v3254_v30, %v8197_v39 }
 0x456   : > { %v8266_v52 = vmul.u32.u64.low %v3738_v13, %v3737_v15  ;;  %v8267_v35 = vmul.u32.u64.high %v3738_v13, %v3737_v15, %v8266_v52  ;;  %v8890_v55 = vand.u32 2147483647, %v8889_v28  ;;  %v3458_v25 = vand.u32 2147483647, %v8217_v53 }
 0x457   : > { %v3729_v0 = vsel %vm3723_vm2, %v3726_v6, %v3728_v3  ;;  %v3902_v56 = vshrl.u32 %v3901_v24, 23  ;;  %v3460_v34 = vcvt.s32.f32 %v8215_v45  ;;  %vm3276_vm8 = vcmp.lt.s32.totalorder %v7526_v9, 0 }
 0x458   : > { %vm8276_vm4 = vcmp.le.f32.partialorder %v8890_v55, 0.7853982  ;;  %v3357_v8 = vmul.f32 %v3356_v33, %v3354_v48  ;;  %v8285_v16 = vsel %vm4327_vm5, 0, %v4326_v32  ;;  %v3748_v39 = vadd.s32 1, %v8259_v31 }
 0x459   : > { %v3658_v30 = vsub.s32 32, %v8244_v57  ;;  %v3663_v4 = vadd.s32 127, %v3662_v27  ;;  %vm4339_vm15 = vcmp.lt.s32.totalorder %v4338_v20, 0  ;;  %v4340_v42 = vadd.s32 4294967169, %v3902_v56 }
 0x45a   : > { %4626 = vcosq.f32 %v8203_v61  ;;  %v3258_v53 = vsel %vm8134_vm6, %v8879_v63, %v3255_v59  ;;  %v3745_v45 = vmul.u32 %v3738_v13, %v3729_v0  ;;  %vm3747_vm14 = vc.u32 %v8267_v35, %v8258_v44 }
 0x45b   : > { %v3461_v46 = vmul.f32 %v3460_v34, %v3458_v25  ;;  %v8893_v48 = vand.u32 2147483647, %v7526_v9  ;;  %v3642_v6 = vadd.s32 %v8050_v5, %v8062_v22  ;;  %v3749_v2 = vsel %vm3747_vm14, %v3748_v39, %v8259_v31 }
 0x45c   : > { %v3908_v3 = vadd.s32 1, %v4340_v42  ;;  %v3465_v19 = vsel %vm3380_vm3, %v3464_v1, %v7919_v12  ;;  %v3558_v13 = vsub.s32 4294967266, %v8285_v16  ;;  %v8308_v37 = vsel %vm4339_vm15, 0, %v4338_v20 }
 0x45d   : > { %vm8297_vm7 = vcmp.le.f32.partialorder %v8893_v48, 0.7853982  ;;  %v3750_v27 = vadd.s32 %v3749_v2, %v3745_v45  ;;  %v3358_v15 = vxor.u32 2147483648, %v3357_v8  ;;  %v3660_v24 = vshrl.u32 %v3642_v6, %v3658_v30 }
 0x45e   : > { %v3664_v33 = vshll.u32 %v3663_v4, 23  ;;  %vm3909_vm6 = vcmp.gt.s32.totalorder %v3908_v3, 0  ;;  %4628 = vcosq.f32 %v3258_v53  ;;  %v8747_v5 = vand.u32 2147483647, %v8249_v54 }
 0x45f   : > { %v3751_v52 = vadd.s32 536870912, %v3750_v27  ;;  %v3910_v22 = vsel %vm3909_vm6, %v3908_v3, 0  ;;  %v3462_v31 = vxor.u32 2147483648, %v3461_v46  ;;  %v3659_v59 = vshll.u32 %v8142_v26, %v8244_v57 }
 0x460   : > { %v3870_v12 = vsub.s32 4294967266, %v8308_v37  ;;  %v3912_v1 = vand.u32 31, %v3910_v22  ;;  %v3467_v20 = vsel %vm8276_vm4, 0, %v3465_v19  ;;  %v3554_v55 = vsub.s32 32, %v8285_v16 }
 0x461   : > { %v8317_v25 = vadd.s32 127, %v3558_v13  ;;  %v8319_v0 = vshrl.u32 %v3751_v52, 30  ;;  %4630 = vsinq.f32 %v3258_v53  ;;  %v3359_v56 = vsel %vm3276_vm8, %v3358_v15, %v3357_v8 }
 0x462   : > { %v3661_v34 = vor.u32 %v3660_v24, %v3659_v59  ;;  %v3665_v39 = vor.u32 4788187, %v3664_v33  ;;  %v3538_v26 = vadd.s32 %v8014_v29, %v8021_v40  ;;  %v3905_v30 = vand.u32 8388607, %v8747_v5 }
 0x463   : > { %v3753_v57 = vshll.u32 %v8319_v0, 30  ;;  %v3913_v4 = vsub.s32 32, %v3912_v1  ;;  %v8330_v42 = vsel %vm3380_vm3, %v3462_v31, %v3461_v46  ;;  %v8332_v45 = vadd.s32 3, %v3467_v20 }
 0x464   : > { %v3866_v53 = vsub.s32 32, %v8308_v37  ;;  %v3871_v8 = vadd.s32 127, %v3870_v12  ;;  %v8338_v48 = vsel %vm8297_vm7, %v7526_v9, %v3359_v56  ;;  %v8340_v29 = vshrl.u32 %v3538_v26, %v3554_v55 }
 0x465   : > { %v3560_v40 = vshll.u32 %v8317_v25, 23  ;;  %v8343_v6 = vsub.s32 %v3750_v27, %v3753_v57  ;;  %v3666_v2 = vand.u32 2147483647, %v3665_v39  ;;  %v3668_v3 = vcvt.s32.f32 %v3661_v34 }
 0x466   : > { %v3850_v46 = vadd.s32 %v8153_v50, %v8160_v23  ;;  %v3867_v19 = vshll.u32 %v8233_v49, %v8308_v37  ;;  %v3906_v15 = vor.u32 8388608, %v3905_v30  ;;  %v3916_v24 = vshrl.u32 %v8876_v18, %v3913_v4 }
 0x467   : > { %v3756_v13 = vsub.s32 0, %v8343_v6  ;;  %v3919_v33 = vshrl.u32 %v8878_v17, %v3913_v4  ;;  %v8352_v52 = vpop.eup %4626  ;;  %v3872_v27 = vshll.u32 %v3871_v8, 23  ;;  %v3911_v59 = vshrl.u32 %v3910_v22, 5 }
 0x468   : > { %v3868_v31 = vshrl.u32 %v3850_v46, %v3866_v53  ;;  %v3922_v12 = vshrl.u32 %v8877_v21, %v3913_v4  ;;  %v3915_v50 = vshll.u32 %v8774_v51, %v3912_v1  ;;  %v3918_v23 = vshll.u32 %v8876_v18, %v3912_v1 }
 0x469   : > { %v4333_v20 = vmin.u32 %v3756_v13, %v8343_v6  ;;  %v3921_v49 = vshll.u32 %v8878_v17, %v3912_v1  ;;  %v3924_v37 = vshll.u32 %v8877_v21, %v3912_v1  ;;  %v3925_v55 = vshrl.u32 %v8764_v62, %v3913_v4 }
 0x46a   : > { %v3927_v56 = vshll.u32 %v8764_v62, %v3912_v1  ;;  %v3928_v34 = vshrl.u32 %v8775_v7, %v3913_v4  ;;  %v3917_v22 = vor.u32 %v3916_v24, %v3915_v50  ;;  %v3920_v26 = vor.u32 %v3919_v33, %v3918_v23 }
 0x46b   : > { %v3758_v39 = vclz %v4333_v20  ;;  %v3923_v57 = vor.u32 %v3922_v12, %v3921_v49  ;;  %v8363_v30 = vpop.eup %4628  ;;  %v3669_v53 = vmul.f32 %v3668_v3, %v3666_v2  ;;  %v3746_v18 = vadd.s32 %v8258_v44, %v8267_v35 }
 0x46c   : > { %v3926_v8 = vor.u32 %v3925_v55, %v3924_v37  ;;  %v3929_v17 = vor.u32 %v3928_v34, %v3927_v56  ;;  %v3869_v46 = vor.u32 %v3868_v31, %v3867_v19  ;;  %v3873_v21 = vor.u32 4788187, %v3872_v27 }
 0x46d   : > { %v4334_v13 = vadd.s32 4294967294, %v3758_v39  ;;  %v3946_v5 = vshll.u32 %v3906_v15, 8  ;;  %v3914_v62 = vshrl.u32 %v8774_v51, %v3913_v4  ;;  %vm3930_vm10 = vcmp.lt.s32.totalorder %v3911_v59, 1 }
 0x46e   : > { %vm3932_vm12 = vcmp.lt.s32.totalorder %v3911_v59, 3  ;;  %vm3933_vm11 = vcmp.lt.s32.totalorder %v3911_v59, 4  ;;  %v8368_v7 = vpop.eup %4630  ;;  %v3938_v2 = vsel %vm3930_vm10, %v3917_v22, %v3920_v26  ;;  %v3942_v35 = vsel %vm3930_vm10, %v3920_v26, %v3923_v57 }
 0x46f   : > { %vm4335_vm13 = vcmp.lt.s32.totalorder %v4334_v13, 0  ;;  %v3935_v1 = vsel %vm3933_vm11, %v3923_v57, 2102212464  ;;  %v3939_v3 = vsel %vm3933_vm11, %v3926_v8, 920167782  ;;  %vm3931_vm9 = vcmp.lt.s32.totalorder %v3911_v59, 2 }
 0x470   : > { %v3761_v24 = vsel %vm4335_vm13, 0, %v4334_v13  ;;  %v3940_v44 = vsel %vm3932_vm12, %v3923_v57, %v3939_v3  ;;  %v3943_v19 = vsel %vm3933_vm11, %v3929_v17, 1326507024  ;;  %v3874_v33 = vand.u32 2147483647, %v3873_v21 }
 0x471   : > { %v3762_v15 = vsub.s32 32, %v3761_v24  ;;  %v3766_v31 = vsub.s32 4294967266, %v3761_v24  ;;  %v3934_v51 = vsel %vm3930_vm10, %v3914_v62, %v3917_v22  ;;  %v3936_v4 = vsel %vm3932_vm12, %v3920_v26, %v3935_v1 }
 0x472   : > { %v3941_v27 = vsel %vm3931_vm9, %v3938_v2, %v3940_v44  ;;  %v3944_v12 = vsel %vm3932_vm12, %v3926_v8, %v3943_v19  ;;  %v3763_v20 = vshll.u32 %v8343_v6, %v3761_v24  ;;  %v3670_v39 = vxor.u32 2147483648, %v3669_v53 }
 0x473   : > { %v3764_v50 = vshrl.u32 %v3746_v18, %v3762_v15  ;;  %v3767_v23 = vadd.s32 127, %v3766_v31  ;;  %v3945_v49 = vsel %vm3931_vm9, %v3942_v35, %v3944_v12  ;;  %v3876_v22 = vcvt.s32.f32 %v3869_v46  ;;  %v8896_v46 = vld [vmem:[#allocation18_spill] sm:$0xff] }
 0x474   : > { %v8379_v37 = vmul.u32.u64.low %v3946_v5, %v3945_v49  ;;  %v8380_v55 = vmul.u32.u64.high %v3946_v5, %v3945_v49, %v8379_v37  ;;  %v8382_v56 = vmul.u32.u64.low %v3946_v5, %v3941_v27  ;;  %v8383_v34 = vmul.u32.u64.high %v3946_v5, %v3941_v27, %v8382_v56 }
 0x475   : > { %v3765_v26 = vor.u32 %v3764_v50, %v3763_v20  ;;  %v3768_v57 = vshll.u32 %v3767_v23, 23  ;;  %v3360_v17 = vsub.s32 4, %v7944_v36  ;;  %v3555_v6 = vshll.u32 %v8173_v60, %v8285_v16 }
 0x476   : > { %v3561_v18 = vor.u32 4788187, %v3560_v40  ;;  %v3937_v8 = vsel %vm3931_vm9, %v3934_v51, %v3936_v4  ;;  %vm3269_vm0 = vcmp.eq.s32.totalorder %v8210_v10, 2  ;;  %v3466_v21 = vsel %vm8276_vm4, %v8889_v28, %v8330_v42 }
 0x477   : > { %vm3588_vm1 = vcmp.lt.s32.totalorder %v8896_v46, 0  ;;  %v3877_v13 = vmul.f32 %v3876_v22, %v3874_v33  ;;  %v3769_v62 = vor.u32 4788187, %v3768_v57  ;;  %4632 = vcosq.f32 %v8338_v48  ;;  %v8907_v57 = vld [vmem:[#allocation15_spill] sm:$0xff] }
 0x478   : > { %v3557_v60 = vor.u32 %v8340_v29, %v3555_v6  ;;  %vm3955_vm2 = vc.u32 %v8380_v55, %v8382_v56  ;;  %v3956_v16 = vadd.s32 1, %v8383_v34  ;;  %vm3266_vm3 = vcmp.eq.s32.totalorder %v8210_v10, 0 }
 0x479   : > { %v3671_v25 = vsel %vm3588_vm1, %v3670_v39, %v3669_v53  ;;  %v3770_v38 = vand.u32 2147483647, %v3769_v62  ;;  %v3772_v42 = vcvt.s32.f32 %v3765_v26  ;;  %v3953_v40 = vmul.u32 %v3946_v5, %v3937_v8 }
 0x47a   : > { %4634 = vsinq.f32 %v8338_v48  ;;  %v3562_v59 = vand.u32 2147483647, %v3561_v18  ;;  %v8897_v1 = vand.u32 2147483647, %v8896_v46  ;;  %v3957_v2 = vsel %vm3955_vm2, %v3956_v16, %v8383_v34 }
 0x47b   : > { %v3270_v3 = vxor.u32 2147483648, %v8363_v30  ;;  %v3878_v24 = vxor.u32 2147483648, %v3877_v13  ;;  %v3773_v44 = vmul.f32 %v3772_v42, %v3770_v38  ;;  %v3958_v35 = vadd.s32 %v3957_v2, %v3953_v40  ;;  %v8909_v38 = vld [vmem:[#allocation10_spill] sm:$0xff] }
 0x47c   : > { %vm8409_vm5 = vcmp.le.f32.partialorder %v8897_v1, 0.7853982  ;;  %v3267_v53 = vxor.u32 2147483648, %v8368_v7  ;;  %4636 = vcosq.f32 %v3466_v21  ;;  %v3564_v5 = vcvt.s32.f32 %v3557_v60  ;;  %v8910_v42 = vld [vmem:[#allocation22_spill] sm:$0xff] }
 0x47d   : > { %v3674_v48 = vsel %vm8409_vm5, %v8896_v46, %v3671_v25  ;;  %4638 = vsinq.f32 %v3466_v21  ;;  %v3361_v19 = vsel %vm3276_vm8, %v3360_v17, %v7944_v36  ;;  %v3774_v33 = vxor.u32 2147483648, %v3773_v44  ;;  %v8908_v21 = vld [vmem:[#allocation21_spill] sm:$0xff] }
 0x47e   : > { %v3959_v15 = vadd.s32 536870912, %v3958_v35  ;;  %v3565_v31 = vmul.f32 %v3564_v5, %v3562_v59  ;;  %vm3796_vm4 = vcmp.lt.s32.totalorder %v7978_v41, 0  ;;  %v8900_v51 = vand.u32 2147483647, %v8116_v43 }
 0x47f   : > { %vm3692_vm14 = vcmp.lt.s32.totalorder %v8116_v43, 0  ;;  %vm3262_vm6 = vweird.f32 %v8879_v63  ;;  %4640 = vcosq.f32 %v3674_v48  ;;  %v3879_v27 = vsel %vm3796_vm4, %v3878_v24, %v3877_v13 }
 0x480   : > { %vm8425_vm15 = vcmp.le.f32.partialorder %v8900_v51, 0.7853982  ;;  %v3775_v36 = vsel %vm3692_vm14, %v3774_v33, %v3773_v44  ;;  %v8435_v12 = vshrl.u32 %v3959_v15, 30  ;;  %v3271_v20 = vsel %vm3269_vm0, %v3270_v3, %v8368_v7  ;;  %v8906_v7 = vld [vmem:[#allocation8_spill] sm:$0xff] }
 0x481   : > { %v3363_v50 = vsel %vm8297_vm7, 0, %v3361_v19  ;;  %4642 = vsinq.f32 %v3674_v48  ;;  %v3778_v23 = vsel %vm8425_vm15, %v8116_v43, %v3775_v36  ;;  %v8903_v49 = vand.u32 2147483647, %v7978_v41  ;;  %v8511_v48 = vpop.permute.xlu0 %4019 }
 0x482   : > { %v3776_v34 = vsub.s32 4, %v8319_v0  ;;  %4644 = vcosq.f32 %v3778_v23  ;;  %v3961_v39 = vshll.u32 %v8435_v12, 30  ;;  %v3268_v32 = vsel %vm3266_vm3, %v8363_v30, %v3267_v53 }
 0x483   : > { %vm8447_vm8 = vcmp.le.f32.partialorder %v8903_v49, 0.7853982  ;;  %v3672_v22 = vsub.s32 4, %v8906_v7  ;;  %4646 = vsinq.f32 %v3778_v23  ;;  %v4032_v17 = vmul.f32 %v8907_v57, %v8195_v58  ;;  %v8914_v23 = vld [vmem:[#allocation16_spill] sm:$0xff] }
 0x484   : > { %v3882_v26 = vsel %vm8447_vm8, %v7978_v41, %v3879_v27  ;;  %v3367_v6 = vadd.s32 3, %v3363_v50  ;;  %v3566_v18 = vxor.u32 2147483648, %v3565_v31  ;;  %v8462_v8 = vsub.s32 %v3958_v35, %v3961_v39  ;;  %v4633_v60 = vpop.eup %4632 }
 0x485   : > { %v8466_v13 = vmul.f32 %v8907_v57, %v8908_v21  ;;  %v8469_v30 = vand.u32 3, %v8170_v47  ;;  %vm3265_vm7 = vcmp.lt.s32.totalorder %v8210_v10, 2  ;;  %v8473_v62 = vand.u32 3, %v8332_v45 }
 0x486   : > { %v3272_v16 = vsel %vm3265_vm7, %v3268_v32, %v3271_v20  ;;  %4648 = vcosq.f32 %v3882_v26  ;;  %v3777_v58 = vsel %vm3692_vm14, %v3776_v34, %v8319_v0  ;;  %v3964_v25 = vsub.s32 0, %v8462_v8 }
 0x487   : > { %vm3484_vm10 = vcmp.lt.s32.totalorder %v8909_v38, 0  ;;  %v3673_v47 = vsel %vm3588_vm1, %v3672_v22, %v8906_v7  ;;  %v3880_v10 = vsub.s32 4, %v8221_v11  ;;  %4650 = vsinq.f32 %v3882_v26  ;;  %v4635_v45 = vpop.eup %4634 }
 0x488   : > { %v8485_v40 = vadd.f32 %v4032_v17, %v8910_v42  ;;  %v8487_v59 = vand.u32 3, %v3367_v6  ;;  %v3567_v0 = vsel %vm3484_vm10, %v3566_v18, %v3565_v31  ;;  %v4341_v1 = vmin.u32 %v3964_v25, %v8462_v8 }
 0x489   : > { %4652 = vsinq.f32 %v8203_v61  ;;  %v3273_v2 = vsel %vm3262_vm6, nan, %v3272_v16  ;;  %v8911_v3 = vand.u32 2147483647, %v8909_v38  ;;  %v3779_v44 = vsel %vm8425_vm15, 0, %v3777_v58  ;;  %v8503_v35 = vpop.eup %4636 }
 0x48a   : > { %v3166_v53 = vxor.u32 2147483648, %v8352_v52  ;;  %vm3477_vm11 = vcmp.eq.s32.totalorder %v8473_v62, 2  ;;  %v3675_v61 = vsel %vm8409_vm5, 0, %v3673_v47  ;;  %v3966_v63 = vclz %v4341_v1  ;;  %v8509_v5 = vpop.eup %4638 }
 0x48b   : > { %vm8497_vm12 = vcmp.le.f32.partialorder %v8911_v3, 0.7853982  ;;  %v3371_v19 = vxor.u32 2147483648, %v4635_v45  ;;  %v3374_v33 = vxor.u32 2147483648, %v4633_v60  ;;  %v3881_v31 = vsel %vm3796_vm4, %v3880_v10, %v8221_v11 }
 0x48c   : > { %v3570_v15 = vsel %vm8497_vm12, %v8909_v38, %v3567_v0  ;;  %v8520_v51 = vmul.f32 %v8511_v48, %v3273_v2  ;;  %vm3369_vm13 = vcmp.lt.s32.totalorder %v8487_v59, 2  ;;  %v3783_v29 = vadd.s32 3, %v3779_v44  ;;  %v4641_v27 = vpop.eup %4640 }
 0x48d   : > { %v4342_v4 = vadd.s32 4294967294, %v3966_v63  ;;  %v3478_v36 = vxor.u32 2147483648, %v8503_v35  ;;  %vm3370_vm9 = vcmp.eq.s32.totalorder %v8487_v59, 0  ;;  %vm3373_vm0 = vcmp.eq.s32.totalorder %v8487_v59, 2 }
 0x48e   : > { %v3679_v20 = vadd.s32 3, %v3675_v61  ;;  %v4643_v50 = vpop.eup %4642  ;;  %v3568_v49 = vsub.s32 4, %v8914_v23  ;;  %4654 = vcosq.f32 %v3570_v15  ;;  %v3883_v11 = vsel %vm8447_vm8, 0, %v3881_v31 }
 0x48f   : > { %vm4343_vm1 = vcmp.lt.s32.totalorder %v4342_v4, 0  ;;  %v4645_v34 = vpop.eup %4644  ;;  %vm3474_vm2 = vcmp.eq.s32.totalorder %v8473_v62, 0  ;;  %v3372_v39 = vsel %vm3370_vm9, %v4633_v60, %v3371_v19  ;;  %v3375_v32 = vsel %vm3373_vm0, %v3374_v33, %v4635_v45 }
 0x490   : > { %4656 = vsinq.f32 %v3570_v15  ;;  %v3969_v7 = vsel %vm4343_vm1, 0, %v4342_v4  ;;  %v4647_v22 = vpop.eup %4646  ;;  %vm3366_vm3 = vweird.f32 %v7526_v9  ;;  %v3784_v26 = vand.u32 3, %v3783_v29 }
 0x491   : > { %v3954_v17 = vadd.s32 %v8382_v56, %v8380_v55  ;;  %v3970_v6 = vsub.s32 32, %v3969_v7  ;;  %v3974_v18 = vsub.s32 4294967266, %v3969_v7  ;;  %v3680_v21 = vand.u32 3, %v3679_v20 }
 0x492   : > { %v3887_v37 = vadd.s32 3, %v3883_v11  ;;  %v3787_v16 = vxor.u32 2147483648, %v4647_v22  ;;  %v3790_v58 = vxor.u32 2147483648, %v4645_v34  ;;  %v3686_v25 = vxor.u32 2147483648, %v4641_v27 }
 0x493   : > { %v3971_v47 = vshll.u32 %v8462_v8, %v3969_v7  ;;  %v3972_v60 = vshrl.u32 %v3954_v17, %v3970_v6  ;;  %v3975_v10 = vadd.s32 127, %v3974_v18  ;;  %v4649_v45 = vpop.eup %4648  ;;  %vm3473_vm5 = vcmp.lt.s32.totalorder %v8473_v62, 2 }
 0x494   : > { %v3475_v42 = vxor.u32 2147483648, %v8509_v5  ;;  %v3479_v55 = vsel %vm3477_vm11, %v3478_v36, %v8509_v5  ;;  %v3569_v56 = vsel %vm3484_vm10, %v3568_v49, %v8914_v23  ;;  %v3683_v0 = vxor.u32 2147483648, %v4643_v50  ;;  %v4651_v1 = vpop.eup %4650 }
 0x495   : > { %vm3786_vm4 = vcmp.eq.s32.totalorder %v3784_v26, 0  ;;  %vm3789_vm15 = vcmp.eq.s32.totalorder %v3784_v26, 2  ;;  %v3973_v8 = vor.u32 %v3972_v60, %v3971_v47  ;;  %v3976_v2 = vshll.u32 %v3975_v10, 23 }
 0x496   : > { %v3376_v3 = vsel %vm3369_vm13, %v3372_v39, %v3375_v32  ;;  %vm3685_vm14 = vcmp.eq.s32.totalorder %v3680_v21, 2  ;;  %v3788_v44 = vsel %vm3786_vm4, %v4645_v34, %v3787_v16  ;;  %v3791_v61 = vsel %vm3789_vm15, %v3790_v58, %v4647_v22  ;;  %v8544_v63 = vpop.eup %4652  ;;  %v8919_v58 = vld [vmem:[#allocation19_spill] sm:$0xff] }
 0x497   : > { %vm3470_vm6 = vweird.f32 %v8889_v28  ;;  %vm3682_vm8 = vcmp.eq.s32.totalorder %v3680_v21, 0  ;;  %v3687_v5 = vsel %vm3685_vm14, %v3686_v25, %v4643_v50  ;;  %v3888_v19 = vand.u32 3, %v3887_v37 }
 0x498   : > { %v3977_v33 = vor.u32 4788187, %v3976_v2  ;;  %v3684_v15 = vsel %vm3682_vm8, %v4641_v27, %v3683_v0  ;;  %v3891_v31 = vxor.u32 2147483648, %v4651_v1  ;;  %v3894_v29 = vxor.u32 2147483648, %v4649_v45  ;;  %v8915_v27 = vld [vmem:[#allocation11_spill] sm:$0xff] }
 0x499   : > { %vm3785_vm7 = vcmp.lt.s32.totalorder %v3784_v26, 2  ;;  %v3476_v59 = vsel %vm3474_vm2, %v8503_v35, %v3475_v42  ;;  %v3980_v20 = vcvt.s32.f32 %v3973_v8  ;;  %v3377_v23 = vsel %vm3366_vm3, nan, %v3376_v3  ;;  %v8561_v26 = vpop.permute.xlu1 %4024  ;;  %v8920_v8 = vld [vmem:[#allocation20_spill] sm:$0xff] }
 0x49a   : > { %v3792_v4 = vsel %vm3785_vm7, %v3788_v44, %v3791_v61  ;;  %v3978_v36 = vand.u32 2147483647, %v3977_v33  ;;  %v3571_v49 = vsel %vm8497_vm12, 0, %v3569_v56  ;;  %vm3681_vm10 = vcmp.lt.s32.totalorder %v3680_v21, 2  ;;  %v8924_v61 = vld [vmem:[#allocation9_spill] sm:$0xff] }
 0x49b   : > { %vm3782_vm11 = vweird.f32 %v8116_v43  ;;  %vm2746_vm13 = vcmp.eq.s32.totalorder %v8915_v27, 0  ;;  %vm2749_vm9 = vcmp.eq.s32.totalorder %v8915_v27, 2  ;;  %v3688_v50 = vsel %vm3681_vm10, %v3684_v15, %v3687_v5  ;;  %v4655_v11 = vpop.eup %4654 }
 0x49c   : > { %vm3890_vm0 = vcmp.eq.s32.totalorder %v3888_v19, 0  ;;  %vm3893_vm1 = vcmp.eq.s32.totalorder %v3888_v19, 2  ;;  %v3981_v35 = vmul.f32 %v3980_v20, %v3978_v36  ;;  %vm3678_vm2 = vweird.f32 %v8896_v46 }
 0x49d   : > { %v3892_v34 = vsel %vm3890_vm0, %v4649_v45, %v3891_v31  ;;  %v3895_v9 = vsel %vm3893_vm1, %v3894_v29, %v4651_v1  ;;  %v3793_v39 = vsel %vm3782_vm11, nan, %v3792_v4  ;;  %v4657_v32 = vpop.eup %4656  ;;  %v3480_v24 = vsel %vm3473_vm5, %v3476_v59, %v3479_v55 }
 0x49e   : > { %v4036_v43 = vmul.f32 %v8511_v48, %v3377_v23  ;;  %v3575_v7 = vadd.s32 3, %v3571_v49  ;;  %v3982_v22 = vxor.u32 2147483648, %v3981_v35  ;;  %v3689_v17 = vsel %vm3678_vm2, nan, %v3688_v50 }
 0x49f   : > { %vm3889_vm12 = vcmp.lt.s32.totalorder %v3888_v19, 2  ;;  %vm3900_vm3 = vcmp.lt.s32.totalorder %v8249_v54, 0  ;;  %v3984_v6 = vsub.s32 4, %v8435_v12  ;;  %v4040_v18 = vmul.f32 %v8561_v26, %v3793_v39 }
 0x4a0   : > { %v3896_v46 = vsel %vm3889_vm12, %v3892_v34, %v3895_v9  ;;  %v8916_v21 = vand.u32 2147483647, %v8249_v54  ;;  %v3983_v37 = vsel %vm3900_vm3, %v3982_v22, %v3981_v35  ;;  %v3163_v16 = vxor.u32 2147483648, %v8544_v63  ;;  %v8926_v22 = vld [vmem:[#allocation17_spill] sm:$0xff] }
 0x4a1   : > { %v4044_v25 = vadd.f32 %v8919_v58, %v8520_v51  ;;  %v3481_v47 = vsel %vm3470_vm6, nan, %v3480_v24  ;;  %v4053_v10 = vadd.f32 %v8485_v40, %v4036_v43  ;;  %v4039_v45 = vmul.f32 %v8561_v26, %v3689_v17  ;;  %v8922_v40 = vld [vmem:[#allocation13_spill] sm:$0xff] }
 0x4a2   : > { %vm8568_vm4 = vcmp.le.f32.partialorder %v8916_v21, 0.7853982  ;;  %vm3886_vm5 = vweird.f32 %v7978_v41  ;;  %v3576_v42 = vand.u32 3, %v3575_v7  ;;  %v3985_v51 = vsel %vm3900_vm3, %v3984_v6, %v8435_v12 }
 0x4a3   : > { %v3986_v60 = vsel %vm8568_vm4, %v8249_v54, %v3983_v37  ;;  %v3897_v55 = vsel %vm3886_vm5, nan, %v3896_v46  ;;  %v4037_v28 = vmul.f32 %v8511_v48, %v3481_v47  ;;  %v3579_v56 = vxor.u32 2147483648, %v4657_v32 }
 0x4a4   : > { %4658 = vcosq.f32 %v3986_v60  ;;  %v3582_v0 = vxor.u32 2147483648, %v4655_v11  ;;  %v4054_v1 = vadd.f32 %v4053_v10, %v4040_v18  ;;  %v8921_v2 = vxor.u32 2147483648, %v8920_v8 }
 0x4a5   : > { %4660 = vsinq.f32 %v3986_v60  ;;  %v8923_v41 = vxor.u32 2147483648, %v8922_v40  ;;  %v4061_v12 = vadd.f32 %v8466_v13, %v8924_v61  ;;  %vm3162_vm15 = vcmp.eq.s32.totalorder %v8469_v30, 0 }
 0x4a6   : > { %v2748_v3 = vsel %vm2746_vm13, %v8922_v40, %v8921_v2  ;;  %vm3165_vm14 = vcmp.eq.s32.totalorder %v8469_v30, 2  ;;  %v4045_v5 = vadd.f32 %v4044_v25, %v4039_v45  ;;  %v4041_v19 = vmul.f32 %v8561_v26, %v3897_v55 }
 0x4a7   : > { %v2751_v44 = vsel %vm2749_vm9, %v8923_v41, %v8920_v8  ;;  %v3987_v33 = vsel %vm8568_vm4, 0, %v3985_v51  ;;  %v3164_v15 = vsel %vm3162_vm15, %v8352_v52, %v3163_v16  ;;  %v3167_v31 = vsel %vm3165_vm14, %v3166_v53, %v8544_v63  ;;  %v8925_v53 = vld [vmem:[#allocation12_spill] sm:$0xff]  ;;  %v4082_v51 = vpop.permute.xlu0 %4081 }
 0x4a8   : > { %vm3578_vm6 = vcmp.eq.s32.totalorder %v3576_v42, 0  ;;  %vm3581_vm8 = vcmp.eq.s32.totalorder %v3576_v42, 2  ;;  %v4062_v29 = vadd.f32 %v4061_v12, %v4037_v28  ;;  %v4055_v4 = vrot.slane %v4054_v1, 4 }
 0x4a9   : > { %v3580_v13 = vsel %vm3578_vm6, %v4655_v11, %v3579_v56  ;;  %v3583_v59 = vsel %vm3581_vm8, %v3582_v0, %v4657_v32  ;;  %vm2745_vm7 = vcmp.lt.s32.totalorder %v8915_v27, 2  ;;  %vm3161_vm10 = vcmp.lt.s32.totalorder %v8469_v30, 2 }
 0x4aa   : > { %v3991_v36 = vadd.s32 3, %v3987_v33  ;;  %v3168_v20 = vsel %vm3161_vm10, %v3164_v15, %v3167_v31  ;;  %vm3577_vm11 = vcmp.lt.s32.totalorder %v3576_v42, 2  ;;  %v4046_v23 = vrot.slane %v4045_v5, 4  ;;  %v8928_v15 = vld [vmem:[#allocation6_spill] sm:$0xff] }
 0x4ab   : > { %v4063_v49 = vadd.f32 %v4062_v29, %v4041_v19  ;;  %v2752_v50 = vsel %vm2745_vm7, %v2748_v3, %v2751_v44  ;;  %v3584_v35 = vsel %vm3577_vm11, %v3580_v13, %v3583_v59  ;;  %vm3158_vm13 = vweird.f32 %v7198_v14 }
 0x4ac   : > { %v4056_v52 = vadd.f32 %v4055_v4, %v4054_v1  ;;  %vm2742_vm9 = vweird.f32 %v8925_v53  ;;  %v3169_v63 = vsel %vm3158_vm13, nan, %v3168_v20  ;;  %vm3574_vm0 = vweird.f32 %v8909_v38 }
 0x4ad   : > { %v3992_v11 = vand.u32 3, %v3991_v36  ;;  %v2753_v34 = vsel %vm2742_vm9, nan, %v2752_v50  ;;  %v3585_v27 = vsel %vm3574_vm0, nan, %v3584_v35  ;;  %v4047_v9 = vadd.f32 %v4046_v23, %v4045_v5 }
 0x4ae   : > { %v4064_v30 = vrot.slane %v4063_v49, 4  ;;  %v4034_v24 = vmul.f32 %v8907_v57, %v3169_v63  ;;  %v4057_v43 = vrot.slane %v4056_v52, 2  ;;  %v4030_v17 = vmul.f32 %v8926_v22, %v2753_v34 }
 0x4af   : > { %v4038_v14 = vmul.f32 %v8511_v48, %v3585_v27  ;;  %vm3997_vm1 = vcmp.eq.s32.totalorder %v3992_v11, 2  ;;  %v4048_v46 = vrot.slane %v4047_v9, 2  ;;  %vm3994_vm2 = vcmp.eq.s32.totalorder %v3992_v11, 0 }
 0x4b0   : > { %v4065_v18 = vadd.f32 %v4064_v30, %v4063_v49  ;;  %vm3993_vm12 = vcmp.lt.s32.totalorder %v3992_v11, 2  ;;  %v4070_v62 = vadd.f32 %v4034_v24, %v4030_v17  ;;  %vm3990_vm3 = vweird.f32 %v8249_v54  ;;  %v8927_v54 = vld [vmem:[#allocation7_spill] sm:$0xff] }
 0x4b1   : > { %v4659_v39 = vpop.eup %4658  ;;  %v4058_v16 = vadd.f32 %v4057_v43, %v4056_v52  ;;  %v4049_v60 = vadd.f32 %v4048_v46, %v4047_v9  ;;  %v4733_v0 = vmov 1966171168   ;;  %v4087_v8 = vrot.slane %v4082_v51, %v8927_v54 }
 0x4b2   : > { %v4661_v32 = vpop.eup %4660  ;;  %v3998_v7 = vxor.u32 2147483648, %v4659_v39  ;;  %v4071_v58 = vadd.f32 %v4070_v62, %v4038_v14  ;;  %v4066_v25 = vrot.slane %v4065_v18, 2  ;;  %v4099_v1 = vunpack.c.l.s4 %v4733_v0 }
 0x4b3   : > { %v3995_v6 = vxor.u32 2147483648, %v4661_v32  ;;  %v4059_v10 = vrot.slane %v4058_v16, 1  ;;  %v4050_v42 = vrot.slane %v4049_v60, 1  ;;  %v8929_v23 = vlaneseq }
 0x4b4   : > { %v3999_v38 = vsel %vm3997_vm1, %v3998_v7, %v4661_v32  ;;  %v4067_v55 = vadd.f32 %v4066_v25, %v4065_v18  ;;  %v4100_v44 = vunpack.c.0.s8 %v4099_v1 }
 0x4b5   : > { %v3996_v21 = vsel %vm3994_vm2, %v4659_v39, %v3995_v6  ;;  %v4060_v56 = vadd.f32 %v4059_v10, %v4058_v16  ;;  %v4051_v40 = vadd.f32 %v4050_v42, %v4049_v60  ;;  %vm4123_vm4 = vcmp.lt.s32.totalorder %v8929_v23, 512 }
 0x4b6   : > { %v4000_v37 = vsel %vm3993_vm12, %v3996_v21, %v3999_v38  ;;  %v4068_v3 = vrot.slane %v4067_v55, 1  ;;  %v4103_v31 = vsub.s32 %v4100_v44, %v8928_v15 }
 0x4b7   : > { %v4001_v57 = vsel %vm3990_vm3, nan, %v4000_v37  ;;  %v4088_v5 = vadd.f32 %v4087_v8, %v4051_v40 }
 0x4b8   : > { %v4042_v47 = vmul.f32 %v8561_v26, %v4001_v57  ;;  %v4089_v26 = vadd.f32 %v4087_v8, %v4060_v56  ;;  %v4069_v61 = vadd.f32 %v4068_v3, %v4067_v55 }
 0x4ba   : > { %v4072_v48 = vadd.f32 %v4071_v58, %v4042_v47  ;;  %v4096_v33 = vcombine.low %v4088_v5, %v4089_v26  ;;  %v4090_v29 = vadd.f32 %v4087_v8, %v4069_v61 }
 0x4bc   : > { %v4073_v45 = vrot.slane %v4072_v48, 4  ;;  %v4104_v4 = vrot.slane %v4096_v33, %v4103_v31 }
 0x4be   : > { %v4074_v28 = vadd.f32 %v4073_v45, %v4072_v48 }
 0x4c0   : > { %v4075_v2 = vrot.slane %v4074_v28, 2 }
 0x4c2   : > { %v4076_v41 = vadd.f32 %v4075_v2, %v4074_v28 }
 0x4c4   : > { %v4077_v12 = vrot.slane %v4076_v41, 1 }
 0x4c6   : > { %v4078_v19 = vadd.f32 %v4077_v12, %v4076_v41 }
 0x4c8   : > { %v4091_v13 = vadd.f32 %v4087_v8, %v4078_v19 }
 0x4ca   : > { %v4097_v59 = vcombine.low %v4090_v29, %v4091_v13 }
 0x4cc   : > { %v4111_v36 = vrot.slane %v4097_v59, %v4103_v31 }
 0x4ce   : > { %v4112_v20 = vcombine.low %v4104_v4, %v4111_v36 }
 0x4d0   : > { %v4119_v49 = vrot.slane %v4112_v20, %v4103_v31 }
 0x4d2   : > { %4125 = vst.msk [vmem:[%s274_s17] sm:$0xf] %vm4123_vm4, %v4119_v49 }
 0x4d3   : > { %4675 = shalt.err (!%p4672_p3)
}
 0x4d4   : > { %s4676_s30 = scalar_lea.hbm %s4139_s21, 64  ;;  %s4680_s14 = scalar_lea.hbm %s8664_s7, 128 }
 0x4d5   : > { %p4677_p4 = scmp.ne.s32.totalorder %s4139_s21, %s4676_s30  ;;  %p4681_p9 = scmp.lt.s32.totalorder %s4139_s21, %s8664_s7 }
 0x4d6   : > { %p4682_p10 = scmp.lt.s32.totalorder %s4680_s14, %s4676_s30 }
 0x4d7   : > { %p4678_p7 = pnand %p4677_p4, %p4816_p5 }
 0x4d8   : > { %p4683_p11 = por %p4682_p10, %p4681_p9 }
 0x4d9   : > { %p4679_p8 = pneg %p4678_p7 }
 0x4db   : > { %p4684_p12 = pnand %p4683_p11, %p4679_p8 }
 0x4dd   : > { %4687 = shalt.err (!%p4684_p12)
}
 0x4de   : > { %4478 = dma.vmem_to_hbm [thread:$0]  (%p4816_p5), %s4142_s18, 64, %s4139_s21, %s4127_s22  }
 0x4df PF: > { %p4484_p13 = scmp.ge.s32.totalorder %s4722_s29, 2  ;;  %s4153_s17 = sand.u32 1, %s4710_s26  }
 0x4e0   : > { %s4154_s19 = scalar_lea.sflag [#allocation4], %s4153_s17 }
 0x4e1   : > { %p4481_p0 = pnand %p4484_p13, %p4820_p6 }
 0x4e3   : > { %p4482_p1 = pneg %p4481_p0 }
 0x4e5   : > { %4705 = dma.done.wait (%p4482_p1), %s4154_s19, 64  }
 0x4e6   : > { %4707 = vsyncadd (%p4482_p1), %s4154_s19, 4294967232  ;;  %p19_p2 = scmp.ge.s32.totalorder %s4803_s8, 4   ;;  %s8930_s26 = smov %s4714_s27 }
 0x4e7   : > { %s8931_s27 = smov %s4718_s28  ;;  %s8932_s28 = smov %s4814_s11 }
 0x4e8   : > { %s8933_s29 = smov %s4803_s8  ;;  %21 = sbr.rel (!%p19_p2) target bundleno = 6 (0x6), region = 84 }
 0x4ed   :  { %4159 = vsyncpa [#allocation4], 1 }
 0x4ee   :  { %4161 = vsyncpa [#allocation4 + $0x1], 1 }

</bundles_post_ra>
